<compile_context>
chip_gen: v7x
topology: tpu7x:2x2x1
jax: 0.10.0
libtpu: 0.0.40
codegen_flags: <defaults>
</compile_context>

<pallas_src>
import functools
import math

import jax
import jax.numpy as jnp
from jax.experimental import pallas as pl
from jax.experimental.pallas import tpu as pltpu


def _attn_kernel(*refs, scale, with_bias):
    """Attention over a block of HB heads.

    q_ref/k_ref/v_ref/o_ref: (HB, C, T) tiles in VMEM.
    bias_ref (optional):     (T, T) f32 additive mask (0 / -inf), shared by all
                             heads and all grid steps (constant block index).
    """
    if with_bias:
        q_ref, k_ref, v_ref, bias_ref, o_ref = refs
    else:
        q_ref, k_ref, v_ref, o_ref = refs
        bias_ref = None

    q = q_ref[...]
    k = k_ref[...]
    v = v_ref[...]

    # Fold the full softmax scale (1/sqrt(ch)) into q only; operands keep the
    # input dtype so bf16 inputs hit the MXU's fast bf16 path.
    q = q * jnp.asarray(scale, q.dtype)

    # Present the QK^T LHS as (T, C): contraction over the last LHS dim and the
    # second-to-last RHS dim is MXU-natural, so no hidden XLU transpose fights
    # the softmax row reductions for XLU ports.
    q_t = jnp.swapaxes(q, 1, 2)                                # (HB, T, C)

    # w[h, t, s] = sum_c q_t[h, t, c] * k[h, c, s]  (f32 accumulation)
    w = jax.lax.dot_general(
        q_t, k, (((2,), (1,)), ((0,), (0,))),
        preferred_element_type=jnp.float32)                    # (HB, T, S)

    if with_bias:
        w = w + bias_ref[...][None, :, :]

    # Numerically-stable softmax in f32; normalization is deferred to the
    # (C, T) output (smaller than (T, S)).
    w = w - jnp.max(w, axis=-1, keepdims=True)
    p = jnp.exp(w)
    l = jnp.sum(p, axis=-1)                                    # (HB, T)

    # a[h, c, t] = sum_s v[h, c, s] * p[h, t, s]
    a = jax.lax.dot_general(
        v, p.astype(v.dtype), (((2,), (2,)), ((0,), (0,))),
        preferred_element_type=jnp.float32)                    # (HB, C, T)

    a = a * pl.reciprocal(l, approx=True)[:, None, :]          # EUP divide
    o_ref[...] = a.astype(o_ref.dtype)


def _pick_head_block(n_heads, ch, t_pad, itemsize,
                     vmem_budget_bytes=20 * 1024 * 1024, hb_cap=8):
    """Largest divisor of n_heads that keeps the per-step VMEM footprint small.

    hb_cap=8 is conservative for v7x's 64 MiB VMEM; v5e/v6e (128 MiB) could use
    up to 16.
    """
    per_head = (
        2 * 4 * ch * t_pad * itemsize        # double-buffered q/k/v/out tiles
        + 3 * t_pad * t_pad * 4              # (T,S) logits / exp / cast temps
        + t_pad * ch * 4)                    # q^T copy
    cap = max(1, min(hb_cap, vmem_budget_bytes // max(per_head, 1)))
    hb = 1
    for d in range(1, n_heads + 1):
        if n_heads % d == 0 and d <= cap:
            hb = d
    return hb


def qkv_attention(qkv, n_heads, use_causal_mask=False):
    """Pallas equivalent of QKVAttention.forward.

    qkv: [N, 3*H*C, T]  ->  returns [N, H*C, T]
    """
    bs, width, length = qkv.shape
    assert width % (3 * n_heads) == 0
    ch = width // (3 * n_heads)
    scale = 1.0 / math.sqrt(ch)  # == (1/ch**0.25) applied to both q and k

    # Free view of qkv; NO jnp.split / reshape copies materialized in HBM.
    qkv5 = qkv.reshape(bs, 3, n_heads, ch, length)

    # Lane-dense T: pad to a multiple of 128 (padded key columns are masked).
    t_pad = max(128, ((length + 127) // 128) * 128)
    if t_pad != length:
        qkv5 = jnp.pad(qkv5, ((0, 0),) * 4 + ((0, t_pad - length),))

    with_bias = use_causal_mask or (t_pad != length)
    bias = None
    if with_bias:
        # Built once on the host side of the kernel; resident in VMEM because
        # its block index is constant across the whole grid.
        s_idx = jnp.arange(t_pad)[None, :]
        allowed = s_idx < length
        if use_causal_mask:
            allowed = allowed & (s_idx <= jnp.arange(t_pad)[:, None])
        bias = jnp.where(allowed, 0.0, -jnp.inf).astype(jnp.float32)

    hb = _pick_head_block(n_heads, ch, t_pad, jnp.dtype(qkv.dtype).itemsize)
    grid = (bs, n_heads // hb)

    def qkv_spec(slot):
        return pl.BlockSpec(
            (pl.Squeezed(), pl.Squeezed(), hb, ch, t_pad),
            lambda n, h, slot=slot: (n, slot, h, 0, 0))

    in_specs = [qkv_spec(0), qkv_spec(1), qkv_spec(2)]
    args = [qkv5, qkv5, qkv5]
    if with_bias:
        in_specs.append(pl.BlockSpec((t_pad, t_pad), lambda n, h: (0, 0)))
        args.append(bias)

    out = pl.pallas_call(
        functools.partial(_attn_kernel, scale=scale, with_bias=with_bias),
        out_shape=jax.ShapeDtypeStruct((bs, n_heads, ch, t_pad), qkv.dtype),
        grid=grid,
        in_specs=in_specs,
        out_specs=pl.BlockSpec((pl.Squeezed(), hb, ch, t_pad),
                               lambda n, h: (n, h, 0, 0)),
        compiler_params=pltpu.CompilerParams(
            dimension_semantics=("parallel", "parallel")),
    )(*args)

    # TODO(synk): for very long sequences (where (T,T) f32 logits no longer fit
    # VMEM, especially v7x's 64 MiB) add an 'arbitrary' grid axis over key tiles
    # with an online-softmax (flash) accumulator instead of full (T,T) logits.

    if t_pad != length:
        out = out[..., :length]
    return out.reshape(bs, n_heads * ch, length)


def _reference(qkv, n_heads, use_causal_mask=False):
    """Pure-JAX reference mirroring the PyTorch forward, for validation."""
    bs, width, length = qkv.shape
    ch = width // (3 * n_heads)
    q, k, v = jnp.split(qkv, 3, axis=1)
    q = q.reshape(bs * n_heads, ch, length)
    k = k.reshape(bs * n_heads, ch, length)
    v = v.reshape(bs * n_heads, ch, length)
    s = 1.0 / math.sqrt(math.sqrt(ch))
    w = jnp.einsum('bct,bcs->bts', q * s, k * s)
    if use_causal_mask:
        mask = jnp.tril(jnp.ones((length, length)))[None]
        w = jnp.where(mask == 0, -jnp.inf, w)
    w = jax.nn.softmax(w.astype(jnp.float32), axis=-1).astype(w.dtype)
    a = jnp.einsum('bts,bcs->bct', w, v)
    return a.reshape(bs, -1, length)


if __name__ == "__main__":
    key = jax.random.PRNGKey(0)
    k0, k1 = jax.random.split(key)

    # Main shape: lane-dense T (multiple of 128), 8 heads batched per block.
    N, H, C, T = 2, 8, 16, 128
    qkv = jax.random.normal(k0, (N, 3 * H * C, T), dtype=jnp.float32)

    out = jax.block_until_ready(qkv_attention(qkv, n_heads=H,
                                              use_causal_mask=False))
    ref = _reference(qkv, H, False)
    assert out.shape == (N, H * C, T)
    assert jnp.allclose(out, ref, atol=2e-3, rtol=2e-3)

    out_c = jax.block_until_ready(qkv_attention(qkv, n_heads=H,
                                                use_causal_mask=True))
    ref_c = _reference(qkv, H, True)
    assert jnp.allclose(out_c, ref_c, atol=2e-3, rtol=2e-3)

    # Non-multiple-of-128 T exercises the pad + key-mask path.
    N2, H2, C2, T2 = 1, 4, 16, 48
    qkv2 = jax.random.normal(k1, (N2, 3 * H2 * C2, T2), dtype=jnp.float32)
    out2 = jax.block_until_ready(qkv_attention(qkv2, n_heads=H2,
                                               use_causal_mask=True))
    ref2 = _reference(qkv2, H2, True)
    assert out2.shape == (N2, H2 * C2, T2)
    assert jnp.allclose(out2, ref2, atol=2e-3, rtol=2e-3)

    print("KERNEL_OK")
</pallas_src>

<mosaic_0001>
module attributes {stable_mosaic.version = 11 : i64} {
  func.func @_attn_kernel(%arg0: i32, %arg1: i32, %arg2: memref<1x1x8x16x128xf32, #tpu.memory_space<vmem>>, %arg3: memref<1x1x8x16x128xf32, #tpu.memory_space<vmem>>, %arg4: memref<1x1x8x16x128xf32, #tpu.memory_space<vmem>>, %arg5: memref<1x8x16x128xf32, #tpu.memory_space<vmem>>) attributes {dimension_semantics = [#tpu.dimension_semantics<parallel>, #tpu.dimension_semantics<parallel>], iteration_bounds = array<i64: 2, 1>, scalar_prefetch = 0 : i64, scratch_operands = 0 : i64, tpu.core_type = #tpu.core_type<tc>, window_params = [{transform_indices = @transform_0, window_bounds = array<i64: 1, 1, 8, 16, 128>}, {transform_indices = @transform_1, window_bounds = array<i64: 1, 1, 8, 16, 128>}, {transform_indices = @transform_2, window_bounds = array<i64: 1, 1, 8, 16, 128>}, {transform_indices = @transform_3, window_bounds = array<i64: 1, 8, 16, 128>}]} {
    %c0 = arith.constant 0 : index
    %c0_0 = arith.constant 0 : index
    %c0_1 = arith.constant 0 : index
    %c0_2 = arith.constant 0 : index
    %c0_3 = arith.constant 0 : index
    %0 = vector.load %arg2[%c0, %c0_0, %c0_1, %c0_2, %c0_3] : memref<1x1x8x16x128xf32, #tpu.memory_space<vmem>>, vector<1x1x8x16x128xf32>
    %1 = vector.shape_cast %0 : vector<1x1x8x16x128xf32> to vector<8x16x128xf32>
    %c0_4 = arith.constant 0 : index
    %c0_5 = arith.constant 0 : index
    %c0_6 = arith.constant 0 : index
    %c0_7 = arith.constant 0 : index
    %c0_8 = arith.constant 0 : index
    %2 = vector.load %arg3[%c0_4, %c0_5, %c0_6, %c0_7, %c0_8] : memref<1x1x8x16x128xf32, #tpu.memory_space<vmem>>, vector<1x1x8x16x128xf32>
    %3 = vector.shape_cast %2 : vector<1x1x8x16x128xf32> to vector<8x16x128xf32>
    %c0_9 = arith.constant 0 : index
    %c0_10 = arith.constant 0 : index
    %c0_11 = arith.constant 0 : index
    %c0_12 = arith.constant 0 : index
    %c0_13 = arith.constant 0 : index
    %4 = vector.load %arg4[%c0_9, %c0_10, %c0_11, %c0_12, %c0_13] : memref<1x1x8x16x128xf32, #tpu.memory_space<vmem>>, vector<1x1x8x16x128xf32>
    %5 = vector.shape_cast %4 : vector<1x1x8x16x128xf32> to vector<8x16x128xf32>
    %cst = arith.constant 2.500000e-01 : f32
    %6 = vector.broadcast %cst : f32 to vector<8x16x128xf32>
    %7 = arith.mulf %1, %6 : vector<8x16x128xf32>
    %8 = tpu.transpose %7, [0, 2, 1] : vector<8x16x128xf32> -> vector<8x128x16xf32>
    %cst_14 = arith.constant dense<0.000000e+00> : vector<8x128x128xf32>
    %9 = tpu.matmul %8, %3, %cst_14 {dimension_numbers = #tpu.dot_dimension_numbers<[2], [1], [1], [2], [0, 0, 0, 1, 1, 2], [0], [0]>} : vector<8x128x16xf32>, vector<8x16x128xf32>, vector<8x128x128xf32> -> vector<8x128x128xf32>
    %cst_15 = arith.constant dense<0xFF800000> : vector<8x128xf32>
    %10 = vector.multi_reduction <maximumf>, %9, %cst_15 [2] : vector<8x128x128xf32> to vector<8x128xf32>
    %11 = vector.shape_cast %10 : vector<8x128xf32> to vector<8x128x1xf32>
    %12 = vector.broadcast %11 : vector<8x128x1xf32> to vector<8x128x128xf32>
    %13 = arith.subf %9, %12 : vector<8x128x128xf32>
    %14 = math.exp %13 : vector<8x128x128xf32>
    %cst_16 = arith.constant dense<0.000000e+00> : vector<8x128xf32>
    %15 = vector.multi_reduction <add>, %14, %cst_16 [2] : vector<8x128x128xf32> to vector<8x128xf32>
    %cst_17 = arith.constant dense<0.000000e+00> : vector<8x16x128xf32>
    %16 = tpu.matmul %5, %14, %cst_17 {dimension_numbers = #tpu.dot_dimension_numbers<[2], [2], [1], [1], [0, 0, 0, 1, 1, 1], [0], [0]>} : vector<8x16x128xf32>, vector<8x128x128xf32>, vector<8x16x128xf32> -> vector<8x16x128xf32>
    %17 = tpu.reciprocal %15 {approx = true} : vector<8x128xf32> -> vector<8x128xf32>
    %18 = vector.shape_cast %17 : vector<8x128xf32> to vector<8x1x128xf32>
    %19 = vector.broadcast %18 : vector<8x1x128xf32> to vector<8x16x128xf32>
    %20 = arith.mulf %16, %19 : vector<8x16x128xf32>
    %c0_18 = arith.constant 0 : index
    %c0_19 = arith.constant 0 : index
    %c0_20 = arith.constant 0 : index
    %c0_21 = arith.constant 0 : index
    %21 = vector.load %arg5[%c0_18, %c0_19, %c0_20, %c0_21] : memref<1x8x16x128xf32, #tpu.memory_space<vmem>>, vector<1x8x16x128xf32>
    %22 = vector.shape_cast %21 : vector<1x8x16x128xf32> to vector<8x16x128xf32>
    %23 = vector.shape_cast %20 : vector<8x16x128xf32> to vector<1x8x16x128xf32>
    tpu.vector_store %arg5[%c0_18, %c0_19, %c0_20, %c0_21], %23 {strides = array<i32>} : memref<1x8x16x128xf32, #tpu.memory_space<vmem>>, vector<1x8x16x128xf32>,
    return
  }
  func.func @transform_0(%arg0: i32, %arg1: i32) -> (i32, i32, i32, i32, i32) {
    %c0_i32 = arith.constant 0 : i32
    %c0_i32_0 = arith.constant 0 : i32
    %c0_i32_1 = arith.constant 0 : i32
    %c0_i32_2 = arith.constant 0 : i32
    return %arg0, %c0_i32, %arg1, %c0_i32_0, %c0_i32_1 : i32, i32, i32, i32, i32
  }
  func.func @transform_1(%arg0: i32, %arg1: i32) -> (i32, i32, i32, i32, i32) {
    %c1_i32 = arith.constant 1 : i32
    %c0_i32 = arith.constant 0 : i32
    %c0_i32_0 = arith.constant 0 : i32
    %c0_i32_1 = arith.constant 0 : i32
    return %arg0, %c1_i32, %arg1, %c0_i32, %c0_i32_0 : i32, i32, i32, i32, i32
  }
  func.func @transform_2(%arg0: i32, %arg1: i32) -> (i32, i32, i32, i32, i32) {
    %c2_i32 = arith.constant 2 : i32
    %c0_i32 = arith.constant 0 : i32
    %c0_i32_0 = arith.constant 0 : i32
    %c0_i32_1 = arith.constant 0 : i32
    return %arg0, %c2_i32, %arg1, %c0_i32, %c0_i32_0 : i32, i32, i32, i32, i32
  }
  func.func @transform_3(%arg0: i32, %arg1: i32) -> (i32, i32, i32, i32) {
    %c0_i32 = arith.constant 0 : i32
    %c0_i32_0 = arith.constant 0 : i32
    %c0_i32_1 = arith.constant 0 : i32
    return %arg0, %arg1, %c0_i32, %c0_i32_0 : i32, i32, i32, i32
  }
}

</mosaic_0001>

<bundles_post_ra>
// kernel: tpu_custom_call.1
= control target key start
LH: loop header
LB: loop body
LE: loop exit
PB: predicated region body
PF: predicated region fallthrough
CT: control target
= control target key end

     0   :  { %s8818_s0 = inlined_call_operand.hbm [shape: f32[2,3,8,16,128], index: 0, kind: input, shape index: {}]   ;;  %s8819_s1 = inlined_call_operand.hbm [shape: f32[2,3,8,16,128], index: 1, kind: input, shape index: {}]   ;;  %s8820_s2 = inlined_call_operand.hbm [shape: f32[2,3,8,16,128], index: 2, kind: input, shape index: {}]   ;;  %s8821_s3 = inlined_call_operand.hbm [shape: f32[2,8,16,128], index: 3, kind: output, shape index: {}]  }
   0x1   :  { %8917 = sst [smem:[#allocation89_spill]] %s8818_s0 }
   0x2   :  { %8918 = sst [smem:[#allocation90_spill]] %s8819_s1 }
   0x3   :  { %8 = vsyncpa [#allocation3], 0 }
   0x4   :  { %10 = vsyncpa [#allocation3 + $0x1], 0 }
   0x5   :  { %11 = vsyncpa [#allocation6], 0 }
   0x6   :  { %13 = vsyncpa [#allocation6 + $0x1], 0 }
   0x7   :  { %14 = vsyncpa [#allocation4], 0 }
   0x8   :  { %16 = vsyncpa [#allocation4 + $0x1], 0  ;;  %s6858_s12 = smov 0   ;;  %s6860_s13 = smov 0  }
   0x9   :  { %s6862_s14 = smov 0   ;;  %s6864_s15 = smov 0  }
   0xa   :  { %s6866_s16 = smov 0   ;;  %s6868_s17 = smov 0  }
   0xb LB: > { %8919 = sst [smem:[#allocation12_spill]] %s6824_s16  ;;  %s6889_s18 = sadd.s32 4294967295, %s6828_s17   ;;  %s6828_s17 = sphi %s6868_s17, %s22_s17   ;;  %s6824_s16 = sphi %s6866_s16, %s9112_s16   ;;  %s6820_s15 = sphi %s6864_s15, %s9111_s15   ;;  %s6816_s14 = sphi %s6862_s14, %s9115_s14   ;;  %s6812_s13 = sphi %s6860_s13, %s9114_s13   ;;  %s6808_s12 = sphi %s6858_s12, %s9113_s12  }
   0xc   : > { %s4832_s19 = sadd.s32 4294967294, %s6828_s17   ;;  %s34_s20 = sadd.s32 1, %s6824_s16 }
   0xd   : > { %s43_s21 = sadd.s32 1, %s6816_s14  ;;  %p36_p0 = scmp.ge.s32.totalorder %s34_s20, 2 }
   0xe   : > { %p50_p1 = scmp.ne.s32.totalorder %s6816_s14, %s6812_s13  ;;  %p51_p2 = scmp.eq.s32.totalorder %s6828_s17, 0 }
   0xf   : > { %p56_p3 = scmp.ne.s32.totalorder %s6812_s13, %s6808_s12  ;;  %s9117_s20 = smov (%p36_p0, %s34_s20), 0 }
  0x10   : > { %8920 = sst [smem:[#allocation13_spill]] %s9117_s20  ;;  %p6901_p4 = por %p51_p2, %p50_p1 }
  0x11   : > { %p57_p5 = scmp.eq.s32.totalorder %s6889_s18, 0  ;;  %s38_s23 = ssub.s32 %s6824_s16, %s9117_s20 }
  0x12   : > { %p138_p6 = scmp.eq.s32.totalorder %s6889_s18, 1  ;;  %p41_p7 = scmp.eq.s32.totalorder %s38_s23, 0 }
  0x13   : > { %p6909_p8 = por %p57_p5, %p56_p3  ;;  %p144_p10 = scmp.eq.s32.totalorder %s4832_s19, 1 }
  0x14   : > { %p6913_p9 = por %p138_p6, %p50_p1  ;;  %p6083_p13 = scmp.lt.s32.totalorder %s6828_s17, 2 }
  0x15   : > { %s8922_s24 = scalar_select %p6909_p8, 1, 0 }
  0x16   : > { %s8923_s25 = scalar_select %p6913_p9, 1, 0 }
  0x17   : > { %s6918_s26 = scalar_select %p41_p7, %s6816_s14, %s43_s21  }
  0x18   : > { %p6920_p11 = por %p144_p10, %p56_p3  ;;  %s8822_s28 = sand.u32 1, %s6816_s14  }
  0x19   : > { %s6929_s29 = sshll.u32 %s8822_s28, 7  ;;  %s6932_s30 = smul.u32 6144, %s6824_s16 }
  0x1a   : > { %s8924_s27 = scalar_select %p6920_p11, 1, 0 }
  0x1b   : > { %p6936_p0 = pnand %p6083_p13, %p6901_p4  ;;  %s188_s5 = sand.u32 1, %s6828_s17  }
  0x1c   : > { %s8926_s1 = sld [smem:[#allocation90_spill]]  ;;  %s192_s10 = scalar_lea.vmem [#allocation5], %s6929_s29 }
  0x1d   : > { %s203_s11 = sshll.u32 %s192_s10, 4  ;;  %s6951_s19 = scalar_lea.sflag [#allocation6], %s188_s5  ;;  %s6948_s11 = int_to_ptr.vmem [resolvable:$true] %s203_s11 }
  0x1e   : > { %p6956_p3 = pneg %p6936_p0 }
  0x22   : > { %s4738_s8 = scalar_lea.hbm %s8926_s1, %s6932_s30  ;;  %s6655_s7 = scalar_lea.hbm %s8926_s1, 12288 }
  0x23   : > { %s6945_s9 = scalar_lea.hbm %s4738_s8, 2048  ;;  %s6680_s21 = scalar_lea.hbm %s4738_s8, 4096 }
  0x24   : > { %p6651_p2 = scmp.ne.s32.totalorder %s6945_s9, %s6680_s21  ;;  %p6656_p6 = scmp.lt.u32.totalorder %s6945_s9, %s8926_s1 }
  0x25   : > { %p6657_p7 = scmp.lt.u32.totalorder %s6655_s7, %s6680_s21  ;;  %p6659_p13 = scmp.lt.u32.totalorder %s6680_s21, %s6945_s9 }
  0x26   : > { %p6653_p4 = pnand %p6956_p3, %p6651_p2 }
  0x27   : > { %p6658_p10 = por %p6657_p7, %p6656_p6 }
  0x28   : > { %p6654_p5 = pneg %p6653_p4 }
  0x29   : > { %p6660_p12 = por %p6659_p13, %p6658_p10 }
  0x2b   : > { %p6661_p1 = pnand %p6660_p12, %p6654_p5 }
  0x2d   : > { %6664 = shalt.err (!%p6661_p1)
}
  0x2e   : > { %s6665_s5 = scalar_lea.vmem %s6948_s11, 2048  ;;  %s6830_s8 = smov [#allocation5]  }
  0x2f   : > { %p6666_p2 = scmp.ne.s32.totalorder %s6948_s11, %s6665_s5  ;;  %s6670_s23 = sshll.u32 %s6830_s8, 4  ;;  %s6671_s23 = int_to_ptr.vmem [resolvable:$false] %s6670_s23 }
  0x30   : > { %s6672_s28 = scalar_lea.vmem %s6671_s23, 4096  ;;  %p6673_p9 = scmp.lt.s32.totalorder %s6948_s11, %s6671_s23 }
  0x31   : > { %p6668_p4 = pnand %p6666_p2, %p6956_p3  ;;  %p6674_p8 = scmp.lt.s32.totalorder %s6672_s28, %s6665_s5 }
  0x33   : > { %p6669_p11 = pneg %p6668_p4  ;;  %p6675_p6 = por %p6674_p8, %p6673_p9 }
  0x35   : > { %p6676_p7 = pnand %p6675_p6, %p6669_p11 }
  0x37   : > { %6679 = shalt.err (!%p6676_p7)
}
  0x38   : > { %s8825_s21 = smov 128   ;;  %s8827_s6 = smov 8  }
  0x39   : > { %6075 = dma.hbm_to_vmem [thread:$0]  (!%p6936_p0), %s6945_s9, 2048, %s6948_s11, %s6951_s19, %s8825_s21, %s8825_s21, %s8827_s6  }
  0x3a   : > { %p236_p8 = scmp.lt.s32.totalorder %s6828_s17, 3  ;;  %p8928_p9 = scmp.ge.s32.totalorder %s6828_s17, 1 }
  0x3b   : > { %s8930_s0 = sld [smem:[#allocation89_spill]]  ;;  %s168_s23 = scalar_lea.vmem [#allocation2], %s6929_s29 }
  0x3c   : > { %p6986_p11 = pnand %p8928_p9, %p236_p8  ;;  %s178_s28 = sshll.u32 %s168_s23, 4  ;;  %s6997_s28 = int_to_ptr.vmem [resolvable:$true] %s178_s28 }
  0x3d   : > { %s8931_s9 = sand.u32 1, %s6816_s14  }
  0x3e   : > { %s8929_s7 = scalar_select %p6986_p11, 1, 0 }
  0x3f   : > { %s7001_s11 = scalar_lea.sflag [#allocation3], %s8931_s9 }
  0x41   : > { %s6994_s8 = scalar_lea.hbm %s8930_s0, %s6932_s30  ;;  %s6686_s5 = scalar_lea.hbm %s8930_s0, 12288 }
  0x42   : > { %s6681_s21 = scalar_lea.hbm %s6994_s8, 2048  ;;  %p6687_p10 = scmp.lt.u32.totalorder %s6994_s8, %s8930_s0 }
  0x43   : > { %p6682_p12 = scmp.ne.s32.totalorder %s6994_s8, %s6681_s21  ;;  %p6688_p13 = scmp.lt.u32.totalorder %s6686_s5, %s6681_s21 }
  0x44   : > { %p6690_p4 = scmp.lt.u32.totalorder %s6681_s21, %s6994_s8 }
  0x45   : > { %p6684_p1 = pnand %p6682_p12, %p6956_p3  ;;  %p6689_p2 = por %p6688_p13, %p6687_p10 }
  0x47   : > { %p6685_p5 = pneg %p6684_p1  ;;  %p6691_p6 = por %p6690_p4, %p6689_p2 }
  0x49   : > { %p6692_p7 = pnand %p6691_p6, %p6685_p5 }
  0x4b   : > { %6695 = shalt.err (!%p6692_p7)
}
  0x4c   : > { %s6696_s23 = scalar_lea.vmem %s6997_s28, 2048  ;;  %s6833_s6 = smov [#allocation2]  }
  0x4d   : > { %p6697_p8 = scmp.ne.s32.totalorder %s6997_s28, %s6696_s23  ;;  %s6701_s9 = sshll.u32 %s6833_s6, 4  ;;  %s6702_s9 = int_to_ptr.vmem [resolvable:$false] %s6701_s9 }
  0x4e   : > { %s6703_s1 = scalar_lea.vmem %s6702_s9, 4096  ;;  %p6704_p1 = scmp.lt.s32.totalorder %s6997_s28, %s6702_s9 }
  0x4f   : > { %p6699_p9 = pnand %p6697_p8, %p6956_p3  ;;  %p6705_p11 = scmp.lt.s32.totalorder %s6703_s1, %s6696_s23 }
  0x51   : > { %p6700_p12 = pneg %p6699_p9  ;;  %p6706_p10 = por %p6705_p11, %p6704_p1 }
  0x53   : > { %p6707_p13 = pnand %p6706_p10, %p6700_p12 }
  0x55   : > { %6710 = shalt.err (!%p6707_p13)
}
  0x56   : > { %s8932_s20 = smov 8   ;;  %s8933_s21 = smov 128  }
  0x57   : > { %6072 = dma.hbm_to_vmem [thread:$0]  (!%p6936_p0), %s6994_s8, 2048, %s6997_s28, %s7001_s11, %s8933_s21, %s8933_s21, %s8932_s20  }
  0x58   : > { %s4747_s6 = scalar_lea.hbm %s8820_s2, %s6932_s30  ;;  %s217_s23 = scalar_lea.vmem [#allocation7], %s6929_s29 }
  0x59   : > { %s228_s9 = sshll.u32 %s217_s23, 4  ;;  %s7033_s1 = scalar_lea.hbm %s4747_s6, 4096  ;;  %s7035_s9 = int_to_ptr.vmem [resolvable:$true] %s228_s9 }
  0x5a   : > { %s6741_s0 = scalar_lea.hbm %s4747_s6, 6144  ;;  %s6716_s28 = scalar_lea.hbm %s8820_s2, 12288 }
  0x5b   : > { %p6712_p11 = scmp.ne.s32.totalorder %s7033_s1, %s6741_s0  ;;  %p6717_p4 = scmp.lt.u32.totalorder %s7033_s1, %s8820_s2 }
  0x5c   : > { %p6718_p6 = scmp.lt.u32.totalorder %s6716_s28, %s6741_s0  ;;  %p6720_p8 = scmp.lt.u32.totalorder %s6741_s0, %s7033_s1 }
  0x5d   : > { %p6714_p5 = pnand %p6712_p11, %p6956_p3 }
  0x5e   : > { %p6719_p7 = por %p6718_p6, %p6717_p4 }
  0x5f   : > { %p6715_p2 = pneg %p6714_p5 }
  0x60   : > { %p6721_p9 = por %p6720_p8, %p6719_p7 }
  0x62   : > { %p6722_p12 = pnand %p6721_p9, %p6715_p2 }
  0x64   : > { %6725 = shalt.err (!%p6722_p12)
}
  0x65   : > { %s6726_s29 = scalar_lea.vmem %s7035_s9, 2048  ;;  %s6834_s16 = smov [#allocation7]  }
  0x66   : > { %p6727_p1 = scmp.ne.s32.totalorder %s7035_s9, %s6726_s29  ;;  %s6731_s10 = sshll.u32 %s6834_s16, 4  ;;  %s6732_s10 = int_to_ptr.vmem [resolvable:$false] %s6731_s10 }
  0x67   : > { %s6733_s5 = scalar_lea.vmem %s6732_s10, 4096  ;;  %p6734_p11 = scmp.lt.s32.totalorder %s7035_s9, %s6732_s10 }
  0x68   : > { %p6729_p10 = pnand %p6727_p1, %p6956_p3  ;;  %p6735_p5 = scmp.lt.s32.totalorder %s6733_s5, %s6726_s29 }
  0x6a   : > { %p6730_p13 = pneg %p6729_p10  ;;  %p6736_p4 = por %p6735_p5, %p6734_p11 }
  0x6c   : > { %p6737_p6 = pnand %p6736_p4, %p6730_p13 }
  0x6e   : > { %6740 = shalt.err (!%p6737_p6)
}
  0x6f   : > { %6078 = dma.hbm_to_vmem [thread:$0]  (!%p6936_p0), %s7033_s1, 2048, %s7035_s9, %s6951_s19, %s8933_s21, %s8933_s21, %s8932_s20  }
  0x70   : > { %p8934_p3 = scmp.ne.s32.totalorder %s8929_s7, 0 }
  0x72   : > { %240 = sbr.rel (%p8934_p3) target bundleno = 1161 (0x489), region = 32 }
  0x79   : > { %s7064_s0 = sand.u32 1, %s6812_s13   ;;  %p8935_p2 = scmp.ne.s32.totalorder %s8922_s24, 0 }
  0x7a   : > { %s7067_s22 = sshll.u32 %s7064_s0, 7  ;;  %s243_s4 = scalar_lea.sflag [#allocation3], %s7064_s0 }
  0x7b   : > { %s7071_s6 = scalar_lea.vmem [#allocation2], %s7067_s22 }
  0x7c   : > { %6795 = dma.done.wait (%p8935_p2), %s243_s4, 2048  }
  0x7d   : > { %6797 = vsyncadd (%p8935_p2), %s243_s4, 4294965248  ;;  %s251_s19 = sand.u32 1, %s6889_s18   ;;  %s7079_s20 = scalar_lea.vmem [#allocation5], %s7067_s22 }
  0x7e   : > { %s252_s7 = scalar_lea.sflag [#allocation6], %s251_s19 }
  0x7f   : > { %6799 = dma.done.wait (%p8935_p2), %s252_s7, 4096  }
  0x80   : > { %6801 = vsyncadd (%p8935_p2), %s252_s7, 4294963200  ;;  %v301_v0 = vld [vmem:[%s7071_s6] sm:$0xff]  ;;  %v303_v1 = vld [vmem:[%s7071_s6 + $0x10] sm:$0xff]  ;;  %vm621_vm0 = vcmask 130048   ;;  %s7415_s18 = scalar_lea.vmem [#allocation7], %s7067_s22  ;;  %vm3929_vm1 = vcmask 130112  }
  0x81   : > { %v302_v2 = vld [vmem:[%s7071_s6 + $0x8] sm:$0xff]  ;;  %v349_v3 = vmul.f32 0.25, %v301_v0  ;;  %v351_v4 = vmul.f32 0.25, %v303_v1  ;;  %v304_v5 = vld [vmem:[%s7071_s6 + $0x18] sm:$0xff]  ;;  %v317_v8 = vld [vmem:[%s7079_s20] sm:$0xff]  ;;  %vm3936_vm2 = vcmask 195712  }
  0x82   : > { %v350_v6 = vmul.f32 0.25, %v302_v2  ;;  %v352_v7 = vmul.f32 0.25, %v304_v5  ;;  %v318_v9 = vld [vmem:[%s7079_s20 + $0x8] sm:$0xff]  ;;  %v319_v11 = vld [vmem:[%s7079_s20 + $0x10] sm:$0xff]  ;;  %v320_v12 = vld [vmem:[%s7079_s20 + $0x18] sm:$0xff]  ;;  %vm3943_vm3 = vcmask 261312  }
  0x83   : > { %365 = vxpose.xlu0.b32.start [1/2] (short) %v349_v3, 128  ;;  %397 = vxpose.xlu1.b32.start [1/2] (short) %v351_v4, 128  ;;  %v5772_v10 = vpack.c.bf16 %v318_v9, %v317_v8  ;;  %v5776_v13 = vpack.c.bf16 %v320_v12, %v319_v11  ;;  %v321_v14 = vld [vmem:[%s7079_s20 + $0x20] sm:$0xff]  ;;  %v322_v15 = vld [vmem:[%s7079_s20 + $0x28] sm:$0xff]  ;;  %v323_v17 = vld [vmem:[%s7079_s20 + $0x30] sm:$0xff]  ;;  %vm3950_vm4 = vcmask 326912   ;;  %vm3957_vm5 = vcmask 392512   ;;  %s8378_s24 = scalar_lea.vmem [#allocation8], %s7067_s22 }
  0x84   : > { %v5780_v16 = vpack.c.bf16 %v322_v15, %v321_v14  ;;  %v324_v18 = vld [vmem:[%s7079_s20 + $0x38] sm:$0xff]  ;;  %v305_v20 = vld [vmem:[%s7071_s6 + $0x20] sm:$0xff]  ;;  %v307_v21 = vld [vmem:[%s7071_s6 + $0x30] sm:$0xff]  ;;  %vm3964_vm6 = vcmask 458112   ;;  %vm3971_vm7 = vcmask 523712   ;;  %vm3978_vm8 = vcmask 589312  }
  0x85   : > { %5773 = vmatprep.subr.bf16.mxu0 %v5772_v10  ;;  %5777 = vmatprep.subr.bf16.mxu1 %v5776_v13  ;;  %v5784_v19 = vpack.c.bf16 %v324_v18, %v323_v17  ;;  %v353_v22 = vmul.f32 0.25, %v305_v20  ;;  %v355_v23 = vmul.f32 0.25, %v307_v21  ;;  %v306_v24 = vld [vmem:[%s7071_s6 + $0x28] sm:$0xff]  ;;  %v308_v25 = vld [vmem:[%s7071_s6 + $0x38] sm:$0xff]  ;;  %v309_v28 = vld [vmem:[%s7071_s6 + $0x40] sm:$0xff]  ;;  %vm3985_vm9 = vcmask 654912  }
  0x86   : > { %5775 = vmatpush3.bf16.msra.mxu0 %v5772_v10  ;;  %5779 = vmatpush3.bf16.msra.mxu1 %v5776_v13  ;;  %v354_v26 = vmul.f32 0.25, %v306_v24  ;;  %v356_v27 = vmul.f32 0.25, %v308_v25  ;;  %v311_v29 = vld [vmem:[%s7071_s6 + $0x50] sm:$0xff]  ;;  %v357_v30 = vmul.f32 0.25, %v309_v28  ;;  %v310_v32 = vld [vmem:[%s7071_s6 + $0x48] sm:$0xff]  ;;  %v312_v33 = vld [vmem:[%s7071_s6 + $0x58] sm:$0xff] }
  0x87   : > { %366 = vxpose.xlu0.b32.end [2/2] (short) %v350_v6, 128  ;;  %398 = vxpose.xlu1.b32.end [2/2] (short) %v352_v7, 128  ;;  %v359_v31 = vmul.f32 0.25, %v311_v29  ;;  %v358_v34 = vmul.f32 0.25, %v310_v32  ;;  %v360_v35 = vmul.f32 0.25, %v312_v33  ;;  %v325_v36 = vld [vmem:[%s7079_s20 + $0x40] sm:$0xff]  ;;  %v326_v39 = vld [vmem:[%s7079_s20 + $0x48] sm:$0xff]  ;;  %v327_v40 = vld [vmem:[%s7079_s20 + $0x50] sm:$0xff] }
  0x88   : > { %5781 = vmatprep.subr.bf16.mxu0 %v5780_v16  ;;  %5785 = vmatprep.subr.bf16.mxu1 %v5784_v19  ;;  %v328_v41 = vld [vmem:[%s7079_s20 + $0x58] sm:$0xff]  ;;  %v7111_v42 = vpack.c.bf16 %v326_v39, %v325_v36  ;;  %v313_v4 = vld [vmem:[%s7071_s6 + $0x60] sm:$0xff]  ;;  %v315_v5 = vld [vmem:[%s7071_s6 + $0x70] sm:$0xff]  ;;  %vm3992_vm10 = vcmask 720512   ;;  %vm3999_vm11 = vcmask 786112   ;;  %vm4006_vm12 = vcmask 851712  }
  0x89   : > { %v7113_v43 = vpack.c.bf16 %v328_v41, %v327_v40  ;;  %v361_v8 = vmul.f32 0.25, %v313_v4  ;;  %v363_v9 = vmul.f32 0.25, %v315_v5  ;;  %v314_v10 = vld [vmem:[%s7071_s6 + $0x68] sm:$0xff]  ;;  %v316_v11 = vld [vmem:[%s7071_s6 + $0x78] sm:$0xff]  ;;  %v329_v18 = vld [vmem:[%s7079_s20 + $0x60] sm:$0xff]  ;;  %vm4013_vm13 = vcmask 917312  }
  0x8a   : > { %v362_v14 = vmul.f32 0.25, %v314_v10  ;;  %v364_v15 = vmul.f32 0.25, %v316_v11  ;;  %v330_v21 = vld [vmem:[%s7079_s20 + $0x68] sm:$0xff]  ;;  %vm4020_vm14 = vcmask 982912   ;;  %vm4027_vm15 = vcmask 1048512   ;;  %s4979_s21 = sshll.u32 %s6820_s15, 11 }
  0x8b   : > { %v7157_v24 = vpack.c.bf16 %v330_v21, %v329_v18  ;;  %s4693_s23 = sshll.u32 %s8378_s24, 4  ;;  %s8763_s1 = scalar_lea.hbm %s8821_s3, %s4979_s21  ;;  %s8765_s23 = int_to_ptr.vmem [resolvable:$true] %s4693_s23 }
  0x8c   : > { %s4677_s8 = scalar_lea.sflag [#allocation4], %s7064_s0  ;;  %s6742_s28 = scalar_lea.vmem %s8765_s23, 2048 }
  0x8d   : > { %p6743_p0 = scmp.ne.s32.totalorder %s8765_s23, %s6742_s28  ;;  %p9108_p7 = scmp.ne.s32.totalorder %s8923_s25, 0 }
  0x8e   : > { %s6835_s11 = smov [#allocation8]  }
  0x8f   : > { %p6744_p8 = pnand %p6743_p0, %p9108_p7  ;;  %s6746_s30 = sshll.u32 %s6835_s11, 4  ;;  %s6747_s30 = int_to_ptr.vmem [resolvable:$false] %s6746_s30 }
  0x90   : > { %s6748_s29 = scalar_lea.vmem %s6747_s30, 4096  ;;  %p6749_p12 = scmp.lt.s32.totalorder %s8765_s23, %s6747_s30 }
  0x91   : > { %p6745_p9 = pneg %p6744_p8  ;;  %p6750_p1 = scmp.lt.s32.totalorder %s6748_s29, %s6742_s28 }
  0x93   : > { %p6751_p10 = por %p6750_p1, %p6749_p12 }
  0x95   : > { %p6752_p13 = pnand %p6751_p10, %p6745_p9 }
  0xc0   : > { %429 = vxpose.xlu0.b32.start [1/2] (short) %v353_v22, 128  ;;  %461 = vxpose.xlu1.b32.start [1/2] (short) %v355_v23, 128  ;;  %v331_v22 = vld [vmem:[%s7079_s20 + $0x70] sm:$0xff]  ;;  %v332_v23 = vld [vmem:[%s7079_s20 + $0x78] sm:$0xff] }
  0xc1   : > { %v7159_v25 = vpack.c.bf16 %v332_v23, %v331_v22 }
  0xc4   : > { %430 = vxpose.xlu0.b32.end [2/2] (short) %v354_v26, 128  ;;  %462 = vxpose.xlu1.b32.end [2/2] (short) %v356_v27, 128 }
  0xfd   : > { %493 = vxpose.xlu0.b32.start [1/2] (short) %v357_v30, 128  ;;  %525 = vxpose.xlu1.b32.start [1/2] (short) %v359_v31, 128 }
 0x101   : > { %494 = vxpose.xlu0.b32.end [2/2] (short) %v358_v34, 128  ;;  %526 = vxpose.xlu1.b32.end [2/2] (short) %v360_v35, 128 }
 0x103   : > { %v381_v37 = vpop.trf.xlu0  ;;  %v413_v38 = vpop.trf.xlu1 }
 0x104   : > { %5272 = vmatprep.mubr.msk.f32.mxu0 %vm621_vm0, %v381_v37  ;;  %5300 = vmatprep.mubr.msk.f32.mxu1 %vm621_vm0, %v413_v38 }
 0x107   : > { %v382_v44 = vpop.trf.xlu0  ;;  %v414_v45 = vpop.trf.xlu1 }
 0x108   : > { %5273 = vmatmul.mubr.msk.f32.vlgmr.msra.gmra.mrb[0].mxu0 %vm621_vm0, %v382_v44  ;;  %5301 = vmatmul.mubr.msk.f32.vlgmr.msra.gmra.mrb[0].mxu1 %vm621_vm0, %v414_v45 }
 0x109   : > { %5783 = vmatpush3.bf16.msra.mxu0 %v5780_v16  ;;  %5787 = vmatpush3.bf16.msra.mxu1 %v5784_v19 }
 0x10a   : > { %5789 = vmatprep.subr.bf16.mxu0 %v7111_v42  ;;  %5793 = vmatprep.subr.bf16.mxu1 %v7113_v43 }
 0x10b   : > { %v383_v46 = vpop.trf.xlu0  ;;  %v415_v47 = vpop.trf.xlu1 }
 0x10c   : > { %5275 = vmatprep.mubr.msk.f32.mxu0 %vm621_vm0, %v383_v46  ;;  %5303 = vmatprep.mubr.msk.f32.mxu1 %vm621_vm0, %v415_v47 }
 0x10f   : > { %v384_v48 = vpop.trf.xlu0  ;;  %v416_v49 = vpop.trf.xlu1 }
 0x110   : > { %5276 = vmatmul.mubr.msk.f32.gmra.mrb[2].mxu0 %vm621_vm0, %v384_v48  ;;  %5304 = vmatmul.mubr.msk.f32.gmra.mrb[2].mxu1 %vm621_vm0, %v416_v49 }
 0x113   : > { %v385_v50 = vpop.trf.xlu0  ;;  %v417_v51 = vpop.trf.xlu1 }
 0x114   : > { %5278 = vmatprep.mubr.msk.f32.mxu0 %vm621_vm0, %v385_v50  ;;  %5306 = vmatprep.mubr.msk.f32.mxu1 %vm621_vm0, %v417_v51 }
 0x117   : > { %v386_v52 = vpop.trf.xlu0  ;;  %v418_v53 = vpop.trf.xlu1 }
 0x118   : > { %5279 = vmatmul.mubr.msk.f32.gmra.mrb[4].mxu0 %vm621_vm0, %v386_v52  ;;  %5307 = vmatmul.mubr.msk.f32.gmra.mrb[4].mxu1 %vm621_vm0, %v418_v53 }
 0x11b   : > { %v387_v54 = vpop.trf.xlu0  ;;  %v419_v55 = vpop.trf.xlu1 }
 0x11c   : > { %5281 = vmatprep.mubr.msk.f32.mxu0 %vm621_vm0, %v387_v54  ;;  %5309 = vmatprep.mubr.msk.f32.mxu1 %vm621_vm0, %v419_v55 }
 0x11f   : > { %v388_v56 = vpop.trf.xlu0  ;;  %v420_v57 = vpop.trf.xlu1 }
 0x120   : > { %5282 = vmatmul.mubr.msk.f32.gmra.mrb[6].mxu0 %vm621_vm0, %v388_v56  ;;  %5310 = vmatmul.mubr.msk.f32.gmra.mrb[6].mxu1 %vm621_vm0, %v420_v57 }
 0x123   : > { %v389_v58 = vpop.trf.xlu0  ;;  %v421_v59 = vpop.trf.xlu1 }
 0x124   : > { %5284 = vmatprep.mubr.msk.f32.mxu0 %vm621_vm0, %v389_v58  ;;  %5312 = vmatprep.mubr.msk.f32.mxu1 %vm621_vm0, %v421_v59 }
 0x127   : > { %v390_v60 = vpop.trf.xlu0  ;;  %v422_v61 = vpop.trf.xlu1 }
 0x128   : > { %5285 = vmatmul.mubr.msk.f32.gmra.mrb[8].mxu0 %vm621_vm0, %v390_v60  ;;  %5313 = vmatmul.mubr.msk.f32.gmra.mrb[8].mxu1 %vm621_vm0, %v422_v61 }
 0x12b   : > { %v391_v62 = vpop.trf.xlu0  ;;  %v423_v63 = vpop.trf.xlu1 }
 0x12c   : > { %5287 = vmatprep.mubr.msk.f32.mxu0 %vm621_vm0, %v391_v62  ;;  %5315 = vmatprep.mubr.msk.f32.mxu1 %vm621_vm0, %v423_v63 }
 0x12f   : > { %v392_v0 = vpop.trf.xlu0  ;;  %v424_v1 = vpop.trf.xlu1 }
 0x130   : > { %5288 = vmatmul.mubr.msk.f32.gmra.mrb[10].mxu0 %vm621_vm0, %v392_v0  ;;  %5316 = vmatmul.mubr.msk.f32.gmra.mrb[10].mxu1 %vm621_vm0, %v424_v1 }
 0x133   : > { %v393_v2 = vpop.trf.xlu0  ;;  %v425_v3 = vpop.trf.xlu1 }
 0x134   : > { %5290 = vmatprep.mubr.msk.f32.mxu0 %vm621_vm0, %v393_v2  ;;  %5318 = vmatprep.mubr.msk.f32.mxu1 %vm621_vm0, %v425_v3 }
 0x137   : > { %v394_v6 = vpop.trf.xlu0  ;;  %v426_v7 = vpop.trf.xlu1 }
 0x138   : > { %5291 = vmatmul.mubr.msk.f32.gmra.mrb[12].mxu0 %vm621_vm0, %v394_v6  ;;  %5319 = vmatmul.mubr.msk.f32.gmra.mrb[12].mxu1 %vm621_vm0, %v426_v7 }
 0x13b   : > { %v395_v12 = vpop.trf.xlu0  ;;  %v427_v13 = vpop.trf.xlu1  ;;  %557 = vxpose.xlu0.b32.start [1/2] (short) %v361_v8, 128  ;;  %589 = vxpose.xlu1.b32.start [1/2] (short) %v363_v9, 128 }
 0x13c   : > { %5293 = vmatprep.mubr.msk.f32.mxu0 %vm621_vm0, %v395_v12  ;;  %5321 = vmatprep.mubr.msk.f32.mxu1 %vm621_vm0, %v427_v13 }
 0x13f   : > { %v396_v16 = vpop.trf.xlu0  ;;  %v428_v17 = vpop.trf.xlu1  ;;  %558 = vxpose.xlu0.b32.end [2/2] (short) %v362_v14, 128  ;;  %590 = vxpose.xlu1.b32.end [2/2] (short) %v364_v15, 128 }
 0x140   : > { %5294 = vmatmul.mubr.msk.f32.gmra.mrb[14].mxu0 %vm621_vm0, %v396_v16  ;;  %5322 = vmatmul.mubr.msk.f32.gmra.mrb[14].mxu1 %vm621_vm0, %v428_v17 }
 0x143   : > { %v445_v19 = vpop.trf.xlu0  ;;  %v477_v20 = vpop.trf.xlu1 }
 0x144   : > { %5328 = vmatprep.mubr.msk.f32.mxu0 %vm621_vm0, %v445_v19  ;;  %5356 = vmatprep.mubr.msk.f32.mxu1 %vm621_vm0, %v477_v20 }
 0x147   : > { %v446_v26 = vpop.trf.xlu0  ;;  %v478_v27 = vpop.trf.xlu1 }
 0x148   : > { %5329 = vmatmul.mubr.msk.f32.vlgmr.msra.gmra.mrb[16].mxu0 %vm621_vm0, %v446_v26  ;;  %5357 = vmatmul.mubr.msk.f32.vlgmr.msra.gmra.mrb[16].mxu1 %vm621_vm0, %v478_v27 }
 0x149   : > { %5791 = vmatpush3.bf16.msra.mxu0 %v7111_v42  ;;  %5795 = vmatpush3.bf16.msra.mxu1 %v7113_v43 }
 0x14a   : > { %5797 = vmatprep.subr.bf16.mxu0 %v7157_v24  ;;  %5801 = vmatprep.subr.bf16.mxu1 %v7159_v25 }
 0x14b   : > { %v447_v28 = vpop.trf.xlu0  ;;  %v479_v29 = vpop.trf.xlu1 }
 0x14c   : > { %5331 = vmatprep.mubr.msk.f32.mxu0 %vm621_vm0, %v447_v28  ;;  %5359 = vmatprep.mubr.msk.f32.mxu1 %vm621_vm0, %v479_v29 }
 0x14f   : > { %v448_v30 = vpop.trf.xlu0  ;;  %v480_v31 = vpop.trf.xlu1 }
 0x150   : > { %5332 = vmatmul.mubr.msk.f32.gmra.mrb[18].mxu0 %vm621_vm0, %v448_v30  ;;  %5360 = vmatmul.mubr.msk.f32.gmra.mrb[18].mxu1 %vm621_vm0, %v480_v31 }
 0x153   : > { %v449_v32 = vpop.trf.xlu0  ;;  %v481_v33 = vpop.trf.xlu1 }
 0x154   : > { %5334 = vmatprep.mubr.msk.f32.mxu0 %vm621_vm0, %v449_v32  ;;  %5362 = vmatprep.mubr.msk.f32.mxu1 %vm621_vm0, %v481_v33 }
 0x157   : > { %v450_v34 = vpop.trf.xlu0  ;;  %v482_v35 = vpop.trf.xlu1 }
 0x158   : > { %5335 = vmatmul.mubr.msk.f32.gmra.mrb[20].mxu0 %vm621_vm0, %v450_v34  ;;  %5363 = vmatmul.mubr.msk.f32.gmra.mrb[20].mxu1 %vm621_vm0, %v482_v35 }
 0x15b   : > { %v451_v36 = vpop.trf.xlu0  ;;  %v483_v37 = vpop.trf.xlu1 }
 0x15c   : > { %5337 = vmatprep.mubr.msk.f32.mxu0 %vm621_vm0, %v451_v36  ;;  %5365 = vmatprep.mubr.msk.f32.mxu1 %vm621_vm0, %v483_v37 }
 0x15f   : > { %v452_v38 = vpop.trf.xlu0  ;;  %v484_v39 = vpop.trf.xlu1 }
 0x160   : > { %5338 = vmatmul.mubr.msk.f32.gmra.mrb[22].mxu0 %vm621_vm0, %v452_v38  ;;  %5366 = vmatmul.mubr.msk.f32.gmra.mrb[22].mxu1 %vm621_vm0, %v484_v39 }
 0x163   : > { %v453_v40 = vpop.trf.xlu0  ;;  %v485_v41 = vpop.trf.xlu1 }
 0x164   : > { %5340 = vmatprep.mubr.msk.f32.mxu0 %vm621_vm0, %v453_v40  ;;  %5368 = vmatprep.mubr.msk.f32.mxu1 %vm621_vm0, %v485_v41 }
 0x167   : > { %v454_v42 = vpop.trf.xlu0  ;;  %v486_v43 = vpop.trf.xlu1 }
 0x168   : > { %5341 = vmatmul.mubr.msk.f32.gmra.mrb[24].mxu0 %vm621_vm0, %v454_v42  ;;  %5369 = vmatmul.mubr.msk.f32.gmra.mrb[24].mxu1 %vm621_vm0, %v486_v43 }
 0x16b   : > { %v455_v44 = vpop.trf.xlu0  ;;  %v487_v45 = vpop.trf.xlu1 }
 0x16c   : > { %5343 = vmatprep.mubr.msk.f32.mxu0 %vm621_vm0, %v455_v44  ;;  %5371 = vmatprep.mubr.msk.f32.mxu1 %vm621_vm0, %v487_v45 }
 0x16f   : > { %v456_v46 = vpop.trf.xlu0  ;;  %v488_v47 = vpop.trf.xlu1 }
 0x170   : > { %5344 = vmatmul.mubr.msk.f32.gmra.mrb[26].mxu0 %vm621_vm0, %v456_v46  ;;  %5372 = vmatmul.mubr.msk.f32.gmra.mrb[26].mxu1 %vm621_vm0, %v488_v47 }
 0x173   : > { %v457_v48 = vpop.trf.xlu0  ;;  %v489_v49 = vpop.trf.xlu1 }
 0x174   : > { %5346 = vmatprep.mubr.msk.f32.mxu0 %vm621_vm0, %v457_v48  ;;  %5374 = vmatprep.mubr.msk.f32.mxu1 %vm621_vm0, %v489_v49 }
 0x177   : > { %v458_v50 = vpop.trf.xlu0  ;;  %v490_v51 = vpop.trf.xlu1 }
 0x178   : > { %5347 = vmatmul.mubr.msk.f32.gmra.mrb[28].mxu0 %vm621_vm0, %v458_v50  ;;  %5375 = vmatmul.mubr.msk.f32.gmra.mrb[28].mxu1 %vm621_vm0, %v490_v51 }
 0x17b   : > { %v459_v52 = vpop.trf.xlu0  ;;  %v491_v53 = vpop.trf.xlu1 }
 0x17c   : > { %5349 = vmatprep.mubr.msk.f32.mxu0 %vm621_vm0, %v459_v52  ;;  %5377 = vmatprep.mubr.msk.f32.mxu1 %vm621_vm0, %v491_v53 }
 0x17f   : > { %v460_v54 = vpop.trf.xlu0  ;;  %v492_v55 = vpop.trf.xlu1 }
 0x180   : > { %5350 = vmatmul.mubr.msk.f32.gmra.mrb[30].mxu0 %vm621_vm0, %v460_v54  ;;  %5378 = vmatmul.mubr.msk.f32.gmra.mrb[30].mxu1 %vm621_vm0, %v492_v55 }
 0x183   : > { %v509_v56 = vpop.trf.xlu0  ;;  %v541_v57 = vpop.trf.xlu1 }
 0x184   : > { %5384 = vmatprep.mubr.msk.f32.mxu0 %vm621_vm0, %v509_v56  ;;  %5412 = vmatprep.mubr.msk.f32.mxu1 %vm621_vm0, %v541_v57 }
 0x187   : > { %v510_v58 = vpop.trf.xlu0  ;;  %v542_v59 = vpop.trf.xlu1 }
 0x188   : > { %5385 = vmatmul.mubr.msk.f32.vlgmr.msra.gmra.mrb[32].mxu0 %vm621_vm0, %v510_v58  ;;  %5413 = vmatmul.mubr.msk.f32.vlgmr.msra.gmra.mrb[32].mxu1 %vm621_vm0, %v542_v59 }
 0x189   : > { %5799 = vmatpush3.bf16.msra.mxu0 %v7157_v24  ;;  %5803 = vmatpush3.bf16.msra.mxu1 %v7159_v25 }
 0x18b   : > { %v511_v60 = vpop.trf.xlu0  ;;  %v543_v61 = vpop.trf.xlu1 }
 0x18c   : > { %5387 = vmatprep.mubr.msk.f32.mxu0 %vm621_vm0, %v511_v60  ;;  %5415 = vmatprep.mubr.msk.f32.mxu1 %vm621_vm0, %v543_v61 }
 0x18f   : > { %v512_v62 = vpop.trf.xlu0  ;;  %v544_v63 = vpop.trf.xlu1 }
 0x190   : > { %5388 = vmatmul.mubr.msk.f32.gmra.mrb[34].mxu0 %vm621_vm0, %v512_v62  ;;  %5416 = vmatmul.mubr.msk.f32.gmra.mrb[34].mxu1 %vm621_vm0, %v544_v63 }
 0x193   : > { %v513_v0 = vpop.trf.xlu0  ;;  %v545_v1 = vpop.trf.xlu1 }
 0x194   : > { %5390 = vmatprep.mubr.msk.f32.mxu0 %vm621_vm0, %v513_v0  ;;  %5418 = vmatprep.mubr.msk.f32.mxu1 %vm621_vm0, %v545_v1 }
 0x197   : > { %v514_v2 = vpop.trf.xlu0  ;;  %v546_v3 = vpop.trf.xlu1 }
 0x198   : > { %5391 = vmatmul.mubr.msk.f32.gmra.mrb[36].mxu0 %vm621_vm0, %v514_v2  ;;  %5419 = vmatmul.mubr.msk.f32.gmra.mrb[36].mxu1 %vm621_vm0, %v546_v3 }
 0x19b   : > { %v515_v4 = vpop.trf.xlu0  ;;  %v547_v5 = vpop.trf.xlu1 }
 0x19c   : > { %5393 = vmatprep.mubr.msk.f32.mxu0 %vm621_vm0, %v515_v4  ;;  %5421 = vmatprep.mubr.msk.f32.mxu1 %vm621_vm0, %v547_v5 }
 0x19f   : > { %v516_v6 = vpop.trf.xlu0  ;;  %v548_v7 = vpop.trf.xlu1 }
 0x1a0   : > { %5394 = vmatmul.mubr.msk.f32.gmra.mrb[38].mxu0 %vm621_vm0, %v516_v6  ;;  %5422 = vmatmul.mubr.msk.f32.gmra.mrb[38].mxu1 %vm621_vm0, %v548_v7 }
 0x1a3   : > { %v517_v8 = vpop.trf.xlu0  ;;  %v549_v9 = vpop.trf.xlu1 }
 0x1a4   : > { %5396 = vmatprep.mubr.msk.f32.mxu0 %vm621_vm0, %v517_v8  ;;  %5424 = vmatprep.mubr.msk.f32.mxu1 %vm621_vm0, %v549_v9 }
 0x1a7   : > { %v518_v10 = vpop.trf.xlu0  ;;  %v550_v11 = vpop.trf.xlu1 }
 0x1a8   : > { %5397 = vmatmul.mubr.msk.f32.gmra.mrb[40].mxu0 %vm621_vm0, %v518_v10  ;;  %5425 = vmatmul.mubr.msk.f32.gmra.mrb[40].mxu1 %vm621_vm0, %v550_v11 }
 0x1ab   : > { %v519_v12 = vpop.trf.xlu0  ;;  %v551_v13 = vpop.trf.xlu1 }
 0x1ac   : > { %5399 = vmatprep.mubr.msk.f32.mxu0 %vm621_vm0, %v519_v12  ;;  %5427 = vmatprep.mubr.msk.f32.mxu1 %vm621_vm0, %v551_v13 }
 0x1af   : > { %v520_v14 = vpop.trf.xlu0  ;;  %v552_v15 = vpop.trf.xlu1 }
 0x1b0   : > { %5400 = vmatmul.mubr.msk.f32.gmra.mrb[42].mxu0 %vm621_vm0, %v520_v14  ;;  %5428 = vmatmul.mubr.msk.f32.gmra.mrb[42].mxu1 %vm621_vm0, %v552_v15 }
 0x1b3   : > { %v521_v16 = vpop.trf.xlu0  ;;  %v553_v17 = vpop.trf.xlu1 }
 0x1b4   : > { %5402 = vmatprep.mubr.msk.f32.mxu0 %vm621_vm0, %v521_v16  ;;  %5430 = vmatprep.mubr.msk.f32.mxu1 %vm621_vm0, %v553_v17 }
 0x1b7   : > { %v522_v18 = vpop.trf.xlu0  ;;  %v554_v19 = vpop.trf.xlu1 }
 0x1b8   : > { %5403 = vmatmul.mubr.msk.f32.gmra.mrb[44].mxu0 %vm621_vm0, %v522_v18  ;;  %5431 = vmatmul.mubr.msk.f32.gmra.mrb[44].mxu1 %vm621_vm0, %v554_v19 }
 0x1bb   : > { %v523_v20 = vpop.trf.xlu0  ;;  %v555_v21 = vpop.trf.xlu1 }
 0x1bc   : > { %5405 = vmatprep.mubr.msk.f32.mxu0 %vm621_vm0, %v523_v20  ;;  %5433 = vmatprep.mubr.msk.f32.mxu1 %vm621_vm0, %v555_v21 }
 0x1bf   : > { %v524_v22 = vpop.trf.xlu0  ;;  %v556_v23 = vpop.trf.xlu1 }
 0x1c0   : > { %5406 = vmatmul.mubr.msk.f32.gmra.mrb[46].mxu0 %vm621_vm0, %v524_v22  ;;  %5434 = vmatmul.mubr.msk.f32.gmra.mrb[46].mxu1 %vm621_vm0, %v556_v23 }
 0x1c3   : > { %v573_v24 = vpop.trf.xlu0  ;;  %v605_v25 = vpop.trf.xlu1 }
 0x1c4   : > { %5440 = vmatprep.mubr.msk.f32.mxu0 %vm621_vm0, %v573_v24  ;;  %5468 = vmatprep.mubr.msk.f32.mxu1 %vm621_vm0, %v605_v25 }
 0x1c7   : > { %v574_v26 = vpop.trf.xlu0  ;;  %v606_v27 = vpop.trf.xlu1 }
 0x1c8   : > { %5441 = vmatmul.mubr.msk.f32.vlgmr.msra.gmra.mrb[48].mxu0 %vm621_vm0, %v574_v26  ;;  %5469 = vmatmul.mubr.msk.f32.vlgmr.msra.gmra.mrb[48].mxu1 %vm621_vm0, %v606_v27 }
 0x1cb   : > { %v575_v28 = vpop.trf.xlu0  ;;  %v607_v29 = vpop.trf.xlu1 }
 0x1cc   : > { %5443 = vmatprep.mubr.msk.f32.mxu0 %vm621_vm0, %v575_v28  ;;  %5471 = vmatprep.mubr.msk.f32.mxu1 %vm621_vm0, %v607_v29 }
 0x1cf   : > { %v576_v30 = vpop.trf.xlu0  ;;  %v608_v31 = vpop.trf.xlu1 }
 0x1d0   : > { %5444 = vmatmul.mubr.msk.f32.gmra.mrb[50].mxu0 %vm621_vm0, %v576_v30  ;;  %5472 = vmatmul.mubr.msk.f32.gmra.mrb[50].mxu1 %vm621_vm0, %v608_v31 }
 0x1d3   : > { %v577_v32 = vpop.trf.xlu0  ;;  %v609_v33 = vpop.trf.xlu1 }
 0x1d4   : > { %5446 = vmatprep.mubr.msk.f32.mxu0 %vm621_vm0, %v577_v32  ;;  %5474 = vmatprep.mubr.msk.f32.mxu1 %vm621_vm0, %v609_v33 }
 0x1d7   : > { %v578_v34 = vpop.trf.xlu0  ;;  %v610_v35 = vpop.trf.xlu1 }
 0x1d8   : > { %5447 = vmatmul.mubr.msk.f32.gmra.mrb[52].mxu0 %vm621_vm0, %v578_v34  ;;  %5475 = vmatmul.mubr.msk.f32.gmra.mrb[52].mxu1 %vm621_vm0, %v610_v35 }
 0x1db   : > { %v7241_v36 = vpop.f32.mrb[0].mxu0  ;;  %v579_v37 = vpop.trf.xlu0 }
 0x1dc   : > { %2168 = vmax.xlane.f32.xlu1 %v7241_v36  ;;  %v7244_v38 = vpop.f32.mrb[1].mxu0  ;;  %v7246_v39 = vpop.f32.mrb[0].mxu1  ;;  %5449 = vmatprep.mubr.msk.f32.mxu0 %vm621_vm0, %v579_v37 }
 0x1dd   : > { %2166 = vmax.xlane.f32.xlu0 %v7244_v38  ;;  %v7250_v40 = vpop.f32.mrb[1].mxu1  ;;  %v611_v41 = vpop.trf.xlu1 }
 0x1de   : > { %5477 = vmatprep.mubr.msk.f32.mxu1 %vm621_vm0, %v611_v41 }
 0x1df   : > { %v580_v42 = vpop.trf.xlu0 }
 0x1e0   : > { %2200 = vmax.xlane.f32.xlu1 %v7246_v39  ;;  %5450 = vmatmul.mubr.msk.f32.gmra.mrb[54].mxu0 %vm621_vm0, %v580_v42 }
 0x1e1   : > { %v612_v43 = vpop.trf.xlu1 }
 0x1e2   : > { %5478 = vmatmul.mubr.msk.f32.gmra.mrb[54].mxu1 %vm621_vm0, %v612_v43 }
 0x1e3   : > { %v7256_v44 = vpop.f32.mrb[2].mxu0  ;;  %v581_v45 = vpop.trf.xlu0 }
 0x1e4   : > { %2198 = vmax.xlane.f32.xlu1 %v7250_v40  ;;  %v7259_v46 = vpop.f32.mrb[3].mxu0  ;;  %v7261_v47 = vpop.f32.mrb[2].mxu1  ;;  %5452 = vmatprep.mubr.msk.f32.mxu0 %vm621_vm0, %v581_v45 }
 0x1e5   : > { %2170 = vmax.xlane.f32.xlu0 %v7259_v46  ;;  %v613_v48 = vpop.trf.xlu1  ;;  %v7265_v49 = vpop.f32.mrb[3].mxu1 }
 0x1e6   : > { %5480 = vmatprep.mubr.msk.f32.mxu1 %vm621_vm0, %v613_v48 }
 0x1e7   : > { %v582_v50 = vpop.trf.xlu0 }
 0x1e8   : > { %2172 = vmax.xlane.f32.xlu1 %v7256_v44  ;;  %5453 = vmatmul.mubr.msk.f32.gmra.mrb[56].mxu0 %vm621_vm0, %v582_v50 }
 0x1e9   : > { %2202 = vmax.xlane.f32.xlu0 %v7265_v49  ;;  %v614_v51 = vpop.trf.xlu1 }
 0x1ea   : > { %5481 = vmatmul.mubr.msk.f32.gmra.mrb[56].mxu1 %vm621_vm0, %v614_v51 }
 0x1eb   : > { %v7272_v52 = vpop.f32.mrb[4].mxu0  ;;  %v583_v53 = vpop.trf.xlu0 }
 0x1ec   : > { %2204 = vmax.xlane.f32.xlu1 %v7261_v47  ;;  %v7275_v54 = vpop.f32.mrb[5].mxu0  ;;  %v7277_v55 = vpop.f32.mrb[4].mxu1  ;;  %5455 = vmatprep.mubr.msk.f32.mxu0 %vm621_vm0, %v583_v53  ;;  %v333_v53 = vld [vmem:[%s7415_s18] sm:$0xff] }
 0x1ed   : > { %2174 = vmax.xlane.f32.xlu0 %v7275_v54  ;;  %v615_v56 = vpop.trf.xlu1  ;;  %v7281_v57 = vpop.f32.mrb[5].mxu1 }
 0x1ee   : > { %5483 = vmatprep.mubr.msk.f32.mxu1 %vm621_vm0, %v615_v56  ;;  %v335_v56 = vld [vmem:[%s7415_s18 + $0x10] sm:$0xff] }
 0x1ef   : > { %v584_v58 = vpop.trf.xlu0 }
 0x1f0   : > { %2176 = vmax.xlane.f32.xlu1 %v7272_v52  ;;  %5456 = vmatmul.mubr.msk.f32.gmra.mrb[58].mxu0 %vm621_vm0, %v584_v58 }
 0x1f1   : > { %2206 = vmax.xlane.f32.xlu0 %v7281_v57  ;;  %v616_v59 = vpop.trf.xlu1 }
 0x1f2   : > { %5484 = vmatmul.mubr.msk.f32.gmra.mrb[58].mxu1 %vm621_vm0, %v616_v59 }
 0x1f3   : > { %v7288_v60 = vpop.f32.mrb[6].mxu0  ;;  %v585_v61 = vpop.trf.xlu0 }
 0x1f4   : > { %2208 = vmax.xlane.f32.xlu1 %v7277_v55  ;;  %v7291_v62 = vpop.f32.mrb[7].mxu0  ;;  %v7293_v63 = vpop.f32.mrb[6].mxu1  ;;  %5458 = vmatprep.mubr.msk.f32.mxu0 %vm621_vm0, %v585_v61 }
 0x1f5   : > { %2178 = vmax.xlane.f32.xlu0 %v7291_v62  ;;  %v617_v0 = vpop.trf.xlu1  ;;  %v7297_v1 = vpop.f32.mrb[7].mxu1 }
 0x1f6   : > { %5486 = vmatprep.mubr.msk.f32.mxu1 %vm621_vm0, %v617_v0 }
 0x1f7   : > { %v586_v2 = vpop.trf.xlu0 }
 0x1f8   : > { %2180 = vmax.xlane.f32.xlu1 %v7288_v60  ;;  %5459 = vmatmul.mubr.msk.f32.gmra.mrb[60].mxu0 %vm621_vm0, %v586_v2 }
 0x1f9   : > { %2210 = vmax.xlane.f32.xlu0 %v7297_v1  ;;  %v618_v3 = vpop.trf.xlu1 }
 0x1fa   : > { %5487 = vmatmul.mubr.msk.f32.gmra.mrb[60].mxu1 %vm621_vm0, %v618_v3 }
 0x1fb   : > { %v7304_v4 = vpop.f32.mrb[8].mxu0  ;;  %v587_v5 = vpop.trf.xlu0 }
 0x1fc   : > { %2212 = vmax.xlane.f32.xlu1 %v7293_v63  ;;  %v7307_v6 = vpop.f32.mrb[9].mxu0  ;;  %v7309_v7 = vpop.f32.mrb[8].mxu1  ;;  %5461 = vmatprep.mubr.msk.f32.mxu0 %vm621_vm0, %v587_v5 }
 0x1fd   : > { %2182 = vmax.xlane.f32.xlu0 %v7307_v6  ;;  %v619_v8 = vpop.trf.xlu1  ;;  %v7313_v9 = vpop.f32.mrb[9].mxu1 }
 0x1fe   : > { %5489 = vmatprep.mubr.msk.f32.mxu1 %vm621_vm0, %v619_v8 }
 0x1ff   : > { %v588_v10 = vpop.trf.xlu0 }
 0x200   : > { %2184 = vmax.xlane.f32.xlu1 %v7304_v4  ;;  %5462 = vmatmul.mubr.msk.f32.gmra.mrb[62].mxu0 %vm621_vm0, %v588_v10 }
 0x201   : > { %2214 = vmax.xlane.f32.xlu0 %v7313_v9  ;;  %v620_v11 = vpop.trf.xlu1  ;;  %5524 = vmatprep.mubr.f32.mxu0 %v333_v53 }
 0x202   : > { %5490 = vmatmul.mubr.msk.f32.gmra.mrb[62].mxu1 %vm621_vm0, %v620_v11 }
 0x203   : > { %v7320_v12 = vpop.f32.mrb[10].mxu0  ;;  %v7322_v13 = vpop.f32.mrb[10].mxu1  ;;  %5559 = vmatprep.mubr.f32.mxu1 %v335_v56 }
 0x204   : > { %2216 = vmax.xlane.f32.xlu1 %v7309_v7  ;;  %v7325_v14 = vpop.f32.mrb[11].mxu0  ;;  %v7327_v15 = vpop.f32.mrb[11].mxu1 }
 0x205   : > { %2186 = vmax.xlane.f32.xlu0 %v7325_v14 }
 0x208   : > { %2188 = vmax.xlane.f32.xlu1 %v7320_v12 }
 0x209   : > { %2218 = vmax.xlane.f32.xlu0 %v7327_v15 }
 0x20b   : > { %v7332_v16 = vpop.f32.mrb[12].mxu0  ;;  %v7334_v17 = vpop.f32.mrb[12].mxu1 }
 0x20c   : > { %2220 = vmax.xlane.f32.xlu1 %v7322_v13  ;;  %v7337_v18 = vpop.f32.mrb[13].mxu0  ;;  %v7339_v19 = vpop.f32.mrb[13].mxu1 }
 0x20d   : > { %2190 = vmax.xlane.f32.xlu0 %v7337_v18 }
 0x210   : > { %2192 = vmax.xlane.f32.xlu1 %v7332_v16 }
 0x211   : > { %2222 = vmax.xlane.f32.xlu0 %v7339_v19 }
 0x213   : > { %v7344_v20 = vpop.f32.mrb[14].mxu0  ;;  %v7346_v21 = vpop.f32.mrb[14].mxu1 }
 0x214   : > { %2224 = vmax.xlane.f32.xlu1 %v7334_v17  ;;  %v7349_v22 = vpop.f32.mrb[15].mxu0  ;;  %v7351_v23 = vpop.f32.mrb[15].mxu1 }
 0x215   : > { %2194 = vmax.xlane.f32.xlu0 %v7349_v22 }
 0x218   : > { %2196 = vmax.xlane.f32.xlu1 %v7344_v20 }
 0x219   : > { %2226 = vmax.xlane.f32.xlu0 %v7351_v23 }
 0x21b   : > { %v7356_v24 = vpop.f32.mrb[16].mxu0  ;;  %v7358_v25 = vpop.f32.mrb[16].mxu1 }
 0x21c   : > { %2228 = vmax.xlane.f32.xlu1 %v7346_v21  ;;  %v7361_v26 = vpop.f32.mrb[17].mxu0  ;;  %v7363_v27 = vpop.f32.mrb[17].mxu1 }
 0x21d   : > { %2230 = vmax.xlane.f32.xlu0 %v7361_v26 }
 0x220   : > { %2232 = vmax.xlane.f32.xlu1 %v7356_v24 }
 0x221   : > { %2262 = vmax.xlane.f32.xlu0 %v7363_v27 }
 0x223   : > { %v7368_v28 = vpop.f32.mrb[18].mxu0  ;;  %v7370_v29 = vpop.f32.mrb[18].mxu1 }
 0x224   : > { %2264 = vmax.xlane.f32.xlu1 %v7358_v25  ;;  %v7373_v30 = vpop.f32.mrb[19].mxu0  ;;  %v7375_v31 = vpop.f32.mrb[19].mxu1 }
 0x225   : > { %2234 = vmax.xlane.f32.xlu0 %v7373_v30 }
 0x228   : > { %2236 = vmax.xlane.f32.xlu1 %v7368_v28 }
 0x229   : > { %2266 = vmax.xlane.f32.xlu0 %v7375_v31 }
 0x22b   : > { %v7380_v32 = vpop.f32.mrb[20].mxu0  ;;  %v7382_v33 = vpop.f32.mrb[20].mxu1 }
 0x22c   : > { %2268 = vmax.xlane.f32.xlu1 %v7370_v29  ;;  %v7385_v34 = vpop.f32.mrb[21].mxu0  ;;  %v7387_v35 = vpop.f32.mrb[21].mxu1 }
 0x22d   : > { %2238 = vmax.xlane.f32.xlu0 %v7385_v34 }
 0x230   : > { %2240 = vmax.xlane.f32.xlu1 %v7380_v32 }
 0x231   : > { %2270 = vmax.xlane.f32.xlu0 %v7387_v35 }
 0x233   : > { %v7392_v37 = vpop.f32.mrb[22].mxu0  ;;  %v7394_v41 = vpop.f32.mrb[22].mxu1 }
 0x234   : > { %2272 = vmax.xlane.f32.xlu1 %v7382_v33  ;;  %v7397_v42 = vpop.f32.mrb[23].mxu0  ;;  %v7399_v43 = vpop.f32.mrb[23].mxu1 }
 0x235   : > { %2242 = vmax.xlane.f32.xlu0 %v7397_v42 }
 0x238   : > { %2244 = vmax.xlane.f32.xlu1 %v7392_v37 }
 0x239   : > { %2274 = vmax.xlane.f32.xlu0 %v7399_v43 }
 0x23b   : > { %v7404_v45 = vpop.f32.mrb[24].mxu0  ;;  %v7406_v48 = vpop.f32.mrb[24].mxu1 }
 0x23c   : > { %8936 = vst [vmem:[#allocation14_spill] sm:$0xff] %v7406_v48  ;;  %2276 = vmax.xlane.f32.xlu1 %v7394_v41  ;;  %v7409_v50 = vpop.f32.mrb[25].mxu0  ;;  %v7411_v51 = vpop.f32.mrb[25].mxu1 }
 0x23d   : > { %2246 = vmax.xlane.f32.xlu0 %v7409_v50 }
 0x240   : > { %2248 = vmax.xlane.f32.xlu1 %v7404_v45 }
 0x241   : > { %2278 = vmax.xlane.f32.xlu0 %v7411_v51 }
 0x243   : > { %v7421_v58 = vpop.f32.mrb[26].mxu0  ;;  %v7423_v59 = vpop.f32.mrb[26].mxu1 }
 0x244   : > { %8937 = vst [vmem:[#allocation15_spill] sm:$0xff] %v7421_v58  ;;  %8938 = vst [vmem:[#allocation16_spill] sm:$0xff] %v7423_v59  ;;  %2280 = vmax.xlane.f32.xlu1 %v7406_v48  ;;  %v7426_v61 = vpop.f32.mrb[27].mxu0  ;;  %v7428_v0 = vpop.f32.mrb[27].mxu1 }
 0x245   : > { %8939 = vst [vmem:[#allocation17_spill] sm:$0xff] %v7426_v61  ;;  %8940 = vst [vmem:[#allocation18_spill] sm:$0xff] %v7428_v0  ;;  %2250 = vmax.xlane.f32.xlu0 %v7426_v61 }
 0x248   : > { %2252 = vmax.xlane.f32.xlu1 %v7421_v58 }
 0x249   : > { %2282 = vmax.xlane.f32.xlu0 %v7428_v0 }
 0x24b   : > { %v7433_v2 = vpop.f32.mrb[28].mxu0  ;;  %v7435_v3 = vpop.f32.mrb[28].mxu1 }
 0x24c   : > { %8941 = vst [vmem:[#allocation19_spill] sm:$0xff] %v7433_v2  ;;  %8942 = vst [vmem:[#allocation20_spill] sm:$0xff] %v7435_v3  ;;  %2284 = vmax.xlane.f32.xlu1 %v7423_v59  ;;  %v7438_v5 = vpop.f32.mrb[29].mxu0  ;;  %v7440_v8 = vpop.f32.mrb[29].mxu1 }
 0x24d   : > { %8943 = vst [vmem:[#allocation21_spill] sm:$0xff] %v7438_v5  ;;  %8944 = vst [vmem:[#allocation22_spill] sm:$0xff] %v7440_v8  ;;  %2254 = vmax.xlane.f32.xlu0 %v7438_v5 }
 0x250   : > { %2256 = vmax.xlane.f32.xlu1 %v7433_v2 }
 0x251   : > { %2286 = vmax.xlane.f32.xlu0 %v7440_v8 }
 0x253   : > { %v7445_v10 = vpop.f32.mrb[30].mxu0  ;;  %v7447_v11 = vpop.f32.mrb[30].mxu1 }
 0x254   : > { %8945 = vst [vmem:[#allocation23_spill] sm:$0xff] %v7445_v10  ;;  %8946 = vst [vmem:[#allocation24_spill] sm:$0xff] %v7447_v11  ;;  %2288 = vmax.xlane.f32.xlu1 %v7435_v3  ;;  %v7450_v53 = vpop.f32.mrb[31].mxu0  ;;  %v7452_v56 = vpop.f32.mrb[31].mxu1 }
 0x255   : > { %8947 = vst [vmem:[#allocation25_spill] sm:$0xff] %v7450_v53  ;;  %8948 = vst [vmem:[#allocation26_spill] sm:$0xff] %v7452_v56  ;;  %2258 = vmax.xlane.f32.xlu0 %v7450_v53 }
 0x258   : > { %2260 = vmax.xlane.f32.xlu1 %v7445_v10 }
 0x259   : > { %2290 = vmax.xlane.f32.xlu0 %v7452_v56 }
 0x25b   : > { %v7457_v5 = vpop.f32.mrb[32].mxu0  ;;  %v7459_v2 = vpop.f32.mrb[32].mxu1 }
 0x25c   : > { %8949 = vst [vmem:[#allocation27_spill] sm:$0xff] %v7457_v5  ;;  %8950 = vst [vmem:[#allocation28_spill] sm:$0xff] %v7459_v2  ;;  %2292 = vmax.xlane.f32.xlu1 %v7447_v11  ;;  %v7462_v8 = vpop.f32.mrb[33].mxu0  ;;  %v7464_v59 = vpop.f32.mrb[33].mxu1 }
 0x25d   : > { %8951 = vst [vmem:[#allocation29_spill] sm:$0xff] %v7462_v8  ;;  %8952 = vst [vmem:[#allocation30_spill] sm:$0xff] %v7464_v59  ;;  %2294 = vmax.xlane.f32.xlu0 %v7462_v8 }
 0x260   : > { %2296 = vmax.xlane.f32.xlu1 %v7457_v5 }
 0x261   : > { %2326 = vmax.xlane.f32.xlu0 %v7464_v59 }
 0x263   : > { %v7469_v53 = vpop.f32.mrb[34].mxu0  ;;  %v7471_v10 = vpop.f32.mrb[34].mxu1 }
 0x264   : > { %8953 = vst [vmem:[#allocation31_spill] sm:$0xff] %v7469_v53  ;;  %8954 = vst [vmem:[#allocation32_spill] sm:$0xff] %v7471_v10  ;;  %2328 = vmax.xlane.f32.xlu1 %v7459_v2  ;;  %v7474_v56 = vpop.f32.mrb[35].mxu0  ;;  %v7476_v3 = vpop.f32.mrb[35].mxu1 }
 0x265   : > { %8955 = vst [vmem:[#allocation33_spill] sm:$0xff] %v7474_v56  ;;  %8956 = vst [vmem:[#allocation34_spill] sm:$0xff] %v7476_v3  ;;  %2298 = vmax.xlane.f32.xlu0 %v7474_v56 }
 0x268   : > { %2300 = vmax.xlane.f32.xlu1 %v7469_v53 }
 0x269   : > { %v2169_v11 = vpop.xlane.xlu1 %2168  ;;  %2330 = vmax.xlane.f32.xlu0 %v7476_v3 }
 0x26a   : > { %v2423_v5 = vsub.f32 %v7241_v36, %v2169_v11  ;;  %v2167_v59 = vpop.xlane.xlu0 %2166 }
 0x26b   : > { %v2422_v8 = vsub.f32 %v7244_v38, %v2167_v59  ;;  %v7483_v0 = vpop.f32.mrb[36].mxu0  ;;  %v7485_v58 = vpop.f32.mrb[36].mxu1 }
 0x26c   : > { %8957 = vst [vmem:[#allocation35_spill] sm:$0xff] %v7485_v58  ;;  %v2552_v2 = vmul.f32 1.442695, %v2423_v5  ;;  %2332 = vmax.xlane.f32.xlu1 %v7471_v10  ;;  %v7488_v61 = vpop.f32.mrb[37].mxu0  ;;  %v7490_v56 = vpop.f32.mrb[37].mxu1 }
 0x26d   : > { %8958 = vst [vmem:[#allocation36_spill] sm:$0xff] %v7488_v61  ;;  %v2550_v53 = vmul.f32 1.442695, %v2422_v8  ;;  %v2201_v48 = vpop.xlane.xlu1 %2200  ;;  %2302 = vmax.xlane.f32.xlu0 %v7488_v61 }
 0x26e   : > { %6138 = vpow2.f32 %v2552_v2  ;;  %v2439_v36 = vsub.f32 %v7246_v39, %v2201_v48 }
 0x26f   : > { %6140 = vpow2.f32 %v2550_v53 }
 0x270   : > { %2304 = vmax.xlane.f32.xlu1 %v7483_v0  ;;  %v2584_v38 = vmul.f32 1.442695, %v2439_v36 }
 0x271   : > { %v2199_v59 = vpop.xlane.xlu1 %2198  ;;  %2334 = vmax.xlane.f32.xlu0 %v7490_v56 }
 0x272   : > { %v2438_v5 = vsub.f32 %v7250_v40, %v2199_v59  ;;  %v2171_v11 = vpop.xlane.xlu0 %2170  ;;  %6142 = vpow2.f32 %v2584_v38 }
 0x273   : > { %v2424_v10 = vsub.f32 %v7259_v46, %v2171_v11  ;;  %v7498_v3 = vpop.f32.mrb[38].mxu0  ;;  %v7500_v8 = vpop.f32.mrb[38].mxu1 }
 0x274   : > { %8959 = vst [vmem:[#allocation37_spill] sm:$0xff] %v7500_v8  ;;  %v2582_v61 = vmul.f32 1.442695, %v2438_v5  ;;  %2336 = vmax.xlane.f32.xlu1 %v7485_v58  ;;  %v7503_v39 = vpop.f32.mrb[39].mxu0  ;;  %v7505_v48 = vpop.f32.mrb[39].mxu1 }
 0x275   : > { %8960 = vst [vmem:[#allocation38_spill] sm:$0xff] %v7505_v48  ;;  %v2554_v2 = vmul.f32 1.442695, %v2424_v10  ;;  %v2173_v53 = vpop.xlane.xlu1 %2172  ;;  %2306 = vmax.xlane.f32.xlu0 %v7503_v39 }
 0x276   : > { %6144 = vpow2.f32 %v2582_v61  ;;  %v2425_v40 = vsub.f32 %v7256_v44, %v2173_v53  ;;  %v2203_v46 = vpop.xlane.xlu0 %2202 }
 0x277   : > { %v2440_v36 = vsub.f32 %v7265_v49, %v2203_v46  ;;  %6146 = vpow2.f32 %v2554_v2 }
 0x278   : > { %v7510_v59 = vpop.eup %6138  ;;  %v2556_v5 = vmul.f32 1.442695, %v2425_v40  ;;  %2308 = vmax.xlane.f32.xlu1 %v7498_v3 }
 0x279   : > { %v7513_v11 = vpop.eup %6140  ;;  %v2586_v58 = vmul.f32 1.442695, %v2440_v36  ;;  %v2205_v38 = vpop.xlane.xlu1 %2204  ;;  %2338 = vmax.xlane.f32.xlu0 %v7505_v48 }
 0x27a   : > { %6148 = vpow2.f32 %v2556_v5  ;;  %v2441_v61 = vsub.f32 %v7261_v47, %v2205_v38  ;;  %v2175_v10 = vpop.xlane.xlu0 %2174  ;;  %v5804_v44 = vpack.c.bf16 %v7510_v59, %v7513_v11 }
 0x27b   : > { %v2426_v49 = vsub.f32 %v7275_v54, %v2175_v10  ;;  %v7520_v53 = vpop.f32.mrb[40].mxu0  ;;  %v7522_v40 = vpop.f32.mrb[40].mxu1  ;;  %6150 = vpow2.f32 %v2586_v58 }
 0x27c   : > { %8961 = vst [vmem:[#allocation39_spill] sm:$0xff] %v7520_v53  ;;  %8962 = vst [vmem:[#allocation40_spill] sm:$0xff] %v7522_v40  ;;  %v2588_v46 = vmul.f32 1.442695, %v2441_v61  ;;  %2340 = vmax.xlane.f32.xlu1 %v7500_v8  ;;  %v7525_v2 = vpop.f32.mrb[41].mxu0  ;;  %5805 = vmatprep.subr.bf16.mxu0 %v5804_v44  ;;  %v7527_v36 = vpop.f32.mrb[41].mxu1 }
 0x27d   : > { %8963 = vst [vmem:[#allocation41_spill] sm:$0xff] %v7525_v2  ;;  %8964 = vst [vmem:[#allocation42_spill] sm:$0xff] %v7527_v36  ;;  %v2558_v47 = vmul.f32 1.442695, %v2426_v49  ;;  %v2177_v5 = vpop.xlane.xlu1 %2176  ;;  %2310 = vmax.xlane.f32.xlu0 %v7525_v2  ;;  %5807 = vmatpush3.bf16.xpose.msra.mxu0 %v5804_v44  ;;  %v7531_v10 = vpop.eup %6142 }
 0x27e   : > { %6152 = vpow2.f32 %v2588_v46  ;;  %v2427_v54 = vsub.f32 %v7272_v52, %v2177_v5  ;;  %v2207_v38 = vpop.xlane.xlu0 %2206 }
 0x27f   : > { %v2442_v61 = vsub.f32 %v7281_v57, %v2207_v38  ;;  %6154 = vpow2.f32 %v2558_v47 }
 0x280   : > { %v7534_v8 = vpop.eup %6144  ;;  %v2560_v48 = vmul.f32 1.442695, %v2427_v54  ;;  %2312 = vmax.xlane.f32.xlu1 %v7520_v53 }
 0x281   : > { %v2590_v58 = vmul.f32 1.442695, %v2442_v61  ;;  %v2209_v49 = vpop.xlane.xlu1 %2208  ;;  %2342 = vmax.xlane.f32.xlu0 %v7527_v36  ;;  %v5836_v44 = vpack.c.bf16 %v7531_v10, %v7534_v8  ;;  %v7541_v5 = vpop.eup %6146 }
 0x282   : > { %6156 = vpow2.f32 %v2560_v48  ;;  %v2443_v52 = vsub.f32 %v7277_v55, %v2209_v49  ;;  %v2179_v46 = vpop.xlane.xlu0 %2178 }
 0x283   : > { %v2428_v57 = vsub.f32 %v7291_v62, %v2179_v46  ;;  %v7544_v38 = vpop.f32.mrb[42].mxu0  ;;  %5837 = vmatprep.subr.bf16.mxu1 %v5836_v44  ;;  %v7546_v54 = vpop.f32.mrb[42].mxu1  ;;  %6158 = vpow2.f32 %v2590_v58 }
 0x284   : > { %8965 = vst [vmem:[#allocation43_spill] sm:$0xff] %v7544_v38  ;;  %8966 = vst [vmem:[#allocation44_spill] sm:$0xff] %v7546_v54  ;;  %v7548_v47 = vpop.eup %6148  ;;  %v2592_v61 = vmul.f32 1.442695, %v2443_v52  ;;  %5839 = vmatpush3.bf16.xpose.msra.mxu1 %v5836_v44  ;;  %2344 = vmax.xlane.f32.xlu1 %v7522_v40  ;;  %v7551_v36 = vpop.f32.mrb[43].mxu0 }
 0x285   : > { %8967 = vst [vmem:[#allocation45_spill] sm:$0xff] %v7551_v36  ;;  %v7553_v48 = vpop.f32.mrb[43].mxu1  ;;  %v2562_v55 = vmul.f32 1.442695, %v2428_v57  ;;  %v2181_v49 = vpop.xlane.xlu1 %2180  ;;  %2314 = vmax.xlane.f32.xlu0 %v7551_v36  ;;  %v5808_v62 = vpack.c.bf16 %v7548_v47, %v7541_v5 }
 0x286   : > { %8968 = vst [vmem:[#allocation46_spill] sm:$0xff] %v7553_v48  ;;  %6160 = vpow2.f32 %v2592_v61  ;;  %v2429_v46 = vsub.f32 %v7288_v60, %v2181_v49  ;;  %v2211_v53 = vpop.xlane.xlu0 %2210  ;;  %v7559_v52 = vpop.eup %6150 }
 0x287   : > { %v2444_v44 = vsub.f32 %v7297_v1, %v2211_v53  ;;  %5809 = vmatprep.subr.bf16.mxu0 %v5808_v62  ;;  %6162 = vpow2.f32 %v2562_v55 }
 0x288   : > { %v7562_v40 = vpop.eup %6152  ;;  %v2564_v2 = vmul.f32 1.442695, %v2429_v46  ;;  %2316 = vmax.xlane.f32.xlu1 %v7544_v38  ;;  %5811 = vmatpush3.bf16.xpose.msra.mxu0 %v5808_v62 }
 0x289   : > { %v2594_v58 = vmul.f32 1.442695, %v2444_v44  ;;  %v2213_v57 = vpop.xlane.xlu1 %2212  ;;  %2346 = vmax.xlane.f32.xlu0 %v7553_v48  ;;  %v5840_v60 = vpack.c.bf16 %v7562_v40, %v7559_v52  ;;  %v7569_v1 = vpop.eup %6154 }
 0x28a   : > { %6164 = vpow2.f32 %v2564_v2  ;;  %v2445_v61 = vsub.f32 %v7293_v63, %v2213_v57  ;;  %v2183_v49 = vpop.xlane.xlu0 %2182 }
 0x28b   : > { %v2430_v53 = vsub.f32 %v7307_v6, %v2183_v49  ;;  %v7572_v46 = vpop.f32.mrb[44].mxu0  ;;  %5841 = vmatprep.subr.bf16.mxu1 %v5840_v60  ;;  %v7574_v62 = vpop.f32.mrb[44].mxu1  ;;  %6166 = vpow2.f32 %v2594_v58 }
 0x28c   : > { %8969 = vst [vmem:[#allocation47_spill] sm:$0xff] %v7572_v46  ;;  %8970 = vst [vmem:[#allocation48_spill] sm:$0xff] %v7574_v62  ;;  %v7576_v55 = vpop.eup %6156  ;;  %v2596_v44 = vmul.f32 1.442695, %v2445_v61  ;;  %2348 = vmax.xlane.f32.xlu1 %v7546_v54  ;;  %v7579_v48 = vpop.f32.mrb[45].mxu0  ;;  %5843 = vmatpush3.bf16.xpose.msra.mxu1 %v5840_v60 }
 0x28d   : > { %8971 = vst [vmem:[#allocation49_spill] sm:$0xff] %v7579_v48  ;;  %v7581_v2 = vpop.f32.mrb[45].mxu1  ;;  %v2566_v63 = vmul.f32 1.442695, %v2430_v53  ;;  %v2185_v57 = vpop.xlane.xlu1 %2184  ;;  %2318 = vmax.xlane.f32.xlu0 %v7579_v48  ;;  %v5812_v6 = vpack.c.bf16 %v7576_v55, %v7569_v1 }
 0x28e   : > { %8972 = vst [vmem:[#allocation50_spill] sm:$0xff] %v7581_v2  ;;  %6168 = vpow2.f32 %v2596_v44  ;;  %v2431_v49 = vsub.f32 %v7304_v4, %v2185_v57  ;;  %v2215_v38 = vpop.xlane.xlu0 %2214  ;;  %v7587_v61 = vpop.eup %6158 }
 0x28f   : > { %v2446_v54 = vsub.f32 %v7313_v9, %v2215_v38  ;;  %5813 = vmatprep.subr.bf16.mxu0 %v5812_v6  ;;  %6170 = vpow2.f32 %v2566_v63 }
 0x290   : > { %v7590_v60 = vpop.eup %6160  ;;  %v2568_v36 = vmul.f32 1.442695, %v2431_v49  ;;  %2320 = vmax.xlane.f32.xlu1 %v7572_v46  ;;  %5815 = vmatpush3.bf16.xpose.msra.mxu0 %v5812_v6 }
 0x291   : > { %v2598_v58 = vmul.f32 1.442695, %v2446_v54  ;;  %v2217_v53 = vpop.xlane.xlu1 %2216  ;;  %2350 = vmax.xlane.f32.xlu0 %v7581_v2  ;;  %v5844_v4 = vpack.c.bf16 %v7590_v60, %v7587_v61  ;;  %v7597_v9 = vpop.eup %6162 }
 0x292   : > { %6172 = vpow2.f32 %v2568_v36  ;;  %v2447_v44 = vsub.f32 %v7309_v7, %v2217_v53  ;;  %v2187_v57 = vpop.xlane.xlu0 %2186 }
 0x293   : > { %v2432_v38 = vsub.f32 %v7325_v14, %v2187_v57  ;;  %v7600_v49 = vpop.f32.mrb[46].mxu0  ;;  %5845 = vmatprep.subr.bf16.mxu1 %v5844_v4  ;;  %v7602_v6 = vpop.f32.mrb[46].mxu1  ;;  %6174 = vpow2.f32 %v2598_v58 }
 0x294   : > { %8973 = vst [vmem:[#allocation51_spill] sm:$0xff] %v7600_v49  ;;  %8974 = vst [vmem:[#allocation52_spill] sm:$0xff] %v7602_v6  ;;  %v7604_v54 = vpop.eup %6164  ;;  %v2600_v63 = vmul.f32 1.442695, %v2447_v44  ;;  %2352 = vmax.xlane.f32.xlu1 %v7574_v62  ;;  %v7607_v2 = vpop.f32.mrb[47].mxu0  ;;  %5847 = vmatpush3.bf16.xpose.msra.mxu1 %v5844_v4 }
 0x295   : > { %8975 = vst [vmem:[#allocation53_spill] sm:$0xff] %v7607_v2  ;;  %v7609_v36 = vpop.f32.mrb[47].mxu1  ;;  %v2570_v7 = vmul.f32 1.442695, %v2432_v38  ;;  %v2189_v53 = vpop.xlane.xlu1 %2188  ;;  %2322 = vmax.xlane.f32.xlu0 %v7607_v2  ;;  %v5816_v14 = vpack.c.bf16 %v7604_v54, %v7597_v9 }
 0x296   : > { %8976 = vst [vmem:[#allocation54_spill] sm:$0xff] %v7609_v36  ;;  %6176 = vpow2.f32 %v2600_v63  ;;  %v2433_v57 = vsub.f32 %v7320_v12, %v2189_v53  ;;  %v2219_v46 = vpop.xlane.xlu0 %2218  ;;  %v7615_v44 = vpop.eup %6166 }
 0x297   : > { %v2448_v62 = vsub.f32 %v7327_v15, %v2219_v46  ;;  %5817 = vmatprep.subr.bf16.mxu0 %v5816_v14  ;;  %6178 = vpow2.f32 %v2570_v7 }
 0x298   : > { %v7618_v4 = vpop.eup %6168  ;;  %v2572_v48 = vmul.f32 1.442695, %v2433_v57  ;;  %2324 = vmax.xlane.f32.xlu1 %v7600_v49  ;;  %5819 = vmatpush3.bf16.xpose.msra.mxu0 %v5816_v14 }
 0x299   : > { %v2602_v58 = vmul.f32 1.442695, %v2448_v62  ;;  %v2221_v38 = vpop.xlane.xlu1 %2220  ;;  %2354 = vmax.xlane.f32.xlu0 %v7609_v36  ;;  %v5848_v12 = vpack.c.bf16 %v7618_v4, %v7615_v44  ;;  %v7625_v15 = vpop.eup %6170 }
 0x29a   : > { %6180 = vpow2.f32 %v2572_v48  ;;  %v2449_v63 = vsub.f32 %v7322_v13, %v2221_v38  ;;  %v2191_v53 = vpop.xlane.xlu0 %2190 }
 0x29b   : > { %v2434_v46 = vsub.f32 %v7337_v18, %v2191_v53  ;;  %v7628_v57 = vpop.f32.mrb[48].mxu0  ;;  %5849 = vmatprep.subr.bf16.mxu1 %v5848_v12  ;;  %v7630_v14 = vpop.f32.mrb[48].mxu1  ;;  %6182 = vpow2.f32 %v2602_v58 }
 0x29c   : > { %8977 = vst [vmem:[#allocation55_spill] sm:$0xff] %v7628_v57  ;;  %8978 = vst [vmem:[#allocation56_spill] sm:$0xff] %v7630_v14  ;;  %v7632_v62 = vpop.eup %6172  ;;  %v2604_v7 = vmul.f32 1.442695, %v2449_v63  ;;  %2356 = vmax.xlane.f32.xlu1 %v7602_v6  ;;  %v7635_v36 = vpop.f32.mrb[49].mxu0  ;;  %5851 = vmatpush3.bf16.xpose.msra.mxu1 %v5848_v12 }
 0x29d   : > { %8979 = vst [vmem:[#allocation57_spill] sm:$0xff] %v7635_v36  ;;  %v7637_v48 = vpop.f32.mrb[49].mxu1  ;;  %v2574_v13 = vmul.f32 1.442695, %v2434_v46  ;;  %v2193_v38 = vpop.xlane.xlu1 %2192  ;;  %2358 = vmax.xlane.f32.xlu0 %v7635_v36  ;;  %v5820_v18 = vpack.c.bf16 %v7632_v62, %v7625_v15 }
 0x29e   : > { %8980 = vst [vmem:[#allocation58_spill] sm:$0xff] %v7637_v48  ;;  %6184 = vpow2.f32 %v2604_v7  ;;  %v2435_v53 = vsub.f32 %v7332_v16, %v2193_v38  ;;  %v2223_v49 = vpop.xlane.xlu0 %2222  ;;  %v7643_v63 = vpop.eup %6174 }
 0x29f   : > { %v2450_v6 = vsub.f32 %v7339_v19, %v2223_v49  ;;  %5821 = vmatprep.subr.bf16.mxu0 %v5820_v18  ;;  %6186 = vpow2.f32 %v2574_v13 }
 0x2a0   : > { %v7646_v12 = vpop.eup %6176  ;;  %v2576_v2 = vmul.f32 1.442695, %v2435_v53  ;;  %2360 = vmax.xlane.f32.xlu1 %v7628_v57  ;;  %5823 = vmatpush3.bf16.xpose.msra.mxu0 %v5820_v18 }
 0x2a1   : > { %v2606_v58 = vmul.f32 1.442695, %v2450_v6  ;;  %v2225_v46 = vpop.xlane.xlu1 %2224  ;;  %2390 = vmax.xlane.f32.xlu0 %v7637_v48  ;;  %v5852_v16 = vpack.c.bf16 %v7646_v12, %v7643_v63  ;;  %v7653_v19 = vpop.eup %6178 }
 0x2a2   : > { %6188 = vpow2.f32 %v2576_v2  ;;  %v2451_v7 = vsub.f32 %v7334_v17, %v2225_v46  ;;  %v2195_v38 = vpop.xlane.xlu0 %2194 }
 0x2a3   : > { %v2436_v49 = vsub.f32 %v7349_v22, %v2195_v38  ;;  %v7656_v53 = vpop.f32.mrb[50].mxu0  ;;  %5853 = vmatprep.subr.bf16.mxu1 %v5852_v16  ;;  %v7658_v18 = vpop.f32.mrb[50].mxu1  ;;  %6190 = vpow2.f32 %v2606_v58 }
 0x2a4   : > { %8981 = vst [vmem:[#allocation59_spill] sm:$0xff] %v7656_v53  ;;  %8982 = vst [vmem:[#allocation60_spill] sm:$0xff] %v7658_v18  ;;  %v7660_v6 = vpop.eup %6180  ;;  %v2608_v13 = vmul.f32 1.442695, %v2451_v7  ;;  %2392 = vmax.xlane.f32.xlu1 %v7630_v14  ;;  %v7663_v48 = vpop.f32.mrb[51].mxu0  ;;  %5855 = vmatpush3.bf16.xpose.msra.mxu1 %v5852_v16 }
 0x2a5   : > { %8983 = vst [vmem:[#allocation61_spill] sm:$0xff] %v7663_v48  ;;  %v7665_v2 = vpop.f32.mrb[51].mxu1  ;;  %v2578_v17 = vmul.f32 1.442695, %v2436_v49  ;;  %v2197_v46 = vpop.xlane.xlu1 %2196  ;;  %2362 = vmax.xlane.f32.xlu0 %v7663_v48  ;;  %v5824_v22 = vpack.c.bf16 %v7660_v6, %v7653_v19 }
 0x2a6   : > { %8984 = vst [vmem:[#allocation62_spill] sm:$0xff] %v7665_v2  ;;  %6192 = vpow2.f32 %v2608_v13  ;;  %v2437_v38 = vsub.f32 %v7344_v20, %v2197_v46  ;;  %v2227_v57 = vpop.xlane.xlu0 %2226  ;;  %v7671_v7 = vpop.eup %6182 }
 0x2a7   : > { %v2452_v14 = vsub.f32 %v7351_v23, %v2227_v57  ;;  %5825 = vmatprep.subr.bf16.mxu0 %v5824_v22  ;;  %6194 = vpow2.f32 %v2578_v17 }
 0x2a8   : > { %v7674_v16 = vpop.eup %6184  ;;  %v2580_v36 = vmul.f32 1.442695, %v2437_v38  ;;  %2364 = vmax.xlane.f32.xlu1 %v7656_v53  ;;  %5827 = vmatpush3.bf16.xpose.msra.mxu0 %v5824_v22 }
 0x2a9   : > { %v2610_v58 = vmul.f32 1.442695, %v2452_v14  ;;  %v2229_v49 = vpop.xlane.xlu1 %2228  ;;  %2394 = vmax.xlane.f32.xlu0 %v7665_v2  ;;  %v5856_v20 = vpack.c.bf16 %v7674_v16, %v7671_v7  ;;  %v7681_v23 = vpop.eup %6186 }
 0x2aa   : > { %6196 = vpow2.f32 %v2580_v36  ;;  %v2453_v13 = vsub.f32 %v7346_v21, %v2229_v49  ;;  %v2231_v46 = vpop.xlane.xlu0 %2230 }
 0x2ab   : > { %v2454_v57 = vsub.f32 %v7361_v26, %v2231_v46  ;;  %v7684_v38 = vpop.f32.mrb[52].mxu0  ;;  %5857 = vmatprep.subr.bf16.mxu1 %v5856_v20  ;;  %v7686_v22 = vpop.f32.mrb[52].mxu1  ;;  %6198 = vpow2.f32 %v2610_v58 }
 0x2ac   : > { %8985 = vst [vmem:[#allocation63_spill] sm:$0xff] %v7684_v38  ;;  %8986 = vst [vmem:[#allocation64_spill] sm:$0xff] %v7686_v22  ;;  %v7688_v14 = vpop.eup %6188  ;;  %v2612_v17 = vmul.f32 1.442695, %v2453_v13  ;;  %2396 = vmax.xlane.f32.xlu1 %v7658_v18  ;;  %v7691_v2 = vpop.f32.mrb[53].mxu0  ;;  %5859 = vmatpush3.bf16.xpose.msra.mxu1 %v5856_v20 }
 0x2ad   : > { %8987 = vst [vmem:[#allocation65_spill] sm:$0xff] %v7691_v2  ;;  %v7693_v36 = vpop.f32.mrb[53].mxu1  ;;  %v2614_v21 = vmul.f32 1.442695, %v2454_v57  ;;  %v2233_v49 = vpop.xlane.xlu1 %2232  ;;  %2366 = vmax.xlane.f32.xlu0 %v7691_v2  ;;  %v5828_v26 = vpack.c.bf16 %v7688_v14, %v7681_v23 }
 0x2ae   : > { %8988 = vst [vmem:[#allocation66_spill] sm:$0xff] %v7693_v36  ;;  %6200 = vpow2.f32 %v2612_v17  ;;  %v2455_v46 = vsub.f32 %v7356_v24, %v2233_v49  ;;  %v2263_v53 = vpop.xlane.xlu0 %2262  ;;  %v7699_v13 = vpop.eup %6190 }
 0x2af   : > { %v2470_v18 = vsub.f32 %v7363_v27, %v2263_v53  ;;  %5829 = vmatprep.subr.bf16.mxu0 %v5828_v26  ;;  %6202 = vpow2.f32 %v2614_v21 }
 0x2b0   : > { %v7702_v20 = vpop.eup %6192  ;;  %v2616_v48 = vmul.f32 1.442695, %v2455_v46  ;;  %2368 = vmax.xlane.f32.xlu1 %v7684_v38  ;;  %5831 = vmatpush3.bf16.xpose.msra.mxu0 %v5828_v26 }
 0x2b1   : > { %v2646_v58 = vmul.f32 1.442695, %v2470_v18  ;;  %v2265_v57 = vpop.xlane.xlu1 %2264  ;;  %2398 = vmax.xlane.f32.xlu0 %v7693_v36  ;;  %v5860_v24 = vpack.c.bf16 %v7702_v20, %v7699_v13  ;;  %v7709_v27 = vpop.eup %6194 }
 0x2b2   : > { %6204 = vpow2.f32 %v2616_v48  ;;  %v2471_v17 = vsub.f32 %v7358_v25, %v2265_v57  ;;  %v2235_v49 = vpop.xlane.xlu0 %2234 }
 0x2b3   : > { %v2456_v53 = vsub.f32 %v7373_v30, %v2235_v49  ;;  %v7712_v46 = vpop.f32.mrb[54].mxu0  ;;  %5861 = vmatprep.subr.bf16.mxu1 %v5860_v24  ;;  %6206 = vpow2.f32 %v2646_v58 }
 0x2b4   : > { %8989 = vst [vmem:[#allocation67_spill] sm:$0xff] %v7712_v46  ;;  %v7714_v26 = vpop.eup %6196  ;;  %v2648_v18 = vmul.f32 1.442695, %v2471_v17  ;;  %2400 = vmax.xlane.f32.xlu1 %v7686_v22  ;;  %v7717_v21 = vpop.f32.mrb[55].mxu0  ;;  %5863 = vmatpush3.bf16.xpose.msra.mxu1 %v5860_v24 }
 0x2b5   : > { %8990 = vst [vmem:[#allocation68_spill] sm:$0xff] %v7717_v21  ;;  %v2618_v48 = vmul.f32 1.442695, %v2456_v53  ;;  %v2237_v36 = vpop.xlane.xlu1 %2236  ;;  %2370 = vmax.xlane.f32.xlu0 %v7717_v21  ;;  %v7720_v25 = vpop.f32.mrb[54].mxu1  ;;  %v5832_v30 = vpack.c.bf16 %v7714_v26, %v7709_v27 }
 0x2b6   : > { %8991 = vst [vmem:[#allocation69_spill] sm:$0xff] %v7720_v25  ;;  %6208 = vpow2.f32 %v2648_v18  ;;  %v2457_v57 = vsub.f32 %v7368_v28, %v2237_v36  ;;  %v2267_v49 = vpop.xlane.xlu0 %2266  ;;  %v7725_v17 = vpop.f32.mrb[55].mxu1 }
 0x2b7   : > { %8992 = vst [vmem:[#allocation70_spill] sm:$0xff] %v7725_v17  ;;  %v7727_v22 = vpop.eup %6198  ;;  %v2472_v24 = vsub.f32 %v7375_v31, %v2267_v49  ;;  %5833 = vmatprep.subr.bf16.mxu0 %v5832_v30  ;;  %6210 = vpow2.f32 %v2618_v48 }
 0x2b8   : > { %v7730_v58 = vpop.eup %6200  ;;  %v2620_v53 = vmul.f32 1.442695, %v2457_v57  ;;  %2372 = vmax.xlane.f32.xlu1 %v7712_v46  ;;  %5835 = vmatpush3.bf16.xpose.msra.mxu0 %v5832_v30  ;;  %v337_v46 = vld [vmem:[%s7415_s18 + $0x20] sm:$0xff] }
 0x2b9   : > { %v2650_v21 = vmul.f32 1.442695, %v2472_v24  ;;  %v2269_v18 = vpop.xlane.xlu1 %2268  ;;  %2402 = vmax.xlane.f32.xlu0 %v7725_v17  ;;  %v5864_v28 = vpack.c.bf16 %v7730_v58, %v7727_v22  ;;  %v7737_v49 = vpop.eup %6202 }
 0x2ba   : > { %6212 = vpow2.f32 %v2620_v53  ;;  %v2473_v36 = vsub.f32 %v7370_v29, %v2269_v18  ;;  %v2239_v31 = vpop.xlane.xlu0 %2238  ;;  %v334_v53 = vld [vmem:[%s7415_s18 + $0x8] sm:$0xff] }
 0x2bb   : > { %v2458_v57 = vsub.f32 %v7385_v34, %v2239_v31  ;;  %v7740_v38 = vpop.f32.mrb[56].mxu0  ;;  %5865 = vmatprep.subr.bf16.mxu1 %v5864_v28  ;;  %6214 = vpow2.f32 %v2650_v21 }
 0x2bc   : > { %8993 = vst [vmem:[#allocation71_spill] sm:$0xff] %v7740_v38  ;;  %v7742_v48 = vpop.eup %6204  ;;  %v2652_v30 = vmul.f32 1.442695, %v2473_v36  ;;  %2404 = vmax.xlane.f32.xlu1 %v7720_v25  ;;  %v7745_v24 = vpop.f32.mrb[57].mxu0  ;;  %5867 = vmatpush3.bf16.xpose.msra.mxu1 %v5864_v28 }
 0x2bd   : > { %8994 = vst [vmem:[#allocation72_spill] sm:$0xff] %v7742_v48  ;;  %8995 = vst [vmem:[#allocation73_spill] sm:$0xff] %v7745_v24  ;;  %v2622_v29 = vmul.f32 1.442695, %v2458_v57  ;;  %v2241_v18 = vpop.xlane.xlu1 %2240  ;;  %2374 = vmax.xlane.f32.xlu0 %v7745_v24  ;;  %v7749_v34 = vpop.f32.mrb[56].mxu1  ;;  %v5868_v31 = vpack.c.bf16 %v7742_v48, %v7737_v49 }
 0x2be   : > { %8996 = vst [vmem:[#allocation74_spill] sm:$0xff] %v7749_v34  ;;  %6216 = vpow2.f32 %v2652_v30  ;;  %v2459_v36 = vsub.f32 %v7380_v32, %v2241_v18  ;;  %v2271_v17 = vpop.xlane.xlu0 %2270  ;;  %v7754_v25 = vpop.f32.mrb[57].mxu1  ;;  %v336_v30 = vld [vmem:[%s7415_s18 + $0x18] sm:$0xff] }
 0x2bf   : > { %8997 = vst [vmem:[#allocation75_spill] sm:$0xff] %v7754_v25  ;;  %v7757_v28 = vpop.eup %6206  ;;  %v2474_v21 = vsub.f32 %v7387_v35, %v2271_v17  ;;  %5869 = vmatprep.subr.bf16.mxu0 %v5868_v31  ;;  %5525 = vmatmul.mubr.f32.vlgmr.msra.gmra.mrb[64].mxu0 %v334_v53  ;;  %6218 = vpow2.f32 %v2622_v29  ;;  %v339_v53 = vld [vmem:[%s7415_s18 + $0x30] sm:$0xff] }
 0x2c0   : > { %v7760_v57 = vpop.eup %6208  ;;  %v2624_v24 = vmul.f32 1.442695, %v2459_v36  ;;  %2376 = vmax.xlane.f32.xlu1 %v7740_v38  ;;  %5871 = vmatpush3.bf16.xpose.msra.mxu0 %v5868_v31 }
 0x2c1   : > { %v2654_v32 = vmul.f32 1.442695, %v2474_v21  ;;  %v2273_v18 = vpop.xlane.xlu1 %2272  ;;  %2406 = vmax.xlane.f32.xlu0 %v7754_v25  ;;  %v5900_v2 = vpack.c.bf16 %v7760_v57, %v7757_v28  ;;  %5594 = vmatprep.mubr.f32.mxu0 %v337_v46  ;;  %v7769_v48 = vpop.eup %6210 }
 0x2c2   : > { %6220 = vpow2.f32 %v2624_v24  ;;  %v2475_v35 = vsub.f32 %v7382_v33, %v2273_v18  ;;  %v2243_v17 = vpop.xlane.xlu0 %2242 }
 0x2c3   : > { %v2460_v36 = vsub.f32 %v7397_v42, %v2243_v17  ;;  %v7772_v31 = vpop.f32.mrb[58].mxu0  ;;  %5901 = vmatprep.subr.bf16.mxu1 %v5900_v2  ;;  %5560 = vmatmul.mubr.f32.vlgmr.msra.gmra.mrb[64].mxu1 %v336_v30  ;;  %6222 = vpow2.f32 %v2654_v32 }
 0x2c4   : > { %8998 = vst [vmem:[#allocation76_spill] sm:$0xff] %v7772_v31  ;;  %v7774_v29 = vpop.eup %6212  ;;  %v2656_v21 = vmul.f32 1.442695, %v2475_v35  ;;  %2408 = vmax.xlane.f32.xlu1 %v7749_v34  ;;  %v7777_v25 = vpop.f32.mrb[59].mxu0  ;;  %5903 = vmatpush3.bf16.xpose.msra.mxu1 %v5900_v2 }
 0x2c5   : > { %8999 = vst [vmem:[#allocation77_spill] sm:$0xff] %v7777_v25  ;;  %v2626_v33 = vmul.f32 1.442695, %v2460_v36  ;;  %v2245_v46 = vpop.xlane.xlu1 %2244  ;;  %2378 = vmax.xlane.f32.xlu0 %v7777_v25  ;;  %v7780_v24 = vpop.f32.mrb[58].mxu1  ;;  %v5872_v42 = vpack.c.bf16 %v7774_v29, %v7769_v48  ;;  %5629 = vmatprep.mubr.f32.mxu1 %v339_v53 }
 0x2c6   : > { %9000 = vst [vmem:[#allocation78_spill] sm:$0xff] %v7780_v24  ;;  %6224 = vpow2.f32 %v2656_v21  ;;  %v2461_v30 = vsub.f32 %v7392_v37, %v2245_v46  ;;  %v2275_v18 = vpop.xlane.xlu0 %2274  ;;  %v7785_v35 = vpop.f32.mrb[59].mxu1 }
 0x2c7   : > { %9001 = vst [vmem:[#allocation79_spill] sm:$0xff] %v7785_v35  ;;  %v7787_v17 = vpop.eup %6214  ;;  %v2476_v2 = vsub.f32 %v7399_v43, %v2275_v18  ;;  %5873 = vmatprep.subr.bf16.mxu0 %v5872_v42  ;;  %6226 = vpow2.f32 %v2626_v33 }
 0x2c8   : > { %9002 = vst [vmem:[#allocation80_spill] sm:$0xff] %v7787_v17  ;;  %v7790_v32 = vpop.eup %6216  ;;  %v2628_v36 = vmul.f32 1.442695, %v2461_v30  ;;  %2380 = vmax.xlane.f32.xlu1 %v7772_v31  ;;  %5875 = vmatpush3.bf16.xpose.msra.mxu0 %v5872_v42 }
 0x2c9   : > { %9003 = vst [vmem:[#allocation81_spill] sm:$0xff] %v7790_v32  ;;  %v2658_v25 = vmul.f32 1.442695, %v2476_v2  ;;  %v2277_v53 = vpop.xlane.xlu1 %2276  ;;  %2410 = vmax.xlane.f32.xlu0 %v7785_v35  ;;  %v5904_v37 = vpack.c.bf16 %v7790_v32, %v7787_v17  ;;  %v7797_v43 = vpop.eup %6218 }
 0x2ca   : > { %6228 = vpow2.f32 %v2628_v36  ;;  %v2477_v21 = vsub.f32 %v7394_v41, %v2277_v53  ;;  %v2247_v46 = vpop.xlane.xlu0 %2246 }
 0x2cb   : > { %v2462_v18 = vsub.f32 %v7409_v50, %v2247_v46  ;;  %v7800_v30 = vpop.f32.mrb[60].mxu0  ;;  %5905 = vmatprep.subr.bf16.mxu1 %v5904_v37  ;;  %6230 = vpow2.f32 %v2658_v25 }
 0x2cc   : > { %9004 = vst [vmem:[#allocation82_spill] sm:$0xff] %v7800_v30  ;;  %v7802_v42 = vpop.eup %6220  ;;  %v2660_v33 = vmul.f32 1.442695, %v2477_v21  ;;  %2412 = vmax.xlane.f32.xlu1 %v7780_v24  ;;  %v7805_v2 = vpop.f32.mrb[61].mxu0  ;;  %5907 = vmatpush3.bf16.xpose.msra.mxu1 %v5904_v37 }
 0x2cd   : > { %9005 = vst [vmem:[#allocation83_spill] sm:$0xff] %v7805_v2  ;;  %v2630_v36 = vmul.f32 1.442695, %v2462_v18  ;;  %v2249_v35 = vpop.xlane.xlu1 %2248  ;;  %2382 = vmax.xlane.f32.xlu0 %v7805_v2  ;;  %v7808_v41 = vpop.f32.mrb[60].mxu1  ;;  %v5876_v50 = vpack.c.bf16 %v7802_v42, %v7797_v43 }
 0x2ce   : > { %9006 = vst [vmem:[#allocation84_spill] sm:$0xff] %v7808_v41  ;;  %6232 = vpow2.f32 %v2660_v33  ;;  %v2463_v53 = vsub.f32 %v7404_v45, %v2249_v35  ;;  %v2279_v46 = vpop.xlane.xlu0 %2278  ;;  %v7813_v21 = vpop.f32.mrb[61].mxu1  ;;  %v9010_v35 = vld [vmem:[#allocation14_spill] sm:$0xff] }
 0x2cf   : > { %9007 = vst [vmem:[#allocation85_spill] sm:$0xff] %v7813_v21  ;;  %v7815_v24 = vpop.eup %6222  ;;  %v2478_v37 = vsub.f32 %v7411_v51, %v2279_v46  ;;  %5877 = vmatprep.subr.bf16.mxu0 %v5876_v50  ;;  %6234 = vpow2.f32 %v2630_v36  ;;  %v9011_v46 = vld [vmem:[#allocation17_spill] sm:$0xff] }
 0x2d0   : > { %9008 = vst [vmem:[#allocation86_spill] sm:$0xff] %v7815_v24  ;;  %v7818_v25 = vpop.eup %6224  ;;  %v2632_v18 = vmul.f32 1.442695, %v2463_v53  ;;  %2384 = vmax.xlane.f32.xlu1 %v7800_v30  ;;  %5879 = vmatpush3.bf16.xpose.msra.mxu0 %v5876_v50 }
 0x2d1   : > { %9009 = vst [vmem:[#allocation87_spill] sm:$0xff] %v7818_v25  ;;  %v2662_v2 = vmul.f32 1.442695, %v2478_v37  ;;  %v2281_v31 = vpop.xlane.xlu1 %2280  ;;  %2414 = vmax.xlane.f32.xlu0 %v7813_v21  ;;  %v5908_v45 = vpack.c.bf16 %v7818_v25, %v7815_v24  ;;  %v7825_v51 = vpop.eup %6226  ;;  %v9017_v25 = vld [vmem:[#allocation18_spill] sm:$0xff] }
 0x2d2   : > { %6236 = vpow2.f32 %v2632_v18  ;;  %v2479_v33 = vsub.f32 %v9010_v35, %v2281_v31  ;;  %v2251_v34 = vpop.xlane.xlu0 %2250  ;;  %v9015_v35 = vld [vmem:[#allocation15_spill] sm:$0xff] }
 0x2d3   : > { %v2464_v38 = vsub.f32 %v9011_v46, %v2251_v34  ;;  %v7828_v53 = vpop.f32.mrb[62].mxu0  ;;  %5909 = vmatprep.subr.bf16.mxu1 %v5908_v45  ;;  %6238 = vpow2.f32 %v2662_v2 }
 0x2d4   : > { %9012 = vst [vmem:[#allocation14_spill] sm:$0xff] %v7828_v53  ;;  %v7830_v50 = vpop.eup %6228  ;;  %v2664_v36 = vmul.f32 1.442695, %v2479_v33  ;;  %2416 = vmax.xlane.f32.xlu1 %v7808_v41  ;;  %v7833_v37 = vpop.f32.mrb[63].mxu0  ;;  %5911 = vmatpush3.bf16.xpose.msra.mxu1 %v5908_v45 }
 0x2d5   : > { %9013 = vst [vmem:[#allocation17_spill] sm:$0xff] %v7833_v37  ;;  %v2634_v18 = vmul.f32 1.442695, %v2464_v38  ;;  %v2253_v21 = vpop.xlane.xlu1 %2252  ;;  %2386 = vmax.xlane.f32.xlu0 %v7833_v37  ;;  %v7836_v31 = vpop.f32.mrb[62].mxu1  ;;  %v5880_v34 = vpack.c.bf16 %v7830_v50, %v7825_v51 }
 0x2d6   : > { %9014 = vst [vmem:[#allocation88_spill] sm:$0xff] %v7836_v31  ;;  %6240 = vpow2.f32 %v2664_v36  ;;  %v2465_v46 = vsub.f32 %v9015_v35, %v2253_v21  ;;  %v2283_v30 = vpop.xlane.xlu0 %2282  ;;  %v7841_v33 = vpop.f32.mrb[63].mxu1  ;;  %v9018_v36 = vld [vmem:[#allocation16_spill] sm:$0xff] }
 0x2d7   : > { %9016 = vst [vmem:[#allocation15_spill] sm:$0xff] %v7841_v33  ;;  %v7843_v41 = vpop.eup %6230  ;;  %v2480_v45 = vsub.f32 %v9017_v25, %v2283_v30  ;;  %5881 = vmatprep.subr.bf16.mxu0 %v5880_v34  ;;  %6242 = vpow2.f32 %v2634_v18  ;;  %v9019_v25 = vld [vmem:[#allocation21_spill] sm:$0xff] }
 0x2d8   : > { %v7846_v38 = vpop.eup %6232  ;;  %v2636_v2 = vmul.f32 1.442695, %v2465_v46  ;;  %2388 = vmax.xlane.f32.xlu1 %v7828_v53  ;;  %5883 = vmatpush3.bf16.xpose.msra.mxu0 %v5880_v34 }
 0x2d9   : > { %v2666_v37 = vmul.f32 1.442695, %v2480_v45  ;;  %v2285_v24 = vpop.xlane.xlu1 %2284  ;;  %2418 = vmax.xlane.f32.xlu0 %v7841_v33  ;;  %v5912_v21 = vpack.c.bf16 %v7846_v38, %v7843_v41  ;;  %v7853_v30 = vpop.eup %6234 }
 0x2da   : > { %6244 = vpow2.f32 %v2636_v2  ;;  %v2481_v35 = vsub.f32 %v9018_v36, %v2285_v24  ;;  %v2255_v32 = vpop.xlane.xlu0 %2254  ;;  %v9020_v2 = vld [vmem:[#allocation19_spill] sm:$0xff] }
 0x2db   : > { %v2466_v17 = vsub.f32 %v9019_v25, %v2255_v32  ;;  %5913 = vmatprep.subr.bf16.mxu1 %v5912_v21  ;;  %6246 = vpow2.f32 %v2666_v37  ;;  %v9021_v25 = vld [vmem:[#allocation22_spill] sm:$0xff] }
 0x2dc   : > { %v7856_v46 = vpop.eup %6236  ;;  %v2668_v34 = vmul.f32 1.442695, %v2481_v35  ;;  %2420 = vmax.xlane.f32.xlu1 %v7836_v31  ;;  %5915 = vmatpush3.bf16.xpose.msra.mxu1 %v5912_v21 }
 0x2dd   : > { %v2638_v18 = vmul.f32 1.442695, %v2466_v17  ;;  %v2257_v45 = vpop.xlane.xlu1 %2256  ;;  %2806 = vadd.xlane.f32.xlu0 %v7513_v11  ;;  %v5884_v24 = vpack.c.bf16 %v7856_v46, %v7853_v30  ;;  %v7863_v32 = vpop.eup %6238 }
 0x2de   : > { %6248 = vpow2.f32 %v2668_v34  ;;  %v2467_v36 = vsub.f32 %v9020_v2, %v2257_v45  ;;  %v2287_v33 = vpop.xlane.xlu0 %2286  ;;  %v9022_v34 = vld [vmem:[#allocation20_spill] sm:$0xff] }
 0x2df   : > { %v2482_v53 = vsub.f32 %v9021_v25, %v2287_v33  ;;  %5885 = vmatprep.subr.bf16.mxu0 %v5884_v24  ;;  %6250 = vpow2.f32 %v2638_v18  ;;  %v9023_v25 = vld [vmem:[#allocation25_spill] sm:$0xff] }
 0x2e0   : > { %v7866_v35 = vpop.eup %6240  ;;  %v2640_v21 = vmul.f32 1.442695, %v2467_v36  ;;  %2808 = vadd.xlane.f32.xlu1 %v7510_v59  ;;  %5887 = vmatpush3.bf16.xpose.msra.mxu0 %v5884_v24  ;;  %v9024_v24 = vld [vmem:[#allocation23_spill] sm:$0xff] }
 0x2e1   : > { %v2670_v11 = vmul.f32 1.442695, %v2482_v53  ;;  %v2289_v17 = vpop.xlane.xlu1 %2288  ;;  %2810 = vadd.xlane.f32.xlu0 %v7541_v5  ;;  %v5916_v37 = vpack.c.bf16 %v7866_v35, %v7863_v32  ;;  %v7873_v33 = vpop.eup %6242 }
 0x2e2   : > { %6252 = vpow2.f32 %v2640_v21  ;;  %v2483_v45 = vsub.f32 %v9022_v34, %v2289_v17  ;;  %v2259_v2 = vpop.xlane.xlu0 %2258 }
 0x2e3   : > { %v2468_v31 = vsub.f32 %v9023_v25, %v2259_v2  ;;  %5917 = vmatprep.subr.bf16.mxu1 %v5916_v37  ;;  %6254 = vpow2.f32 %v2670_v11  ;;  %v9025_v2 = vld [vmem:[#allocation26_spill] sm:$0xff] }
 0x2e4   : > { %v7876_v36 = vpop.eup %6244  ;;  %v2672_v59 = vmul.f32 1.442695, %v2483_v45  ;;  %2812 = vadd.xlane.f32.xlu1 %v7548_v47  ;;  %5919 = vmatpush3.bf16.xpose.msra.mxu1 %v5916_v37  ;;  %v9026_v37 = vld [vmem:[#allocation24_spill] sm:$0xff] }
 0x2e5   : > { %v2642_v5 = vmul.f32 1.442695, %v2468_v31  ;;  %v2261_v53 = vpop.xlane.xlu1 %2260  ;;  %2814 = vadd.xlane.f32.xlu0 %v7569_v1  ;;  %v5888_v18 = vpack.c.bf16 %v7876_v36, %v7873_v33  ;;  %v7883_v34 = vpop.eup %6246 }
 0x2e6   : > { %6256 = vpow2.f32 %v2672_v59  ;;  %v2469_v21 = vsub.f32 %v9024_v24, %v2261_v53  ;;  %v2291_v17 = vpop.xlane.xlu0 %2290 }
 0x2e7   : > { %v2484_v25 = vsub.f32 %v9025_v2, %v2291_v17  ;;  %5889 = vmatprep.subr.bf16.mxu0 %v5888_v18  ;;  %6258 = vpow2.f32 %v2642_v5  ;;  %v9027_v17 = vld [vmem:[#allocation29_spill] sm:$0xff] }
 0x2e8   : > { %v7886_v45 = vpop.eup %6248  ;;  %v2644_v47 = vmul.f32 1.442695, %v2469_v21  ;;  %2816 = vadd.xlane.f32.xlu1 %v7576_v55  ;;  %5891 = vmatpush3.bf16.xpose.msra.mxu0 %v5888_v18 }
 0x2e9   : > { %v2674_v1 = vmul.f32 1.442695, %v2484_v25  ;;  %v2293_v31 = vpop.xlane.xlu1 %2292  ;;  %2818 = vadd.xlane.f32.xlu0 %v7597_v9  ;;  %v5920_v11 = vpack.c.bf16 %v7886_v45, %v7883_v34  ;;  %v7893_v24 = vpop.eup %6250  ;;  %v9028_v25 = vld [vmem:[#allocation27_spill] sm:$0xff] }
 0x2ea   : > { %6260 = vpow2.f32 %v2644_v47  ;;  %v2485_v59 = vsub.f32 %v9026_v37, %v2293_v31  ;;  %v2295_v53 = vpop.xlane.xlu0 %2294 }
 0x2eb   : > { %v2486_v2 = vsub.f32 %v9027_v17, %v2295_v53  ;;  %5921 = vmatprep.subr.bf16.mxu1 %v5920_v11  ;;  %6262 = vpow2.f32 %v2674_v1  ;;  %v9029_v53 = vld [vmem:[#allocation30_spill] sm:$0xff] }
 0x2ec   : > { %v7896_v21 = vpop.eup %6252  ;;  %v2676_v55 = vmul.f32 1.442695, %v2485_v59  ;;  %2820 = vadd.xlane.f32.xlu1 %v7604_v54  ;;  %5923 = vmatpush3.bf16.xpose.msra.mxu1 %v5920_v11 }
 0x2ed   : > { %v2678_v9 = vmul.f32 1.442695, %v2486_v2  ;;  %v2297_v5 = vpop.xlane.xlu1 %2296  ;;  %2822 = vadd.xlane.f32.xlu0 %v7625_v15  ;;  %v5892_v18 = vpack.c.bf16 %v7896_v21, %v7893_v24  ;;  %v7903_v37 = vpop.eup %6254  ;;  %v9030_v2 = vld [vmem:[#allocation28_spill] sm:$0xff] }
 0x2ee   : > { %6264 = vpow2.f32 %v2676_v55  ;;  %v2487_v47 = vsub.f32 %v9028_v25, %v2297_v5  ;;  %v2327_v31 = vpop.xlane.xlu0 %2326 }
 0x2ef   : > { %v2502_v17 = vsub.f32 %v9029_v53, %v2327_v31  ;;  %5893 = vmatprep.subr.bf16.mxu0 %v5892_v18  ;;  %6266 = vpow2.f32 %v2678_v9  ;;  %v9031_v31 = vld [vmem:[#allocation33_spill] sm:$0xff] }
 0x2f0   : > { %v7906_v59 = vpop.eup %6256  ;;  %v2680_v54 = vmul.f32 1.442695, %v2487_v47  ;;  %2824 = vadd.xlane.f32.xlu1 %v7632_v62  ;;  %5895 = vmatpush3.bf16.xpose.msra.mxu0 %v5892_v18 }
 0x2f1   : > { %v2710_v15 = vmul.f32 1.442695, %v2502_v17  ;;  %v2329_v1 = vpop.xlane.xlu1 %2328  ;;  %2826 = vadd.xlane.f32.xlu0 %v7653_v19  ;;  %v5924_v11 = vpack.c.bf16 %v7906_v59, %v7903_v37  ;;  %v7913_v25 = vpop.eup %6258  ;;  %v9032_v17 = vld [vmem:[#allocation31_spill] sm:$0xff] }
 0x2f2   : > { %6268 = vpow2.f32 %v2680_v54  ;;  %v2503_v55 = vsub.f32 %v9030_v2, %v2329_v1  ;;  %v2299_v5 = vpop.xlane.xlu0 %2298 }
 0x2f3   : > { %v2488_v53 = vsub.f32 %v9031_v31, %v2299_v5  ;;  %5925 = vmatprep.subr.bf16.mxu1 %v5924_v11  ;;  %6270 = vpow2.f32 %v2710_v15  ;;  %v9033_v5 = vld [vmem:[#allocation34_spill] sm:$0xff] }
 0x2f4   : > { %v7916_v47 = vpop.eup %6260  ;;  %v2712_v62 = vmul.f32 1.442695, %v2503_v55  ;;  %2828 = vadd.xlane.f32.xlu1 %v7660_v6  ;;  %5927 = vmatpush3.bf16.xpose.msra.mxu1 %v5924_v11 }
 0x2f5   : > { %v2682_v19 = vmul.f32 1.442695, %v2488_v53  ;;  %v2301_v9 = vpop.xlane.xlu1 %2300  ;;  %2830 = vadd.xlane.f32.xlu0 %v7681_v23  ;;  %v5896_v18 = vpack.c.bf16 %v7916_v47, %v7913_v25  ;;  %v7923_v2 = vpop.eup %6262  ;;  %v9034_v53 = vld [vmem:[#allocation32_spill] sm:$0xff] }
 0x2f6   : > { %6272 = vpow2.f32 %v2712_v62  ;;  %v2489_v54 = vsub.f32 %v9032_v17, %v2301_v9  ;;  %v2331_v1 = vpop.xlane.xlu0 %2330 }
 0x2f7   : > { %v2504_v31 = vsub.f32 %v9033_v5, %v2331_v1  ;;  %5897 = vmatprep.subr.bf16.mxu0 %v5896_v18  ;;  %6274 = vpow2.f32 %v2682_v19  ;;  %v9035_v1 = vld [vmem:[#allocation36_spill] sm:$0xff] }
 0x2f8   : > { %v7926_v55 = vpop.eup %6264  ;;  %v2684_v6 = vmul.f32 1.442695, %v2489_v54  ;;  %2832 = vadd.xlane.f32.xlu1 %v7688_v14  ;;  %5899 = vmatpush3.bf16.xpose.msra.mxu0 %v5896_v18 }
 0x2f9   : > { %v2714_v23 = vmul.f32 1.442695, %v2504_v31  ;;  %v2333_v15 = vpop.xlane.xlu1 %2332  ;;  %2834 = vadd.xlane.f32.xlu0 %v7709_v27  ;;  %v5928_v11 = vpack.c.bf16 %v7926_v55, %v7923_v2  ;;  %v7933_v17 = vpop.eup %6266  ;;  %v338_v27 = vld [vmem:[%s7415_s18 + $0x28] sm:$0xff] }
 0x2fa   : > { %6276 = vpow2.f32 %v2684_v6  ;;  %v2505_v62 = vsub.f32 %v9034_v53, %v2333_v15  ;;  %v2303_v9 = vpop.xlane.xlu0 %2302  ;;  %v341_v53 = vld [vmem:[%s7415_s18 + $0x40] sm:$0xff] }
 0x2fb   : > { %v2490_v54 = vsub.f32 %v9035_v1, %v2303_v9  ;;  %5929 = vmatprep.subr.bf16.mxu1 %v5928_v11  ;;  %6278 = vpow2.f32 %v2714_v23 }
 0x2fc   : > { %v7936_v14 = vpop.eup %6268  ;;  %v2716_v19 = vmul.f32 1.442695, %v2505_v62  ;;  %2836 = vadd.xlane.f32.xlu1 %v7714_v26  ;;  %5931 = vmatpush3.bf16.xpose.msra.mxu1 %v5928_v11 }
 0x2fd   : > { %v2686_v18 = vmul.f32 1.442695, %v2490_v54  ;;  %v2305_v5 = vpop.xlane.xlu1 %2304  ;;  %2838 = vadd.xlane.f32.xlu0 %v7534_v8  ;;  %v5932_v31 = vpack.c.bf16 %v7936_v14, %v7933_v17  ;;  %v7945_v9 = vpop.eup %6270  ;;  %v340_v8 = vld [vmem:[%s7415_s18 + $0x38] sm:$0xff] }
 0x2fe   : > { %6280 = vpow2.f32 %v2716_v19  ;;  %v2491_v6 = vsub.f32 %v7483_v0, %v2305_v5  ;;  %v2335_v15 = vpop.xlane.xlu0 %2334 }
 0x2ff   : > { %v2506_v26 = vsub.f32 %v7490_v56, %v2335_v15  ;;  %5933 = vmatprep.subr.bf16.mxu0 %v5932_v31  ;;  %5595 = vmatmul.mubr.f32.vlgmr.msra.gmra.mrb[66].mxu0 %v338_v27  ;;  %6282 = vpow2.f32 %v2686_v18  ;;  %v9036_v56 = vld [vmem:[#allocation35_spill] sm:$0xff]  ;;  %v343_v27 = vld [vmem:[%s7415_s18 + $0x50] sm:$0xff] }
 0x300   : > { %v7948_v23 = vpop.eup %6272  ;;  %v2688_v11 = vmul.f32 1.442695, %v2491_v6  ;;  %2840 = vadd.xlane.f32.xlu1 %v7531_v10  ;;  %5935 = vmatpush3.bf16.xpose.msra.mxu0 %v5932_v31 }
 0x301   : > { %v2718_v62 = vmul.f32 1.442695, %v2506_v26  ;;  %v2337_v1 = vpop.xlane.xlu1 %2336  ;;  %2842 = vadd.xlane.f32.xlu0 %v7559_v52  ;;  %v5964_v0 = vpack.c.bf16 %v7948_v23, %v7945_v9  ;;  %5664 = vmatprep.mubr.f32.mxu0 %v341_v53  ;;  %v7957_v5 = vpop.eup %6274 }
 0x302   : > { %6284 = vpow2.f32 %v2688_v11  ;;  %v2507_v54 = vsub.f32 %v9036_v56, %v2337_v1  ;;  %v2307_v19 = vpop.xlane.xlu0 %2306  ;;  %v9037_v11 = vld [vmem:[#allocation38_spill] sm:$0xff] }
 0x303   : > { %v2492_v10 = vsub.f32 %v7503_v39, %v2307_v19  ;;  %5965 = vmatprep.subr.bf16.mxu1 %v5964_v0  ;;  %5630 = vmatmul.mubr.f32.vlgmr.msra.gmra.mrb[66].mxu1 %v340_v8  ;;  %6286 = vpow2.f32 %v2718_v62 }
 0x304   : > { %v7960_v18 = vpop.eup %6276  ;;  %v2720_v31 = vmul.f32 1.442695, %v2507_v54  ;;  %2844 = vadd.xlane.f32.xlu1 %v7562_v40  ;;  %5967 = vmatpush3.bf16.xpose.msra.mxu1 %v5964_v0  ;;  %v9038_v0 = vld [vmem:[#allocation37_spill] sm:$0xff] }
 0x305   : > { %v2690_v52 = vmul.f32 1.442695, %v2492_v10  ;;  %v2309_v6 = vpop.xlane.xlu1 %2308  ;;  %2846 = vadd.xlane.f32.xlu0 %v7587_v61  ;;  %v5936_v15 = vpack.c.bf16 %v7960_v18, %v7957_v5  ;;  %5699 = vmatprep.mubr.f32.mxu1 %v343_v27  ;;  %v7967_v26 = vpop.eup %6278  ;;  %v9039_v27 = vld [vmem:[#allocation41_spill] sm:$0xff] }
 0x306   : > { %6288 = vpow2.f32 %v2720_v31  ;;  %v2493_v39 = vsub.f32 %v7498_v3, %v2309_v6  ;;  %v2339_v53 = vpop.xlane.xlu0 %2338 }
 0x307   : > { %v2508_v8 = vsub.f32 %v9037_v11, %v2339_v53  ;;  %5937 = vmatprep.subr.bf16.mxu0 %v5936_v15  ;;  %6290 = vpow2.f32 %v2690_v52 }
 0x308   : > { %v7970_v40 = vpop.eup %6280  ;;  %v2692_v62 = vmul.f32 1.442695, %v2493_v39  ;;  %2848 = vadd.xlane.f32.xlu1 %v7590_v60  ;;  %5939 = vmatpush3.bf16.xpose.msra.mxu0 %v5936_v15  ;;  %v9040_v15 = vld [vmem:[#allocation39_spill] sm:$0xff] }
 0x309   : > { %v2722_v61 = vmul.f32 1.442695, %v2508_v8  ;;  %v2341_v1 = vpop.xlane.xlu1 %2340  ;;  %2850 = vadd.xlane.f32.xlu0 %v7615_v44  ;;  %v5968_v3 = vpack.c.bf16 %v7970_v40, %v7967_v26  ;;  %v7977_v19 = vpop.eup %6282  ;;  %v9041_v8 = vld [vmem:[#allocation42_spill] sm:$0xff] }
 0x30a   : > { %6292 = vpow2.f32 %v2692_v62  ;;  %v2509_v56 = vsub.f32 %v9038_v0, %v2341_v1  ;;  %v2311_v54 = vpop.xlane.xlu0 %2310  ;;  %v9042_v0 = vld [vmem:[#allocation40_spill] sm:$0xff] }
 0x30b   : > { %v2494_v10 = vsub.f32 %v9039_v27, %v2311_v54  ;;  %5969 = vmatprep.subr.bf16.mxu1 %v5968_v3  ;;  %6294 = vpow2.f32 %v2722_v61 }
 0x30c   : > { %v7980_v31 = vpop.eup %6284  ;;  %v2724_v60 = vmul.f32 1.442695, %v2509_v56  ;;  %2852 = vadd.xlane.f32.xlu1 %v7618_v4  ;;  %5971 = vmatpush3.bf16.xpose.msra.mxu1 %v5968_v3 }
 0x30d   : > { %v2694_v44 = vmul.f32 1.442695, %v2494_v10  ;;  %v2313_v52 = vpop.xlane.xlu1 %2312  ;;  %2854 = vadd.xlane.f32.xlu0 %v7643_v63  ;;  %v5940_v6 = vpack.c.bf16 %v7980_v31, %v7977_v19  ;;  %v7987_v11 = vpop.eup %6286  ;;  %v9043_v10 = vld [vmem:[#allocation45_spill] sm:$0xff] }
 0x30e   : > { %6296 = vpow2.f32 %v2724_v60  ;;  %v2495_v39 = vsub.f32 %v9040_v15, %v2313_v52  ;;  %v2343_v53 = vpop.xlane.xlu0 %2342  ;;  %v9044_v15 = vld [vmem:[#allocation43_spill] sm:$0xff] }
 0x30f   : > { %v2510_v62 = vsub.f32 %v9041_v8, %v2343_v53  ;;  %5941 = vmatprep.subr.bf16.mxu0 %v5940_v6  ;;  %6298 = vpow2.f32 %v2694_v44 }
 0x310   : > { %v7990_v1 = vpop.eup %6288  ;;  %v2696_v4 = vmul.f32 1.442695, %v2495_v39  ;;  %2856 = vadd.xlane.f32.xlu1 %v7646_v12  ;;  %5943 = vmatpush3.bf16.xpose.msra.mxu0 %v5940_v6 }
 0x311   : > { %v2726_v63 = vmul.f32 1.442695, %v2510_v62  ;;  %v2345_v61 = vpop.xlane.xlu1 %2344  ;;  %2858 = vadd.xlane.f32.xlu0 %v7671_v7  ;;  %v5972_v3 = vpack.c.bf16 %v7990_v1, %v7987_v11  ;;  %v7997_v27 = vpop.eup %6290  ;;  %v9045_v62 = vld [vmem:[#allocation46_spill] sm:$0xff] }
 0x312   : > { %6300 = vpow2.f32 %v2696_v4  ;;  %v2511_v56 = vsub.f32 %v9042_v0, %v2345_v61  ;;  %v2315_v54 = vpop.xlane.xlu0 %2314  ;;  %v9046_v0 = vld [vmem:[#allocation44_spill] sm:$0xff] }
 0x313   : > { %v2496_v60 = vsub.f32 %v9043_v10, %v2315_v54  ;;  %5973 = vmatprep.subr.bf16.mxu1 %v5972_v3  ;;  %6302 = vpow2.f32 %v2726_v63 }
 0x314   : > { %v8000_v52 = vpop.eup %6292  ;;  %v2728_v12 = vmul.f32 1.442695, %v2511_v56  ;;  %2860 = vadd.xlane.f32.xlu1 %v7674_v16  ;;  %5975 = vmatpush3.bf16.xpose.msra.mxu1 %v5972_v3 }
 0x315   : > { %v2698_v7 = vmul.f32 1.442695, %v2496_v60  ;;  %v2317_v44 = vpop.xlane.xlu1 %2316  ;;  %2862 = vadd.xlane.f32.xlu0 %v7699_v13  ;;  %v5944_v6 = vpack.c.bf16 %v8000_v52, %v7997_v27  ;;  %v8007_v8 = vpop.eup %6294  ;;  %v9047_v60 = vld [vmem:[#allocation49_spill] sm:$0xff] }
 0x316   : > { %6304 = vpow2.f32 %v2728_v12  ;;  %v2497_v39 = vsub.f32 %v9044_v15, %v2317_v44  ;;  %v2347_v53 = vpop.xlane.xlu0 %2346  ;;  %v9048_v15 = vld [vmem:[#allocation47_spill] sm:$0xff] }
 0x317   : > { %v2512_v4 = vsub.f32 %v9045_v62, %v2347_v53  ;;  %5945 = vmatprep.subr.bf16.mxu0 %v5944_v6  ;;  %6306 = vpow2.f32 %v2698_v7 }
 0x318   : > { %v8010_v61 = vpop.eup %6296  ;;  %v2700_v16 = vmul.f32 1.442695, %v2497_v39  ;;  %2864 = vadd.xlane.f32.xlu1 %v7702_v20  ;;  %5947 = vmatpush3.bf16.xpose.msra.mxu0 %v5944_v6 }
 0x319   : > { %v2730_v13 = vmul.f32 1.442695, %v2512_v4  ;;  %v2349_v63 = vpop.xlane.xlu1 %2348  ;;  %2866 = vadd.xlane.f32.xlu0 %v7727_v22  ;;  %v5976_v3 = vpack.c.bf16 %v8010_v61, %v8007_v8  ;;  %v8017_v10 = vpop.eup %6298  ;;  %v9049_v4 = vld [vmem:[#allocation50_spill] sm:$0xff] }
 0x31a   : > { %6308 = vpow2.f32 %v2700_v16  ;;  %v2513_v56 = vsub.f32 %v9046_v0, %v2349_v63  ;;  %v2319_v54 = vpop.xlane.xlu0 %2318 }
 0x31b   : > { %v2498_v12 = vsub.f32 %v9047_v60, %v2319_v54  ;;  %5977 = vmatprep.subr.bf16.mxu1 %v5976_v3  ;;  %6310 = vpow2.f32 %v2730_v13  ;;  %v9050_v13 = vld [vmem:[#allocation72_spill] sm:$0xff] }
 0x31c   : > { %v8020_v44 = vpop.eup %6300  ;;  %v2732_v20 = vmul.f32 1.442695, %v2513_v56  ;;  %2868 = vadd.xlane.f32.xlu1 %v7730_v58  ;;  %5979 = vmatpush3.bf16.xpose.msra.mxu1 %v5976_v3  ;;  %v9051_v56 = vld [vmem:[#allocation48_spill] sm:$0xff] }
 0x31d   : > { %v2702_v22 = vmul.f32 1.442695, %v2498_v12  ;;  %v2321_v7 = vpop.xlane.xlu1 %2320  ;;  %2870 = vadd.xlane.f32.xlu0 %v7737_v49  ;;  %v5948_v6 = vpack.c.bf16 %v8020_v44, %v8017_v10  ;;  %v8027_v62 = vpop.eup %6302 }
 0x31e   : > { %6312 = vpow2.f32 %v2732_v20  ;;  %v2499_v39 = vsub.f32 %v9048_v15, %v2321_v7  ;;  %v2351_v53 = vpop.xlane.xlu0 %2350  ;;  %v9052_v20 = vld [vmem:[#allocation53_spill] sm:$0xff] }
 0x31f   : > { %v2514_v16 = vsub.f32 %v9049_v4, %v2351_v53  ;;  %5949 = vmatprep.subr.bf16.mxu0 %v5948_v6  ;;  %6314 = vpow2.f32 %v2702_v22  ;;  %v9053_v53 = vld [vmem:[#allocation51_spill] sm:$0xff] }
 0x320   : > { %v8030_v63 = vpop.eup %6304  ;;  %v2704_v58 = vmul.f32 1.442695, %v2499_v39  ;;  %2872 = vadd.xlane.f32.xlu1 %v9050_v13  ;;  %5951 = vmatpush3.bf16.xpose.msra.mxu0 %v5948_v6  ;;  %v9054_v13 = vld [vmem:[#allocation54_spill] sm:$0xff] }
 0x321   : > { %v2734_v49 = vmul.f32 1.442695, %v2514_v16  ;;  %v2353_v3 = vpop.xlane.xlu1 %2352  ;;  %2874 = vadd.xlane.f32.xlu0 %v7769_v48  ;;  %v5980_v0 = vpack.c.bf16 %v8030_v63, %v8027_v62  ;;  %v8037_v12 = vpop.eup %6306 }
 0x322   : > { %6316 = vpow2.f32 %v2704_v58  ;;  %v2515_v54 = vsub.f32 %v9051_v56, %v2353_v3  ;;  %v2323_v60 = vpop.xlane.xlu0 %2322 }
 0x323   : > { %v2500_v7 = vsub.f32 %v9052_v20, %v2323_v60  ;;  %5981 = vmatprep.subr.bf16.mxu1 %v5980_v0  ;;  %6318 = vpow2.f32 %v2734_v49 }
 0x324   : > { %v8040_v15 = vpop.eup %6308  ;;  %v2736_v6 = vmul.f32 1.442695, %v2515_v54  ;;  %2876 = vadd.xlane.f32.xlu1 %v7774_v29  ;;  %5983 = vmatpush3.bf16.xpose.msra.mxu1 %v5980_v0  ;;  %v9055_v54 = vld [vmem:[#allocation52_spill] sm:$0xff] }
 0x325   : > { %v2706_v48 = vmul.f32 1.442695, %v2500_v7  ;;  %v2325_v22 = vpop.xlane.xlu1 %2324  ;;  %2878 = vadd.xlane.f32.xlu0 %v7797_v43  ;;  %v5952_v39 = vpack.c.bf16 %v8040_v15, %v8037_v12  ;;  %v8047_v58 = vpop.eup %6310 }
 0x326   : > { %6320 = vpow2.f32 %v2736_v6  ;;  %v2501_v4 = vsub.f32 %v9053_v53, %v2325_v22  ;;  %v2355_v16 = vpop.xlane.xlu0 %2354  ;;  %v9056_v6 = vld [vmem:[#allocation57_spill] sm:$0xff] }
 0x327   : > { %v2516_v3 = vsub.f32 %v9054_v13, %v2355_v16  ;;  %5953 = vmatprep.subr.bf16.mxu0 %v5952_v39  ;;  %6322 = vpow2.f32 %v2706_v48 }
 0x328   : > { %v8050_v56 = vpop.eup %6312  ;;  %v2708_v29 = vmul.f32 1.442695, %v2501_v4  ;;  %2880 = vadd.xlane.f32.xlu1 %v7802_v42  ;;  %5955 = vmatpush3.bf16.xpose.msra.mxu0 %v5952_v39  ;;  %v9057_v4 = vld [vmem:[#allocation55_spill] sm:$0xff] }
 0x329   : > { %v2738_v43 = vmul.f32 1.442695, %v2516_v3  ;;  %v2357_v49 = vpop.xlane.xlu1 %2356  ;;  %2882 = vadd.xlane.f32.xlu0 %v7825_v51  ;;  %v5984_v0 = vpack.c.bf16 %v8050_v56, %v8047_v58  ;;  %v8057_v7 = vpop.eup %6314 }
 0x32a   : > { %6324 = vpow2.f32 %v2708_v29  ;;  %v2517_v60 = vsub.f32 %v9055_v54, %v2357_v49  ;;  %v2359_v20 = vpop.xlane.xlu0 %2358  ;;  %v9058_v29 = vld [vmem:[#allocation58_spill] sm:$0xff] }
 0x32b   : > { %v2518_v22 = vsub.f32 %v9056_v6, %v2359_v20  ;;  %5985 = vmatprep.subr.bf16.mxu1 %v5984_v0  ;;  %6326 = vpow2.f32 %v2738_v43 }
 0x32c   : > { %v8060_v53 = vpop.eup %6316  ;;  %v2740_v42 = vmul.f32 1.442695, %v2517_v60  ;;  %2884 = vadd.xlane.f32.xlu1 %v7830_v50  ;;  %5987 = vmatpush3.bf16.xpose.msra.mxu1 %v5984_v0  ;;  %v9059_v60 = vld [vmem:[#allocation56_spill] sm:$0xff] }
 0x32d   : > { %v2742_v51 = vmul.f32 1.442695, %v2518_v22  ;;  %v2361_v48 = vpop.xlane.xlu1 %2360  ;;  %2886 = vadd.xlane.f32.xlu0 %v7853_v30  ;;  %v5956_v39 = vpack.c.bf16 %v8060_v53, %v8057_v7  ;;  %v8067_v3 = vpop.eup %6318 }
 0x32e   : > { %6328 = vpow2.f32 %v2740_v42  ;;  %v2519_v16 = vsub.f32 %v9057_v4, %v2361_v48  ;;  %v2391_v13 = vpop.xlane.xlu0 %2390  ;;  %v9061_v42 = vld [vmem:[#allocation61_spill] sm:$0xff] }
 0x32f   : > { %v2534_v49 = vsub.f32 %v9058_v29, %v2391_v13  ;;  %5957 = vmatprep.subr.bf16.mxu0 %v5956_v39  ;;  %6330 = vpow2.f32 %v2742_v51 }
 0x330   : > { %v8070_v54 = vpop.eup %6320  ;;  %v2744_v50 = vmul.f32 1.442695, %v2519_v16  ;;  %2888 = vadd.xlane.f32.xlu1 %v7856_v46  ;;  %5959 = vmatpush3.bf16.xpose.msra.mxu0 %v5956_v39  ;;  %v9063_v16 = vld [vmem:[#allocation59_spill] sm:$0xff] }
 0x331   : > { %v2774_v30 = vmul.f32 1.442695, %v2534_v49  ;;  %v2393_v43 = vpop.xlane.xlu1 %2392  ;;  %2890 = vadd.xlane.f32.xlu0 %v7873_v33  ;;  %v5988_v0 = vpack.c.bf16 %v8070_v54, %v8067_v3  ;;  %v8077_v22 = vpop.eup %6322 }
 0x332   : > { %6332 = vpow2.f32 %v2744_v50  ;;  %v2535_v20 = vsub.f32 %v9059_v60, %v2393_v43  ;;  %v2363_v6 = vpop.xlane.xlu0 %2362  ;;  %9060 = vst [vmem:[#allocation18_spill] sm:$0xff] %v8077_v22  ;;  %v9065_v50 = vld [vmem:[#allocation62_spill] sm:$0xff] }
 0x333   : > { %v2520_v48 = vsub.f32 %v9061_v42, %v2363_v6  ;;  %5989 = vmatprep.subr.bf16.mxu1 %v5988_v0  ;;  %6334 = vpow2.f32 %v2774_v30 }
 0x334   : > { %v8080_v4 = vpop.eup %6324  ;;  %v2776_v46 = vmul.f32 1.442695, %v2535_v20  ;;  %2892 = vadd.xlane.f32.xlu1 %v7876_v36  ;;  %5991 = vmatpush3.bf16.xpose.msra.mxu1 %v5988_v0  ;;  %v9067_v20 = vld [vmem:[#allocation60_spill] sm:$0xff] }
 0x335   : > { %9062 = vst [vmem:[#allocation16_spill] sm:$0xff] %v8080_v4  ;;  %v2746_v33 = vmul.f32 1.442695, %v2520_v48  ;;  %v2365_v51 = vpop.xlane.xlu1 %2364  ;;  %2894 = vadd.xlane.f32.xlu0 %v7893_v24  ;;  %v5960_v39 = vpack.c.bf16 %v8080_v4, %v8077_v22  ;;  %v8087_v49 = vpop.eup %6326  ;;  %v348_v22 = vld [vmem:[%s7415_s18 + $0x78] sm:$0xff] }
 0x336   : > { %6336 = vpow2.f32 %v2776_v46  ;;  %v2521_v13 = vsub.f32 %v9063_v16, %v2365_v51  ;;  %v2395_v29 = vpop.xlane.xlu0 %2394  ;;  %9064 = vst [vmem:[#allocation21_spill] sm:$0xff] %v8087_v49  ;;  %v9068_v46 = vld [vmem:[#allocation65_spill] sm:$0xff] }
 0x337   : > { %v2536_v43 = vsub.f32 %v9065_v50, %v2395_v29  ;;  %5961 = vmatprep.subr.bf16.mxu0 %v5960_v39  ;;  %6338 = vpow2.f32 %v2746_v33  ;;  %v9069_v29 = vld [vmem:[#allocation63_spill] sm:$0xff] }
 0x338   : > { %v8090_v60 = vpop.eup %6328  ;;  %v2748_v36 = vmul.f32 1.442695, %v2521_v13  ;;  %2896 = vadd.xlane.f32.xlu1 %v7896_v21  ;;  %5963 = vmatpush3.bf16.xpose.msra.mxu0 %v5960_v39 }
 0x339   : > { %9066 = vst [vmem:[#allocation19_spill] sm:$0xff] %v8090_v60  ;;  %v2778_v24 = vmul.f32 1.442695, %v2536_v43  ;;  %v2397_v30 = vpop.xlane.xlu1 %2396  ;;  %2898 = vadd.xlane.f32.xlu0 %v7913_v25  ;;  %v5992_v0 = vpack.c.bf16 %v8090_v60, %v8087_v49  ;;  %v8097_v48 = vpop.eup %6330  ;;  %v342_v25 = vld [vmem:[%s7415_s18 + $0x48] sm:$0xff] }
 0x33a   : > { %6340 = vpow2.f32 %v2748_v36  ;;  %v2537_v6 = vsub.f32 %v9067_v20, %v2397_v30  ;;  %v2367_v42 = vpop.xlane.xlu0 %2366  ;;  %v345_v36 = vld [vmem:[%s7415_s18 + $0x60] sm:$0xff] }
 0x33b   : > { %v2522_v51 = vsub.f32 %v9068_v46, %v2367_v42  ;;  %5993 = vmatprep.subr.bf16.mxu1 %v5992_v0  ;;  %6342 = vpow2.f32 %v2778_v24  ;;  %v9070_v20 = vld [vmem:[#allocation66_spill] sm:$0xff]  ;;  %v9071_v46 = vld [vmem:[#allocation80_spill] sm:$0xff] }
 0x33c   : > { %v8100_v21 = vpop.eup %6332  ;;  %v2780_v33 = vmul.f32 1.442695, %v2537_v6  ;;  %2900 = vadd.xlane.f32.xlu1 %v7916_v47  ;;  %5995 = vmatpush3.bf16.xpose.msra.mxu1 %v5992_v0 }
 0x33d   : > { %v2750_v39 = vmul.f32 1.442695, %v2522_v51  ;;  %v2369_v16 = vpop.xlane.xlu1 %2368  ;;  %2902 = vadd.xlane.f32.xlu0 %v7757_v28  ;;  %v5996_v13 = vpack.c.bf16 %v8100_v21, %v8097_v48  ;;  %v8109_v30 = vpop.eup %6334  ;;  %v344_v28 = vld [vmem:[%s7415_s18 + $0x58] sm:$0xff] }
 0x33e   : > { %6344 = vpow2.f32 %v2780_v33  ;;  %v2523_v50 = vsub.f32 %v9069_v29, %v2369_v16  ;;  %v2399_v43 = vpop.xlane.xlu0 %2398  ;;  %v9072_v33 = vld [vmem:[#allocation64_spill] sm:$0xff] }
 0x33f   : > { %v2538_v47 = vsub.f32 %v9070_v20, %v2399_v43  ;;  %5997 = vmatprep.subr.bf16.mxu0 %v5996_v13  ;;  %5665 = vmatmul.mubr.f32.vlgmr.msra.gmra.mrb[68].mxu0 %v342_v25  ;;  %6346 = vpow2.f32 %v2750_v39  ;;  %v347_v29 = vld [vmem:[%s7415_s18 + $0x70] sm:$0xff]  ;;  %v9074_v20 = vld [vmem:[#allocation81_spill] sm:$0xff] }
 0x340   : > { %v8112_v24 = vpop.eup %6336  ;;  %v2752_v0 = vmul.f32 1.442695, %v2523_v50  ;;  %2904 = vadd.xlane.f32.xlu1 %v7760_v57  ;;  %5999 = vmatpush3.bf16.xpose.msra.mxu0 %v5996_v13  ;;  %v9073_v50 = vld [vmem:[#allocation68_spill] sm:$0xff] }
 0x341   : > { %v2782_v6 = vmul.f32 1.442695, %v2538_v47  ;;  %v2401_v42 = vpop.xlane.xlu1 %2400  ;;  %2906 = vadd.xlane.f32.xlu0 %v9071_v46  ;;  %v6028_v51 = vpack.c.bf16 %v8112_v24, %v8109_v30  ;;  %5734 = vmatprep.mubr.f32.mxu0 %v345_v36  ;;  %v8121_v43 = vpop.eup %6338  ;;  %v9076_v46 = vld [vmem:[#allocation67_spill] sm:$0xff] }
 0x342   : > { %6348 = vpow2.f32 %v2752_v0  ;;  %v2539_v16 = vsub.f32 %v9072_v33, %v2401_v42  ;;  %v2371_v25 = vpop.xlane.xlu0 %2370  ;;  %v9075_v0 = vld [vmem:[#allocation86_spill] sm:$0xff] }
 0x343   : > { %v2524_v57 = vsub.f32 %v9073_v50, %v2371_v25  ;;  %6029 = vmatprep.subr.bf16.mxu1 %v6028_v51  ;;  %5700 = vmatmul.mubr.f32.vlgmr.msra.gmra.mrb[68].mxu1 %v344_v28  ;;  %6350 = vpow2.f32 %v2782_v6  ;;  %v9077_v50 = vld [vmem:[#allocation70_spill] sm:$0xff] }
 0x344   : > { %v8124_v39 = vpop.eup %6340  ;;  %v2784_v13 = vmul.f32 1.442695, %v2539_v16  ;;  %2908 = vadd.xlane.f32.xlu1 %v9074_v20  ;;  %6031 = vmatpush3.bf16.xpose.msra.mxu1 %v6028_v51  ;;  %v9078_v51 = vld [vmem:[#allocation87_spill] sm:$0xff] }
 0x345   : > { %v2754_v47 = vmul.f32 1.442695, %v2524_v57  ;;  %v2373_v36 = vpop.xlane.xlu1 %2372  ;;  %2910 = vadd.xlane.f32.xlu0 %v9075_v0  ;;  %v6000_v42 = vpack.c.bf16 %v8124_v39, %v8121_v43  ;;  %5769 = vmatprep.mubr.f32.mxu1 %v347_v29  ;;  %v8131_v28 = vpop.eup %6342 }
 0x346   : > { %6352 = vpow2.f32 %v2784_v13  ;;  %v2525_v33 = vsub.f32 %v9076_v46, %v2373_v36  ;;  %v2403_v25 = vpop.xlane.xlu0 %2402  ;;  %v9079_v13 = vld [vmem:[#allocation69_spill] sm:$0xff] }
 0x347   : > { %v2540_v16 = vsub.f32 %v9077_v50, %v2403_v25  ;;  %6001 = vmatprep.subr.bf16.mxu0 %v6000_v42  ;;  %6354 = vpow2.f32 %v2754_v47  ;;  %v9080_v50 = vld [vmem:[#allocation73_spill] sm:$0xff] }
 0x348   : > { %v8134_v20 = vpop.eup %6344  ;;  %v2756_v6 = vmul.f32 1.442695, %v2525_v33  ;;  %2912 = vadd.xlane.f32.xlu1 %v9078_v51  ;;  %6003 = vmatpush3.bf16.xpose.msra.mxu0 %v6000_v42 }
 0x349   : > { %v2786_v57 = vmul.f32 1.442695, %v2540_v16  ;;  %v2405_v0 = vpop.xlane.xlu1 %2404  ;;  %2914 = vadd.xlane.f32.xlu0 %v7843_v41  ;;  %v6032_v29 = vpack.c.bf16 %v8134_v20, %v8131_v28  ;;  %v8141_v25 = vpop.eup %6346 }
 0x34a   : > { %6356 = vpow2.f32 %v2756_v6  ;;  %v2541_v36 = vsub.f32 %v9079_v13, %v2405_v0  ;;  %v2375_v46 = vpop.xlane.xlu0 %2374  ;;  %v9081_v6 = vld [vmem:[#allocation71_spill] sm:$0xff] }
 0x34b   : > { %v2526_v60 = vsub.f32 %v9080_v50, %v2375_v46  ;;  %6033 = vmatprep.subr.bf16.mxu1 %v6032_v29  ;;  %6358 = vpow2.f32 %v2786_v57  ;;  %v9082_v46 = vld [vmem:[#allocation75_spill] sm:$0xff] }
 0x34c   : > { %v8144_v33 = vpop.eup %6348  ;;  %v2788_v42 = vmul.f32 1.442695, %v2541_v36  ;;  %2916 = vadd.xlane.f32.xlu1 %v7846_v38  ;;  %6035 = vmatpush3.bf16.xpose.msra.mxu1 %v6032_v29  ;;  %v9083_v29 = vld [vmem:[#allocation74_spill] sm:$0xff] }
 0x34d   : > { %v2758_v41 = vmul.f32 1.442695, %v2526_v60  ;;  %v2377_v47 = vpop.xlane.xlu1 %2376  ;;  %2918 = vadd.xlane.f32.xlu0 %v7863_v32  ;;  %v6004_v16 = vpack.c.bf16 %v8144_v33, %v8141_v25  ;;  %v8151_v13 = vpop.eup %6350 }
 0x34e   : > { %6360 = vpow2.f32 %v2788_v42  ;;  %v2527_v51 = vsub.f32 %v9081_v6, %v2377_v47  ;;  %v2407_v0 = vpop.xlane.xlu0 %2406 }
 0x34f   : > { %v2542_v50 = vsub.f32 %v9082_v46, %v2407_v0  ;;  %6005 = vmatprep.subr.bf16.mxu0 %v6004_v16  ;;  %6362 = vpow2.f32 %v2758_v41  ;;  %v9084_v0 = vld [vmem:[#allocation77_spill] sm:$0xff] }
 0x350   : > { %v8154_v36 = vpop.eup %6352  ;;  %v2760_v38 = vmul.f32 1.442695, %v2527_v51  ;;  %2920 = vadd.xlane.f32.xlu1 %v7866_v35  ;;  %6007 = vmatpush3.bf16.xpose.msra.mxu0 %v6004_v16 }
 0x351   : > { %v2790_v32 = vmul.f32 1.442695, %v2542_v50  ;;  %v2409_v60 = vpop.xlane.xlu1 %2408  ;;  %2922 = vadd.xlane.f32.xlu0 %v7883_v34  ;;  %v6036_v57 = vpack.c.bf16 %v8154_v36, %v8151_v13  ;;  %v8161_v6 = vpop.eup %6354  ;;  %v9085_v50 = vld [vmem:[#allocation76_spill] sm:$0xff] }
 0x352   : > { %6364 = vpow2.f32 %v2760_v38  ;;  %v2543_v42 = vsub.f32 %v9083_v29, %v2409_v60  ;;  %v2379_v47 = vpop.xlane.xlu0 %2378 }
 0x353   : > { %v2528_v46 = vsub.f32 %v9084_v0, %v2379_v47  ;;  %6037 = vmatprep.subr.bf16.mxu1 %v6036_v57  ;;  %6366 = vpow2.f32 %v2790_v32  ;;  %v9086_v47 = vld [vmem:[#allocation79_spill] sm:$0xff] }
 0x354   : > { %v8164_v51 = vpop.eup %6356  ;;  %v2792_v35 = vmul.f32 1.442695, %v2543_v42  ;;  %2924 = vadd.xlane.f32.xlu1 %v7886_v45  ;;  %6039 = vmatpush3.bf16.xpose.msra.mxu1 %v6036_v57 }
 0x355   : > { %v2762_v34 = vmul.f32 1.442695, %v2528_v46  ;;  %v2381_v41 = vpop.xlane.xlu1 %2380  ;;  %2926 = vadd.xlane.f32.xlu0 %v7903_v37  ;;  %v6008_v16 = vpack.c.bf16 %v8164_v51, %v8161_v6  ;;  %v8171_v29 = vpop.eup %6358  ;;  %v9087_v46 = vld [vmem:[#allocation78_spill] sm:$0xff] }
 0x356   : > { %6368 = vpow2.f32 %v2792_v35  ;;  %v2529_v38 = vsub.f32 %v9085_v50, %v2381_v41  ;;  %v2411_v60 = vpop.xlane.xlu0 %2410 }
 0x357   : > { %v2544_v0 = vsub.f32 %v9086_v47, %v2411_v60  ;;  %6009 = vmatprep.subr.bf16.mxu0 %v6008_v16  ;;  %6370 = vpow2.f32 %v2762_v34  ;;  %v9088_v60 = vld [vmem:[#allocation83_spill] sm:$0xff] }
 0x358   : > { %v8174_v42 = vpop.eup %6360  ;;  %v2764_v45 = vmul.f32 1.442695, %v2529_v38  ;;  %2928 = vadd.xlane.f32.xlu1 %v7906_v59  ;;  %6011 = vmatpush3.bf16.xpose.msra.mxu0 %v6008_v16 }
 0x359   : > { %v2794_v37 = vmul.f32 1.442695, %v2544_v0  ;;  %v2413_v32 = vpop.xlane.xlu1 %2412  ;;  %2930 = vadd.xlane.f32.xlu0 %v7923_v2  ;;  %v6040_v57 = vpack.c.bf16 %v8174_v42, %v8171_v29  ;;  %v8181_v50 = vpop.eup %6362  ;;  %v9089_v0 = vld [vmem:[#allocation82_spill] sm:$0xff] }
 0x35a   : > { %6372 = vpow2.f32 %v2764_v45  ;;  %v2545_v35 = vsub.f32 %v9087_v46, %v2413_v32  ;;  %v2383_v41 = vpop.xlane.xlu0 %2382 }
 0x35b   : > { %v2530_v47 = vsub.f32 %v9088_v60, %v2383_v41  ;;  %6041 = vmatprep.subr.bf16.mxu1 %v6040_v57  ;;  %6374 = vpow2.f32 %v2794_v37  ;;  %v9090_v41 = vld [vmem:[#allocation85_spill] sm:$0xff] }
 0x35c   : > { %v8184_v38 = vpop.eup %6364  ;;  %v2796_v59 = vmul.f32 1.442695, %v2545_v35  ;;  %2932 = vadd.xlane.f32.xlu1 %v7926_v55  ;;  %6043 = vmatpush3.bf16.xpose.msra.mxu1 %v6040_v57 }
 0x35d   : > { %v2766_v2 = vmul.f32 1.442695, %v2530_v47  ;;  %v2385_v34 = vpop.xlane.xlu1 %2384  ;;  %2934 = vadd.xlane.f32.xlu0 %v7933_v17  ;;  %v6012_v16 = vpack.c.bf16 %v8184_v38, %v8181_v50  ;;  %v8191_v46 = vpop.eup %6366  ;;  %v9091_v47 = vld [vmem:[#allocation84_spill] sm:$0xff] }
 0x35e   : > { %6376 = vpow2.f32 %v2796_v59  ;;  %v2531_v45 = vsub.f32 %v9089_v0, %v2385_v34  ;;  %v2415_v32 = vpop.xlane.xlu0 %2414 }
 0x35f   : > { %v2546_v60 = vsub.f32 %v9090_v41, %v2415_v32  ;;  %6013 = vmatprep.subr.bf16.mxu0 %v6012_v16  ;;  %6378 = vpow2.f32 %v2766_v2  ;;  %v9092_v32 = vld [vmem:[#allocation17_spill] sm:$0xff] }
 0x360   : > { %v8194_v35 = vpop.eup %6368  ;;  %v2768_v55 = vmul.f32 1.442695, %v2531_v45  ;;  %2936 = vadd.xlane.f32.xlu1 %v7936_v14  ;;  %6015 = vmatpush3.bf16.xpose.msra.mxu0 %v6012_v16 }
 0x361   : > { %v2798_v17 = vmul.f32 1.442695, %v2546_v60  ;;  %v2417_v37 = vpop.xlane.xlu1 %2416  ;;  %2938 = vadd.xlane.f32.xlu0 %v7957_v5  ;;  %v6044_v57 = vpack.c.bf16 %v8194_v35, %v8191_v46  ;;  %v8201_v0 = vpop.eup %6370  ;;  %v9093_v60 = vld [vmem:[#allocation14_spill] sm:$0xff] }
 0x362   : > { %6380 = vpow2.f32 %v2768_v55  ;;  %v2547_v59 = vsub.f32 %v9091_v47, %v2417_v37  ;;  %v2387_v34 = vpop.xlane.xlu0 %2386 }
 0x363   : > { %v2532_v41 = vsub.f32 %v9092_v32, %v2387_v34  ;;  %6045 = vmatprep.subr.bf16.mxu1 %v6044_v57  ;;  %6382 = vpow2.f32 %v2798_v17  ;;  %v9094_v34 = vld [vmem:[#allocation15_spill] sm:$0xff] }
 0x364   : > { %v8204_v45 = vpop.eup %6372  ;;  %v2800_v14 = vmul.f32 1.442695, %v2547_v59  ;;  %2940 = vadd.xlane.f32.xlu1 %v7960_v18  ;;  %6047 = vmatpush3.bf16.xpose.msra.mxu1 %v6044_v57 }
 0x365   : > { %v2770_v5 = vmul.f32 1.442695, %v2532_v41  ;;  %v2389_v2 = vpop.xlane.xlu1 %2388  ;;  %2942 = vadd.xlane.f32.xlu0 %v7977_v19  ;;  %v6016_v16 = vpack.c.bf16 %v8204_v45, %v8201_v0  ;;  %v8211_v47 = vpop.eup %6374  ;;  %v9095_v41 = vld [vmem:[#allocation88_spill] sm:$0xff] }
 0x366   : > { %6384 = vpow2.f32 %v2800_v14  ;;  %v2533_v55 = vsub.f32 %v9093_v60, %v2389_v2  ;;  %v2419_v37 = vpop.xlane.xlu0 %2418  ;;  %v3918_v2 = vlaneseq }
 0x367   : > { %v2548_v32 = vsub.f32 %v9094_v34, %v2419_v37  ;;  %6017 = vmatprep.subr.bf16.mxu0 %v6016_v16  ;;  %6386 = vpow2.f32 %v2770_v5 }
 0x368   : > { %v8214_v59 = vpop.eup %6376  ;;  %v2772_v18 = vmul.f32 1.442695, %v2533_v55  ;;  %2944 = vadd.xlane.f32.xlu1 %v7980_v31  ;;  %6019 = vmatpush3.bf16.xpose.msra.mxu0 %v6016_v16  ;;  %v8229_v16 = vand.u32 127, %v3918_v2 }
 0x369   : > { %v2802_v19 = vmul.f32 1.442695, %v2548_v32  ;;  %v2421_v17 = vpop.xlane.xlu1 %2420  ;;  %2946 = vadd.xlane.f32.xlu0 %v7997_v27  ;;  %v6048_v57 = vpack.c.bf16 %v8214_v59, %v8211_v47  ;;  %v8221_v37 = vpop.eup %6378 }
 0x36a   : > { %6388 = vpow2.f32 %v2772_v18  ;;  %v2549_v14 = vsub.f32 %v9095_v41, %v2421_v17  ;;  %v2807_v60 = vpop.xlane.xlu0 %2806  ;;  %v3924_v17 = vadd.s32 4294967288, %v8229_v16 }
 0x36b   : > { %6049 = vmatprep.subr.bf16.mxu1 %v6048_v57  ;;  %6390 = vpow2.f32 %v2802_v19  ;;  %v8239_v19 = vshrl.u32 %v3918_v2, 7  ;;  %v3945_v2 = vadd.s32 4294967264, %v8229_v16 }
 0x36c   : > { %v8223_v55 = vpop.eup %6380  ;;  %v2804_v31 = vmul.f32 1.442695, %v2549_v14  ;;  %2948 = vadd.xlane.f32.xlu1 %v8000_v52  ;;  %6051 = vmatpush3.bf16.xpose.msra.mxu1 %v6048_v57  ;;  %6392 = vrcp.f32 %v2807_v60  ;;  %v3931_v14 = vadd.s32 4294967280, %v8229_v16 }
 0x36d   : > { %v2809_v27 = vpop.xlane.xlu1 %2808  ;;  %2950 = vadd.xlane.f32.xlu0 %v8017_v10  ;;  %v6020_v5 = vpack.c.bf16 %v8223_v55, %v8221_v37  ;;  %v8231_v32 = vpop.eup %6382 }
 0x36e   : > { %6394 = vpow2.f32 %v2804_v31  ;;  %v2811_v34 = vpop.xlane.xlu0 %2810 }
 0x36f   : > { %6396 = vrcp.f32 %v2809_v27  ;;  %6021 = vmatprep.subr.bf16.mxu0 %v6020_v5 }
 0x370   : > { %v8233_v18 = vpop.eup %6384  ;;  %6398 = vrcp.f32 %v2811_v34  ;;  %2952 = vadd.xlane.f32.xlu1 %v8020_v44  ;;  %6023 = vmatpush3.bf16.xpose.msra.mxu0 %v6020_v5  ;;  %v8257_v5 = vsub.s32 %v8229_v16, %v8239_v19  ;;  %v8260_v34 = vsub.s32 %v3924_v17, %v8239_v19  ;;  %v8272_v17 = vsub.s32 %v3945_v2, %v8239_v19 }
 0x371   : > { %v2813_v52 = vpop.xlane.xlu1 %2812  ;;  %2954 = vadd.xlane.f32.xlu0 %v8037_v12  ;;  %v6052_v10 = vpack.c.bf16 %v8233_v18, %v8231_v32  ;;  %v8242_v41 = vpop.eup %6386  ;;  %v3938_v12 = vadd.s32 4294967272, %v8229_v16 }
 0x372   : > { %6400 = vrcp.f32 %v2813_v52  ;;  %v2815_v57 = vpop.xlane.xlu0 %2814  ;;  %9096 = vst [vmem:[#allocation22_spill] sm:$0xff] %v8242_v41 }
 0x373   : > { %6402 = vrcp.f32 %v2815_v57  ;;  %6053 = vmatprep.subr.bf16.mxu1 %v6052_v10 }
 0x374   : > { %v8245_v44 = vpop.eup %6388  ;;  %2956 = vadd.xlane.f32.xlu1 %v8040_v15  ;;  %6055 = vmatpush3.bf16.xpose.msra.mxu1 %v6052_v10  ;;  %v8263_v10 = vsub.s32 %v3931_v14, %v8239_v19 }
 0x375   : > { %9097 = vst [vmem:[#allocation20_spill] sm:$0xff] %v8245_v44  ;;  %v2817_v60 = vpop.xlane.xlu1 %2816  ;;  %2958 = vadd.xlane.f32.xlu0 %v8057_v7  ;;  %v6024_v31 = vpack.c.bf16 %v8245_v44, %v8242_v41  ;;  %v8253_v27 = vpop.eup %6390  ;;  %v8269_v44 = vsub.s32 %v3938_v12, %v8239_v19  ;;  %v3959_v12 = vadd.s32 4294967248, %v8229_v16 }
 0x376   : > { %9098 = vst [vmem:[#allocation25_spill] sm:$0xff] %v8253_v27  ;;  %6404 = vrcp.f32 %v2817_v60  ;;  %v2819_v15 = vpop.xlane.xlu0 %2818  ;;  %v6393_v52 = vpop.eup %6392  ;;  %v3952_v60 = vadd.s32 4294967256, %v8229_v16 }
 0x377   : > { %6406 = vrcp.f32 %v2819_v15  ;;  %6025 = vmatprep.subr.bf16.mxu0 %v6024_v31 }
 0x378   : > { %v8265_v7 = vpop.eup %6394  ;;  %2966 = vadd.xlane.f32.xlu1 %v7945_v9  ;;  %6027 = vmatpush3.bf16.xpose.msra.mxu0 %v6024_v31  ;;  %v3923_v9 = vrot.slane %v6393_v52, %v8257_v5 }
 0x379   : > { %9099 = vst [vmem:[#allocation23_spill] sm:$0xff] %v8265_v7  ;;  %v6397_v57 = vpop.eup %6396  ;;  %v2821_v4 = vpop.xlane.xlu1 %2820  ;;  %2968 = vadd.xlane.f32.xlu0 %v7948_v23  ;;  %v6056_v14 = vpack.c.bf16 %v8265_v7, %v8253_v27  ;;  %v346_v7 = vld [vmem:[%s7415_s18 + $0x68] sm:$0xff]  ;;  %v8287_v27 = vsub.s32 %v3952_v60, %v8239_v19 }
 0x37a   : > { %v6399_v15 = vpop.eup %6398  ;;  %v3928_v31 = vrot.slane %v6397_v57, %v8260_v34  ;;  %6408 = vrcp.f32 %v2821_v4  ;;  %v2823_v41 = vpop.xlane.xlu0 %2822  ;;  %v3966_v4 = vadd.s32 4294967240, %v8229_v16 }
 0x37b   : > { %v3935_v2 = vrot.slane %v6399_v15, %v8263_v10  ;;  %6410 = vrcp.f32 %v2823_v41  ;;  %6057 = vmatprep.subr.bf16.mxu1 %v6056_v14  ;;  %v3973_v41 = vadd.s32 4294967232, %v8229_v16 }
 0x37c   : > { %v6401_v49 = vpop.eup %6400  ;;  %v3930_v23 = vsel %vm3929_vm1, %v3928_v31, %v3923_v9  ;;  %2998 = vadd.xlane.f32.xlu1 %v8097_v48  ;;  %6059 = vmatpush3.bf16.xpose.msra.mxu1 %v6056_v14  ;;  %v8295_v14 = vsub.s32 %v3959_v12, %v8239_v19 }
 0x37d   : > { %v6403_v52 = vpop.eup %6402  ;;  %v3942_v57 = vrot.slane %v6401_v49, %v8269_v44  ;;  %v2825_v15 = vpop.xlane.xlu1 %2824  ;;  %3000 = vadd.xlane.f32.xlu0 %v8100_v21  ;;  %v3937_v9 = vsel %vm3936_vm2, %v3935_v2, %v3930_v23  ;;  %v8302_v23 = vsub.s32 %v3966_v4, %v8239_v19  ;;  %v8305_v12 = vsub.s32 %v3973_v41, %v8239_v19 }
 0x37e   : > { %v3949_v48 = vrot.slane %v6403_v52, %v8272_v17  ;;  %6412 = vrcp.f32 %v2825_v15  ;;  %v2827_v49 = vpop.xlane.xlu0 %2826  ;;  %v3980_v52 = vadd.s32 4294967224, %v8229_v16 }
 0x37f   : > { %v3944_v60 = vsel %vm3943_vm3, %v3942_v57, %v3937_v9  ;;  %6414 = vrcp.f32 %v2827_v49  ;;  %5735 = vmatmul.mubr.f32.vlgmr.msra.gmra.mrb[70].mxu0 %v346_v7 }
 0x380   : > { %v6405_v31 = vpop.eup %6404  ;;  %3030 = vadd.xlane.f32.xlu1 %v8109_v30  ;;  %v3951_v7 = vsel %vm3950_vm4, %v3949_v48, %v3944_v60  ;;  %v3987_v30 = vadd.s32 4294967216, %v8229_v16  ;;  %v8316_v48 = vsub.s32 %v3980_v52, %v8239_v19  ;;  %v3994_v60 = vadd.s32 4294967208, %v8229_v16 }
 0x381   : > { %v6407_v21 = vpop.eup %6406  ;;  %v3956_v2 = vrot.slane %v6405_v31, %v8287_v27  ;;  %v2829_v57 = vpop.xlane.xlu1 %2828  ;;  %3032 = vadd.xlane.f32.xlu0 %v8112_v24 }
 0x382   : > { %v3963_v15 = vrot.slane %v6407_v21, %v8295_v14  ;;  %6416 = vrcp.f32 %v2829_v57  ;;  %v2831_v9 = vpop.xlane.xlu0 %2830  ;;  %v4001_v21 = vadd.s32 4294967200, %v8229_v16  ;;  %v8324_v57 = vsub.s32 %v3987_v30, %v8239_v19 }
 0x383   : > { %v3958_v49 = vsel %vm3957_vm5, %v3956_v2, %v3951_v7  ;;  %6418 = vrcp.f32 %v2831_v9  ;;  %5770 = vmatmul.mubr.f32.vlgmr.msra.gmra.mrb[70].mxu1 %v348_v22 }
 0x384   : > { %v6409_v4 = vpop.eup %6408  ;;  %2970 = vadd.xlane.f32.xlu1 %v7967_v26  ;;  %v3965_v2 = vsel %vm3964_vm6, %v3963_v15, %v3958_v49  ;;  %v8330_v15 = vsub.s32 %v3994_v60, %v8239_v19  ;;  %v8334_v30 = vsub.s32 %v4001_v21, %v8239_v19 }
 0x385   : > { %v6411_v41 = vpop.eup %6410  ;;  %v3970_v24 = vrot.slane %v6409_v4, %v8302_v23  ;;  %v2833_v31 = vpop.xlane.xlu1 %2832  ;;  %3002 = vadd.xlane.f32.xlu0 %v8121_v43  ;;  %v4008_v4 = vadd.s32 4294967192, %v8229_v16 }
 0x386   : > { %v3977_v22 = vrot.slane %v6411_v41, %v8305_v12  ;;  %6420 = vrcp.f32 %v2833_v31  ;;  %v2835_v26 = vpop.xlane.xlu0 %2834  ;;  %v4015_v31 = vadd.s32 4294967184, %v8229_v16 }
 0x387   : > { %v3972_v7 = vsel %vm3971_vm7, %v3970_v24, %v3965_v2  ;;  %6422 = vrcp.f32 %v2835_v26 }
 0x388   : > { %v6413_v52 = vpop.eup %6412  ;;  %3034 = vadd.xlane.f32.xlu1 %v8131_v28  ;;  %v3979_v28 = vsel %vm3978_vm8, %v3977_v22, %v3972_v7  ;;  %v4022_v22 = vadd.s32 4294967176, %v8229_v16 }
 0x389   : > { %v6415_v43 = vpop.eup %6414  ;;  %v3984_v9 = vrot.slane %v6413_v52, %v8316_v48  ;;  %v2837_v49 = vpop.xlane.xlu1 %2836  ;;  %2972 = vadd.xlane.f32.xlu0 %v7970_v40  ;;  %v8345_v52 = vsub.s32 %v4008_v4, %v8239_v19 }
 0x38a   : > { %v3991_v41 = vrot.slane %v6415_v43, %v8324_v57  ;;  %6424 = vrcp.f32 %v2837_v49  ;;  %v2839_v24 = vpop.xlane.xlu0 %2838 }
 0x38b   : > { %v3986_v2 = vsel %vm3985_vm9, %v3984_v9, %v3979_v28  ;;  %6426 = vrcp.f32 %v2839_v24 }
 0x38c   : > { %v6417_v60 = vpop.eup %6416  ;;  %3004 = vadd.xlane.f32.xlu1 %v8124_v39  ;;  %v3993_v43 = vsel %vm3992_vm10, %v3991_v41, %v3986_v2  ;;  %v8351_v39 = vsub.s32 %v4015_v31, %v8239_v19  ;;  %v8358_v41 = vsub.s32 %v4022_v22, %v8239_v19 }
 0x38d   : > { %v6419_v40 = vpop.eup %6418  ;;  %v3998_v21 = vrot.slane %v6417_v60, %v8330_v15  ;;  %v2841_v26 = vpop.xlane.xlu1 %2840  ;;  %3036 = vadd.xlane.f32.xlu0 %v8134_v20 }
 0x38e   : > { %6428 = vrcp.f32 %v2841_v26  ;;  %v2843_v7 = vpop.xlane.xlu0 %2842  ;;  %v4005_v9 = vrot.slane %v6419_v40, %v8334_v30 }
 0x38f   : > { %6430 = vrcp.f32 %v2843_v7  ;;  %v4000_v49 = vsel %vm3999_vm11, %v3998_v21, %v3993_v43 }
 0x390   : > { %v6421_v24 = vpop.eup %6420  ;;  %2974 = vadd.xlane.f32.xlu1 %v7987_v11  ;;  %v4007_v2 = vsel %vm4006_vm12, %v4005_v9, %v4000_v49 }
 0x391   : > { %v6423_v20 = vpop.eup %6422  ;;  %v2845_v4 = vpop.xlane.xlu1 %2844  ;;  %3006 = vadd.xlane.f32.xlu0 %v8141_v25  ;;  %v4012_v16 = vrot.slane %v6421_v24, %v8345_v52 }
 0x392   : > { %6432 = vrcp.f32 %v2845_v4  ;;  %v2847_v28 = vpop.xlane.xlu0 %2846  ;;  %v5526_v31 = vpop.f32.mrb[64].mxu0  ;;  %v4019_v60 = vrot.slane %v6423_v20, %v8351_v39 }
 0x393   : > { %6434 = vrcp.f32 %v2847_v28  ;;  %v4014_v11 = vsel %vm4013_vm13, %v4012_v16, %v4007_v2  ;;  %v3128_v40 = vpop.f32.mrb[65].mxu0 }
 0x394   : > { %v6425_v21 = vpop.eup %6424  ;;  %3038 = vadd.xlane.f32.xlu1 %v8151_v13  ;;  %v4021_v22 = vsel %vm4020_vm14, %v4019_v60, %v4014_v11 }
 0x395   : > { %v2849_v25 = vpop.xlane.xlu1 %2848  ;;  %2976 = vadd.xlane.f32.xlu0 %v7990_v1  ;;  %v4026_v19 = vrot.slane %v6425_v21, %v8358_v41  ;;  %v6427_v26 = vpop.eup %6426 }
 0x396   : > { %6436 = vrcp.f32 %v2849_v25  ;;  %v2851_v7 = vpop.xlane.xlu0 %2850  ;;  %v8367_v43 = vpop.f32.mrb[64].mxu1  ;;  %v4032_v4 = vrot.slane %v6427_v26, %v8257_v5 }
 0x397   : > { %v4028_v9 = vsel %vm4027_vm15, %v4026_v19, %v4021_v22  ;;  %6438 = vrcp.f32 %v2851_v7  ;;  %v8370_v49 = vpop.f32.mrb[65].mxu1 }
 0x398   : > { %v6429_v13 = vpop.eup %6428  ;;  %v4645_v24 = vmul.f32 %v5526_v31, %v4028_v9  ;;  %v4644_v20 = vmul.f32 %v4028_v9, %v3128_v40  ;;  %3008 = vadd.xlane.f32.xlu1 %v8144_v33 }
 0x399   : > { %v6431_v1 = vpop.eup %6430  ;;  %v4036_v16 = vrot.slane %v6429_v13, %v8260_v34  ;;  %v2853_v28 = vpop.xlane.xlu1 %2852  ;;  %3040 = vadd.xlane.f32.xlu0 %v8154_v36 }
 0x39a   : > { %v4041_v2 = vrot.slane %v6431_v1, %v8263_v10  ;;  %4661 = vst [vmem:[%s8378_s24 + $0x8] sm:$0xff] %v4645_v24  ;;  %4660 = vst [vmem:[%s8378_s24] sm:$0xff] %v4644_v20  ;;  %6440 = vrcp.f32 %v2853_v28  ;;  %v2855_v31 = vpop.xlane.xlu0 %2854 }
 0x39b   : > { %v4037_v33 = vsel %vm3929_vm1, %v4036_v16, %v4032_v4  ;;  %6442 = vrcp.f32 %v2855_v31 }
 0x39c   : > { %v6433_v60 = vpop.eup %6432  ;;  %2978 = vadd.xlane.f32.xlu1 %v8007_v8  ;;  %v4042_v21 = vsel %vm3936_vm2, %v4041_v2, %v4037_v33 }
 0x39d   : > { %v6435_v11 = vpop.eup %6434  ;;  %v4046_v40 = vrot.slane %v6433_v60, %v8269_v44  ;;  %v2857_v36 = vpop.xlane.xlu1 %2856  ;;  %3010 = vadd.xlane.f32.xlu0 %v8161_v6 }
 0x39e   : > { %v4051_v25 = vrot.slane %v6435_v11, %v8272_v17  ;;  %6444 = vrcp.f32 %v2857_v36  ;;  %v2859_v19 = vpop.xlane.xlu0 %2858 }
 0x39f   : > { %v4047_v26 = vsel %vm3943_vm3, %v4046_v40, %v4042_v21  ;;  %6446 = vrcp.f32 %v2859_v19 }
 0x3a0   : > { %v6437_v22 = vpop.eup %6436  ;;  %3042 = vadd.xlane.f32.xlu1 %v8171_v29  ;;  %v4052_v6 = vsel %vm3950_vm4, %v4051_v25, %v4047_v26 }
 0x3a1   : > { %v6439_v7 = vpop.eup %6438  ;;  %v4056_v8 = vrot.slane %v6437_v22, %v8287_v27  ;;  %v2861_v9 = vpop.xlane.xlu1 %2860  ;;  %2980 = vadd.xlane.f32.xlu0 %v8010_v61 }
 0x3a2   : > { %v4061_v13 = vrot.slane %v6439_v7, %v8295_v14  ;;  %6448 = vrcp.f32 %v2861_v9  ;;  %v2863_v24 = vpop.xlane.xlu0 %2862 }
 0x3a3   : > { %v4057_v20 = vsel %vm3957_vm5, %v4056_v8, %v4052_v6  ;;  %6450 = vrcp.f32 %v2863_v24 }
 0x3a4   : > { %v6441_v1 = vpop.eup %6440  ;;  %3012 = vadd.xlane.f32.xlu1 %v8164_v51  ;;  %v4062_v61 = vsel %vm3964_vm6, %v4061_v13, %v4057_v20 }
 0x3a5   : > { %v6443_v4 = vpop.eup %6442  ;;  %v4066_v29 = vrot.slane %v6441_v1, %v8302_v23  ;;  %v2865_v16 = vpop.xlane.xlu1 %2864  ;;  %3044 = vadd.xlane.f32.xlu0 %v8174_v42 }
 0x3a6   : > { %v4071_v28 = vrot.slane %v6443_v4, %v8305_v12  ;;  %6452 = vrcp.f32 %v2865_v16  ;;  %v2867_v2 = vpop.xlane.xlu0 %2866 }
 0x3a7   : > { %v4067_v31 = vsel %vm3971_vm7, %v4066_v29, %v4062_v61  ;;  %6454 = vrcp.f32 %v2867_v2 }
 0x3a8   : > { %v6445_v33 = vpop.eup %6444  ;;  %2982 = vadd.xlane.f32.xlu1 %v8027_v62  ;;  %v4072_v36 = vsel %vm3978_vm8, %v4071_v28, %v4067_v31 }
 0x3a9   : > { %v6447_v60 = vpop.eup %6446  ;;  %v4076_v51 = vrot.slane %v6445_v33, %v8316_v48  ;;  %v2869_v11 = vpop.xlane.xlu1 %2868  ;;  %3014 = vadd.xlane.f32.xlu0 %v8181_v50 }
 0x3aa   : > { %v4081_v42 = vrot.slane %v6447_v60, %v8324_v57  ;;  %6456 = vrcp.f32 %v2869_v11  ;;  %v2871_v40 = vpop.xlane.xlu0 %2870 }
 0x3ab   : > { %v4077_v21 = vsel %vm3985_vm9, %v4076_v51, %v4072_v36  ;;  %6458 = vrcp.f32 %v2871_v40 }
 0x3ac   : > { %v6449_v25 = vpop.eup %6448  ;;  %3046 = vadd.xlane.f32.xlu1 %v8191_v46  ;;  %v4082_v22 = vsel %vm3992_vm10, %v4081_v42, %v4077_v21 }
 0x3ad   : > { %v6451_v19 = vpop.eup %6450  ;;  %v4086_v62 = vrot.slane %v6449_v25, %v8330_v15  ;;  %v2873_v26 = vpop.xlane.xlu1 %2872  ;;  %2984 = vadd.xlane.f32.xlu0 %v8030_v63 }
 0x3ae   : > { %6460 = vrcp.f32 %v2873_v26  ;;  %v2875_v50 = vpop.xlane.xlu0 %2874  ;;  %v4091_v7 = vrot.slane %v6451_v19, %v8334_v30 }
 0x3af   : > { %6462 = vrcp.f32 %v2875_v50  ;;  %v4087_v8 = vsel %vm3999_vm11, %v4086_v62, %v4082_v22 }
 0x3b0   : > { %v6453_v9 = vpop.eup %6452  ;;  %3016 = vadd.xlane.f32.xlu1 %v8184_v38  ;;  %v4092_v24 = vsel %vm4006_vm12, %v4091_v7, %v4087_v8 }
 0x3b1   : > { %v6455_v6 = vpop.eup %6454  ;;  %v2877_v46 = vpop.xlane.xlu1 %2876  ;;  %3048 = vadd.xlane.f32.xlu0 %v8194_v35  ;;  %v4096_v13 = vrot.slane %v6453_v9, %v8345_v52 }
 0x3b2   : > { %6464 = vrcp.f32 %v2877_v46  ;;  %v2879_v63 = vpop.xlane.xlu0 %2878  ;;  %v4101_v20 = vrot.slane %v6455_v6, %v8351_v39 }
 0x3b3   : > { %6466 = vrcp.f32 %v2879_v63  ;;  %v4097_v1 = vsel %vm4013_vm13, %v4096_v13, %v4092_v24 }
 0x3b4   : > { %v6457_v4 = vpop.eup %6456  ;;  %2986 = vadd.xlane.f32.xlu1 %v8047_v58  ;;  %v4102_v16 = vsel %vm4020_vm14, %v4101_v20, %v4097_v1 }
 0x3b5   : > { %v2881_v29 = vpop.xlane.xlu1 %2880  ;;  %3018 = vadd.xlane.f32.xlu0 %v8201_v0  ;;  %v4106_v38 = vrot.slane %v6457_v4, %v8358_v41  ;;  %v6459_v35 = vpop.eup %6458 }
 0x3b6   : > { %6468 = vrcp.f32 %v2881_v29  ;;  %v2883_v61 = vpop.xlane.xlu0 %2882  ;;  %v4111_v33 = vrot.slane %v6459_v35, %v8257_v5 }
 0x3b7   : > { %v4107_v28 = vsel %vm4027_vm15, %v4106_v38, %v4102_v16  ;;  %6470 = vrcp.f32 %v2883_v61 }
 0x3b8   : > { %v6461_v2 = vpop.eup %6460  ;;  %v4647_v31 = vmul.f32 %v8367_v43, %v4107_v28  ;;  %v4646_v58 = vmul.f32 %v4107_v28, %v8370_v49  ;;  %3050 = vadd.xlane.f32.xlu1 %v8211_v47 }
 0x3b9   : > { %v6463_v0 = vpop.eup %6462  ;;  %v4115_v60 = vrot.slane %v6461_v2, %v8260_v34  ;;  %v2885_v51 = vpop.xlane.xlu1 %2884  ;;  %2988 = vadd.xlane.f32.xlu0 %v8050_v56  ;;  %v9100_v2 = vld [vmem:[#allocation18_spill] sm:$0xff] }
 0x3ba   : > { %v4120_v11 = vrot.slane %v6463_v0, %v8263_v10  ;;  %4663 = vst [vmem:[%s8378_s24 + $0x18] sm:$0xff] %v4647_v31  ;;  %4662 = vst [vmem:[%s8378_s24 + $0x10] sm:$0xff] %v4646_v58  ;;  %6472 = vrcp.f32 %v2885_v51  ;;  %v2887_v42 = vpop.xlane.xlu0 %2886 }
 0x3bb   : > { %v4116_v43 = vsel %vm3929_vm1, %v4115_v60, %v4111_v33  ;;  %6474 = vrcp.f32 %v2887_v42  ;;  %v9101_v60 = vld [vmem:[#allocation21_spill] sm:$0xff] }
 0x3bc   : > { %v6465_v49 = vpop.eup %6464  ;;  %3020 = vadd.xlane.f32.xlu1 %v8204_v45  ;;  %v4121_v56 = vsel %vm3936_vm2, %v4120_v11, %v4116_v43  ;;  %v9102_v11 = vld [vmem:[#allocation22_spill] sm:$0xff] }
 0x3bd   : > { %v6467_v47 = vpop.eup %6466  ;;  %v4125_v40 = vrot.slane %v6465_v49, %v8269_v44  ;;  %v2889_v36 = vpop.xlane.xlu1 %2888  ;;  %3052 = vadd.xlane.f32.xlu0 %v8214_v59 }
 0x3be   : > { %v4130_v21 = vrot.slane %v6467_v47, %v8272_v17  ;;  %6476 = vrcp.f32 %v2889_v36  ;;  %v2891_v25 = vpop.xlane.xlu0 %2890 }
 0x3bf   : > { %v4126_v19 = vsel %vm3943_vm3, %v4125_v40, %v4121_v56  ;;  %6478 = vrcp.f32 %v2891_v25  ;;  %v9103_v25 = vld [vmem:[#allocation25_spill] sm:$0xff] }
 0x3c0   : > { %v6469_v62 = vpop.eup %6468  ;;  %2990 = vadd.xlane.f32.xlu1 %v8067_v3  ;;  %v4131_v59 = vsel %vm3950_vm4, %v4130_v21, %v4126_v19 }
 0x3c1   : > { %v6471_v26 = vpop.eup %6470  ;;  %v4135_v45 = vrot.slane %v6469_v62, %v8287_v27  ;;  %v2893_v50 = vpop.xlane.xlu1 %2892  ;;  %3022 = vadd.xlane.f32.xlu0 %v8221_v37  ;;  %v9104_v62 = vld [vmem:[#allocation16_spill] sm:$0xff] }
 0x3c2   : > { %v4140_v22 = vrot.slane %v6471_v26, %v8295_v14  ;;  %6480 = vrcp.f32 %v2893_v50  ;;  %v2895_v7 = vpop.xlane.xlu0 %2894 }
 0x3c3   : > { %v4136_v8 = vsel %vm3957_vm5, %v4135_v45, %v4131_v59  ;;  %6482 = vrcp.f32 %v2895_v7 }
 0x3c4   : > { %v6473_v9 = vpop.eup %6472  ;;  %3054 = vadd.xlane.f32.xlu1 %v8231_v32  ;;  %v4141_v37 = vsel %vm3964_vm6, %v4140_v22, %v4136_v8 }
 0x3c5   : > { %v6475_v6 = vpop.eup %6474  ;;  %v4145_v3 = vrot.slane %v6473_v9, %v8302_v23  ;;  %v2897_v46 = vpop.xlane.xlu1 %2896  ;;  %2960 = vadd.xlane.f32.xlu0 %v8060_v53 }
 0x3c6   : > { %v4150_v13 = vrot.slane %v6475_v6, %v8305_v12  ;;  %6484 = vrcp.f32 %v2897_v46  ;;  %v2899_v63 = vpop.xlane.xlu0 %2898  ;;  %v9105_v46 = vld [vmem:[#allocation19_spill] sm:$0xff] }
 0x3c7   : > { %v4146_v24 = vsel %vm3971_vm7, %v4145_v3, %v4141_v37  ;;  %6486 = vrcp.f32 %v2899_v63 }
 0x3c8   : > { %v6477_v20 = vpop.eup %6476  ;;  %2992 = vadd.xlane.f32.xlu1 %v8070_v54  ;;  %v4151_v53 = vsel %vm3978_vm8, %v4150_v13, %v4146_v24 }
 0x3c9   : > { %v6479_v1 = vpop.eup %6478  ;;  %v4155_v32 = vrot.slane %v6477_v20, %v8316_v48  ;;  %v2901_v4 = vpop.xlane.xlu1 %2900  ;;  %3024 = vadd.xlane.f32.xlu0 %v8223_v55  ;;  %v9106_v20 = vld [vmem:[#allocation20_spill] sm:$0xff] }
 0x3ca   : > { %v4160_v29 = vrot.slane %v6479_v1, %v8324_v57  ;;  %6488 = vrcp.f32 %v2901_v4  ;;  %v2903_v38 = vpop.xlane.xlu0 %2902 }
 0x3cb   : > { %v4156_v35 = vsel %vm3985_vm9, %v4155_v32, %v4151_v53  ;;  %6490 = vrcp.f32 %v2903_v38 }
 0x3cc   : > { %v6481_v16 = vpop.eup %6480  ;;  %3056 = vadd.xlane.f32.xlu1 %v8233_v18  ;;  %v4161_v58 = vsel %vm3992_vm10, %v4160_v29, %v4156_v35  ;;  %v9107_v29 = vld [vmem:[#allocation23_spill] sm:$0xff] }
 0x3cd   : > { %v6483_v61 = vpop.eup %6482  ;;  %v4165_v54 = vrot.slane %v6481_v16, %v8330_v15  ;;  %v2905_v28 = vpop.xlane.xlu1 %2904  ;;  %2962 = vadd.xlane.f32.xlu0 %v9100_v2 }
 0x3ce   : > { %v4170_v55 = vrot.slane %v6483_v61, %v8334_v30  ;;  %6492 = vrcp.f32 %v2905_v28  ;;  %v2907_v31 = vpop.xlane.xlu0 %2906 }
 0x3cf   : > { %6494 = vrcp.f32 %v2907_v31  ;;  %v4166_v0 = vsel %vm3999_vm11, %v4165_v54, %v4161_v58 }
 0x3d0   : > { %v6485_v33 = vpop.eup %6484  ;;  %2994 = vadd.xlane.f32.xlu1 %v9101_v60  ;;  %v4171_v47 = vsel %vm4006_vm12, %v4170_v55, %v4166_v0 }
 0x3d1   : > { %v6487_v51 = vpop.eup %6486  ;;  %v2909_v18 = vpop.xlane.xlu1 %2908  ;;  %3026 = vadd.xlane.f32.xlu0 %v9102_v11  ;;  %v4175_v42 = vrot.slane %v6485_v33, %v8345_v52 }
 0x3d2   : > { %6496 = vrcp.f32 %v2909_v18  ;;  %v2911_v43 = vpop.xlane.xlu0 %2910  ;;  %v5596_v49 = vpop.f32.mrb[66].mxu0  ;;  %v4180_v40 = vrot.slane %v6487_v51, %v8351_v39 }
 0x3d3   : > { %6498 = vrcp.f32 %v2911_v43  ;;  %v4176_v36 = vsel %vm4013_vm13, %v4175_v42, %v4171_v47  ;;  %v3278_v56 = vpop.f32.mrb[67].mxu0 }
 0x3d4   : > { %v6489_v21 = vpop.eup %6488  ;;  %3058 = vadd.xlane.f32.xlu1 %v9103_v25  ;;  %v4181_v50 = vsel %vm4020_vm14, %v4180_v40, %v4176_v36 }
 0x3d5   : > { %v2913_v19 = vpop.xlane.xlu1 %2912  ;;  %2964 = vadd.xlane.f32.xlu0 %v9104_v62  ;;  %v4185_v26 = vrot.slane %v6489_v21, %v8358_v41  ;;  %v6491_v45 = vpop.eup %6490 }
 0x3d6   : > { %6500 = vrcp.f32 %v2913_v19  ;;  %v2915_v59 = vpop.xlane.xlu0 %2914  ;;  %v8474_v22 = vpop.f32.mrb[66].mxu1  ;;  %v4190_v13 = vrot.slane %v6491_v45, %v8257_v5 }
 0x3d7   : > { %v4186_v7 = vsel %vm4027_vm15, %v4185_v26, %v4181_v50  ;;  %6502 = vrcp.f32 %v2915_v59  ;;  %v8477_v8 = vpop.f32.mrb[67].mxu1 }
 0x3d8   : > { %v6493_v9 = vpop.eup %6492  ;;  %v4649_v6 = vmul.f32 %v5596_v49, %v4186_v7  ;;  %v4648_v3 = vmul.f32 %v4186_v7, %v3278_v56  ;;  %2996 = vadd.xlane.f32.xlu1 %v9105_v46 }
 0x3d9   : > { %v6495_v37 = vpop.eup %6494  ;;  %v4194_v63 = vrot.slane %v6493_v9, %v8260_v34  ;;  %v2917_v24 = vpop.xlane.xlu1 %2916  ;;  %3028 = vadd.xlane.f32.xlu0 %v9106_v20 }
 0x3da   : > { %v4199_v1 = vrot.slane %v6495_v37, %v8263_v10  ;;  %4665 = vst [vmem:[%s8378_s24 + $0x28] sm:$0xff] %v4649_v6  ;;  %4664 = vst [vmem:[%s8378_s24 + $0x20] sm:$0xff] %v4648_v3  ;;  %6504 = vrcp.f32 %v2917_v24  ;;  %v2919_v32 = vpop.xlane.xlu0 %2918 }
 0x3db   : > { %v4195_v4 = vsel %vm3929_vm1, %v4194_v63, %v4190_v13  ;;  %6506 = vrcp.f32 %v2919_v32 }
 0x3dc   : > { %v6497_v53 = vpop.eup %6496  ;;  %3060 = vadd.xlane.f32.xlu1 %v9107_v29  ;;  %v4200_v61 = vsel %vm3936_vm2, %v4199_v1, %v4195_v4 }
 0x3dd   : > { %v6499_v38 = vpop.eup %6498  ;;  %v4204_v35 = vrot.slane %v6497_v53, %v8269_v44  ;;  %v2921_v16 = vpop.xlane.xlu1 %2920 }
 0x3de   : > { %v4209_v54 = vrot.slane %v6499_v38, %v8272_v17  ;;  %6508 = vrcp.f32 %v2921_v16  ;;  %v2923_v28 = vpop.xlane.xlu0 %2922 }
 0x3df   : > { %v4205_v2 = vsel %vm3943_vm3, %v4204_v35, %v4200_v61  ;;  %6510 = vrcp.f32 %v2923_v28 }
 0x3e0   : > { %v6501_v55 = vpop.eup %6500  ;;  %v4210_v33 = vsel %vm3950_vm4, %v4209_v54, %v4205_v2 }
 0x3e1   : > { %v6503_v31 = vpop.eup %6502  ;;  %v4214_v58 = vrot.slane %v6501_v55, %v8287_v27  ;;  %v2925_v0 = vpop.xlane.xlu1 %2924 }
 0x3e2   : > { %v4219_v60 = vrot.slane %v6503_v31, %v8295_v14  ;;  %6512 = vrcp.f32 %v2925_v0  ;;  %v2927_v51 = vpop.xlane.xlu0 %2926 }
 0x3e3   : > { %v4215_v18 = vsel %vm3957_vm5, %v4214_v58, %v4210_v33  ;;  %6514 = vrcp.f32 %v2927_v51 }
 0x3e4   : > { %v6505_v11 = vpop.eup %6504  ;;  %v4220_v47 = vsel %vm3964_vm6, %v4219_v60, %v4215_v18 }
 0x3e5   : > { %v6507_v42 = vpop.eup %6506  ;;  %v4224_v43 = vrot.slane %v6505_v11, %v8302_v23  ;;  %v2929_v49 = vpop.xlane.xlu1 %2928 }
 0x3e6   : > { %v4229_v40 = vrot.slane %v6507_v42, %v8305_v12  ;;  %6516 = vrcp.f32 %v2929_v49  ;;  %v2931_v36 = vpop.xlane.xlu0 %2930 }
 0x3e7   : > { %v4225_v56 = vsel %vm3971_vm7, %v4224_v43, %v4220_v47  ;;  %6518 = vrcp.f32 %v2931_v36 }
 0x3e8   : > { %v6509_v21 = vpop.eup %6508  ;;  %v4230_v26 = vsel %vm3978_vm8, %v4229_v40, %v4225_v56 }
 0x3e9   : > { %v6511_v25 = vpop.eup %6510  ;;  %v4234_v19 = vrot.slane %v6509_v21, %v8316_v48  ;;  %v2933_v62 = vpop.xlane.xlu1 %2932 }
 0x3ea   : > { %v4239_v45 = vrot.slane %v6511_v25, %v8324_v57  ;;  %6520 = vrcp.f32 %v2933_v62  ;;  %v2935_v50 = vpop.xlane.xlu0 %2934 }
 0x3eb   : > { %v4235_v59 = vsel %vm3985_vm9, %v4234_v19, %v4230_v26  ;;  %6522 = vrcp.f32 %v2935_v50 }
 0x3ec   : > { %v6513_v7 = vpop.eup %6512  ;;  %v4240_v13 = vsel %vm3992_vm10, %v4239_v45, %v4235_v59 }
 0x3ed   : > { %v6515_v9 = vpop.eup %6514  ;;  %v4244_v6 = vrot.slane %v6513_v7, %v8330_v15  ;;  %v2937_v3 = vpop.xlane.xlu1 %2936 }
 0x3ee   : > { %v4249_v46 = vrot.slane %v6515_v9, %v8334_v30  ;;  %6524 = vrcp.f32 %v2937_v3  ;;  %v2939_v37 = vpop.xlane.xlu0 %2938 }
 0x3ef   : > { %6526 = vrcp.f32 %v2939_v37  ;;  %v4245_v63 = vsel %vm3999_vm11, %v4244_v6, %v4240_v13 }
 0x3f0   : > { %v6517_v24 = vpop.eup %6516  ;;  %v4250_v53 = vsel %vm4006_vm12, %v4249_v46, %v4245_v63 }
 0x3f1   : > { %v6519_v20 = vpop.eup %6518  ;;  %v2941_v1 = vpop.xlane.xlu1 %2940  ;;  %v4254_v32 = vrot.slane %v6517_v24, %v8345_v52 }
 0x3f2   : > { %6528 = vrcp.f32 %v2941_v1  ;;  %v2943_v4 = vpop.xlane.xlu0 %2942  ;;  %v4259_v29 = vrot.slane %v6519_v20, %v8351_v39 }
 0x3f3   : > { %6530 = vrcp.f32 %v2943_v4  ;;  %v4255_v38 = vsel %vm4013_vm13, %v4254_v32, %v4250_v53 }
 0x3f4   : > { %v6521_v35 = vpop.eup %6520  ;;  %v4260_v28 = vsel %vm4020_vm14, %v4259_v29, %v4255_v38 }
 0x3f5   : > { %v2945_v16 = vpop.xlane.xlu1 %2944  ;;  %v4264_v61 = vrot.slane %v6521_v35, %v8358_v41  ;;  %v6523_v54 = vpop.eup %6522 }
 0x3f6   : > { %6532 = vrcp.f32 %v2945_v16  ;;  %v2947_v2 = vpop.xlane.xlu0 %2946  ;;  %v4269_v60 = vrot.slane %v6523_v54, %v8257_v5 }
 0x3f7   : > { %v4265_v55 = vsel %vm4027_vm15, %v4264_v61, %v4260_v28  ;;  %6534 = vrcp.f32 %v2947_v2 }
 0x3f8   : > { %v6525_v31 = vpop.eup %6524  ;;  %v4651_v58 = vmul.f32 %v8474_v22, %v4265_v55  ;;  %v4650_v0 = vmul.f32 %v4265_v55, %v8477_v8 }
 0x3f9   : > { %v6527_v33 = vpop.eup %6526  ;;  %v4273_v51 = vrot.slane %v6525_v31, %v8260_v34  ;;  %v2949_v18 = vpop.xlane.xlu1 %2948 }
 0x3fa   : > { %v4278_v11 = vrot.slane %v6527_v33, %v8263_v10  ;;  %4667 = vst [vmem:[%s8378_s24 + $0x38] sm:$0xff] %v4651_v58  ;;  %4666 = vst [vmem:[%s8378_s24 + $0x30] sm:$0xff] %v4650_v0  ;;  %6536 = vrcp.f32 %v2949_v18  ;;  %v2951_v42 = vpop.xlane.xlu0 %2950 }
 0x3fb   : > { %v4274_v43 = vsel %vm3929_vm1, %v4273_v51, %v4269_v60  ;;  %6538 = vrcp.f32 %v2951_v42 }
 0x3fc   : > { %v6529_v49 = vpop.eup %6528  ;;  %v4279_v22 = vsel %vm3936_vm2, %v4278_v11, %v4274_v43 }
 0x3fd   : > { %v6531_v47 = vpop.eup %6530  ;;  %v4283_v8 = vrot.slane %v6529_v49, %v8269_v44  ;;  %v2953_v40 = vpop.xlane.xlu1 %2952 }
 0x3fe   : > { %v4288_v36 = vrot.slane %v6531_v47, %v8272_v17  ;;  %6540 = vrcp.f32 %v2953_v40  ;;  %v2955_v56 = vpop.xlane.xlu0 %2954 }
 0x3ff   : > { %v4284_v21 = vsel %vm3943_vm3, %v4283_v8, %v4279_v22  ;;  %6542 = vrcp.f32 %v2955_v56 }
 0x400   : > { %v6533_v25 = vpop.eup %6532  ;;  %v4289_v19 = vsel %vm3950_vm4, %v4288_v36, %v4284_v21 }
 0x401   : > { %v6535_v62 = vpop.eup %6534  ;;  %v4293_v26 = vrot.slane %v6533_v25, %v8287_v27  ;;  %v2957_v45 = vpop.xlane.xlu1 %2956 }
 0x402   : > { %v4298_v50 = vrot.slane %v6535_v62, %v8295_v14  ;;  %6544 = vrcp.f32 %v2957_v45  ;;  %v2959_v59 = vpop.xlane.xlu0 %2958 }
 0x403   : > { %v4294_v7 = vsel %vm3957_vm5, %v4293_v26, %v4289_v19  ;;  %6546 = vrcp.f32 %v2959_v59 }
 0x404   : > { %v6537_v9 = vpop.eup %6536  ;;  %v4299_v6 = vsel %vm3964_vm6, %v4298_v50, %v4294_v7 }
 0x405   : > { %v6539_v3 = vpop.eup %6538  ;;  %v4303_v46 = vrot.slane %v6537_v9, %v8302_v23  ;;  %v2967_v37 = vpop.xlane.xlu1 %2966 }
 0x406   : > { %v4308_v13 = vrot.slane %v6539_v3, %v8305_v12  ;;  %6548 = vrcp.f32 %v2967_v37  ;;  %v2969_v63 = vpop.xlane.xlu0 %2968 }
 0x407   : > { %v4304_v24 = vsel %vm3971_vm7, %v4303_v46, %v4299_v6  ;;  %6550 = vrcp.f32 %v2969_v63 }
 0x408   : > { %v6541_v20 = vpop.eup %6540  ;;  %v4309_v1 = vsel %vm3978_vm8, %v4308_v13, %v4304_v24 }
 0x409   : > { %v6543_v32 = vpop.eup %6542  ;;  %v4313_v4 = vrot.slane %v6541_v20, %v8316_v48  ;;  %v2999_v53 = vpop.xlane.xlu1 %2998 }
 0x40a   : > { %v4318_v29 = vrot.slane %v6543_v32, %v8324_v57  ;;  %6552 = vrcp.f32 %v2999_v53  ;;  %v3001_v38 = vpop.xlane.xlu0 %3000 }
 0x40b   : > { %v4314_v35 = vsel %vm3985_vm9, %v4313_v4, %v4309_v1  ;;  %6554 = vrcp.f32 %v3001_v38 }
 0x40c   : > { %v6545_v16 = vpop.eup %6544  ;;  %v4319_v61 = vsel %vm3992_vm10, %v4318_v29, %v4314_v35 }
 0x40d   : > { %v6547_v54 = vpop.eup %6546  ;;  %v4323_v28 = vrot.slane %v6545_v16, %v8330_v15  ;;  %v3031_v2 = vpop.xlane.xlu1 %3030 }
 0x40e   : > { %v4328_v55 = vrot.slane %v6547_v54, %v8334_v30  ;;  %6556 = vrcp.f32 %v3031_v2  ;;  %v3033_v31 = vpop.xlane.xlu0 %3032 }
 0x40f   : > { %v4324_v58 = vsel %vm3999_vm11, %v4323_v28, %v4319_v61  ;;  %6558 = vrcp.f32 %v3033_v31 }
 0x410   : > { %v6549_v0 = vpop.eup %6548  ;;  %v8544_v33 = vsel %vm4006_vm12, %v4328_v55, %v4324_v58 }
 0x411   : > { %v6551_v60 = vpop.eup %6550  ;;  %v4348_v51 = vrot.slane %v6549_v0, %v8257_v5  ;;  %v2971_v18 = vpop.xlane.xlu1 %2970 }
 0x412   : > { %v4352_v11 = vrot.slane %v6551_v60, %v8260_v34  ;;  %6560 = vrcp.f32 %v2971_v18  ;;  %v3003_v42 = vpop.xlane.xlu0 %3002  ;;  %v8548_v43 = vpop.f32.mrb[68].mxu0 }
 0x413   : > { %6562 = vrcp.f32 %v3003_v42  ;;  %v8550_v49 = vpop.f32.mrb[69].mxu0 }
 0x414   : > { %v6553_v22 = vpop.eup %6552  ;;  %v4353_v47 = vsel %vm3929_vm1, %v4352_v11, %v4348_v51 }
 0x415   : > { %v6555_v8 = vpop.eup %6554  ;;  %v4427_v40 = vrot.slane %v6553_v22, %v8257_v5  ;;  %v3035_v36 = vpop.xlane.xlu1 %3034 }
 0x416   : > { %v4431_v56 = vrot.slane %v6555_v8, %v8260_v34  ;;  %6564 = vrcp.f32 %v3035_v36  ;;  %v2973_v21 = vpop.xlane.xlu0 %2972  ;;  %v8555_v25 = vpop.f32.mrb[68].mxu1 }
 0x417   : > { %6566 = vrcp.f32 %v2973_v21  ;;  %v8557_v19 = vpop.f32.mrb[69].mxu1 }
 0x418   : > { %v6557_v62 = vpop.eup %6556  ;;  %v4432_v26 = vsel %vm3929_vm1, %v4431_v56, %v4427_v40 }
 0x419   : > { %v6559_v45 = vpop.eup %6558  ;;  %v4506_v50 = vrot.slane %v6557_v62, %v8257_v5  ;;  %v3005_v59 = vpop.xlane.xlu1 %3004 }
 0x41a   : > { %v4510_v7 = vrot.slane %v6559_v45, %v8260_v34  ;;  %6568 = vrcp.f32 %v3005_v59  ;;  %v3037_v9 = vpop.xlane.xlu0 %3036 }
 0x41b   : > { %6570 = vrcp.f32 %v3037_v9 }
 0x41c   : > { %v6561_v6 = vpop.eup %6560  ;;  %v4511_v3 = vsel %vm3929_vm1, %v4510_v7, %v4506_v50 }
 0x41d   : > { %v6563_v46 = vpop.eup %6562  ;;  %v4357_v37 = vrot.slane %v6561_v6, %v8263_v10  ;;  %v2975_v13 = vpop.xlane.xlu1 %2974 }
 0x41e   : > { %v4436_v63 = vrot.slane %v6563_v46, %v8263_v10  ;;  %v3007_v24 = vpop.xlane.xlu0 %3006  ;;  %6572 = vrcp.f32 %v2975_v13 }
 0x41f   : > { %v4358_v20 = vsel %vm3936_vm2, %v4357_v37, %v4353_v47  ;;  %6574 = vrcp.f32 %v3007_v24 }
 0x420   : > { %v6565_v1 = vpop.eup %6564  ;;  %v4437_v5 = vsel %vm3936_vm2, %v4436_v63, %v4432_v26 }
 0x421   : > { %v6567_v32 = vpop.eup %6566  ;;  %v4515_v34 = vrot.slane %v6565_v1, %v8263_v10  ;;  %v3039_v4 = vpop.xlane.xlu1 %3038 }
 0x422   : > { %v4362_v53 = vrot.slane %v6567_v32, %v8269_v44  ;;  %v2977_v29 = vpop.xlane.xlu0 %2976  ;;  %6576 = vrcp.f32 %v3039_v4 }
 0x423   : > { %v4516_v38 = vsel %vm3936_vm2, %v4515_v34, %v4511_v3  ;;  %6578 = vrcp.f32 %v2977_v29 }
 0x424   : > { %v6569_v35 = vpop.eup %6568  ;;  %v8571_v16 = vsel %vm3943_vm3, %v4362_v53, %v4358_v20 }
 0x425   : > { %v6571_v61 = vpop.eup %6570  ;;  %v4441_v54 = vrot.slane %v6569_v35, %v8269_v44  ;;  %v3009_v28 = vpop.xlane.xlu1 %3008 }
 0x426   : > { %v4520_v2 = vrot.slane %v6571_v61, %v8269_v44  ;;  %v3041_v55 = vpop.xlane.xlu0 %3040  ;;  %6580 = vrcp.f32 %v3009_v28 }
 0x427   : > { %v8576_v31 = vsel %vm3943_vm3, %v4441_v54, %v4437_v5  ;;  %6582 = vrcp.f32 %v3041_v55 }
 0x428   : > { %v8579_v10 = vsel %vm3943_vm3, %v4520_v2, %v4516_v38  ;;  %v6573_v50 = vpop.eup %6572 }
 0x429   : > { %v2979_v58 = vpop.xlane.xlu1 %2978  ;;  %v8581_v59 = vpop.eup %6574 }
 0x42a   : > { %v3011_v0 = vpop.xlane.xlu0 %3010  ;;  %6584 = vrcp.f32 %v2979_v58 }
 0x42b   : > { %6586 = vrcp.f32 %v3011_v0 }
 0x42c   : > { %v8583_v9 = vpop.eup %6576 }
 0x42d   : > { %v3043_v60 = vpop.xlane.xlu1 %3042  ;;  %v8585_v3 = vpop.eup %6578 }
 0x42e   : > { %v2981_v51 = vpop.xlane.xlu0 %2980  ;;  %6588 = vrcp.f32 %v3043_v60 }
 0x42f   : > { %6590 = vrcp.f32 %v2981_v51  ;;  %v4367_v51 = vrot.slane %v6573_v50, %v8272_v17 }
 0x430   : > { %v8587_v46 = vpop.eup %6580 }
 0x431   : > { %v3013_v18 = vpop.xlane.xlu1 %3012  ;;  %v8589_v37 = vpop.eup %6582 }
 0x432   : > { %v3045_v11 = vpop.xlane.xlu0 %3044  ;;  %6592 = vrcp.f32 %v3013_v18 }
 0x433   : > { %6594 = vrcp.f32 %v3045_v11  ;;  %v4446_v11 = vrot.slane %v8581_v59, %v8272_v17 }
 0x434   : > { %v8591_v63 = vpop.eup %6584 }
 0x435   : > { %v2983_v42 = vpop.xlane.xlu1 %2982  ;;  %v8595_v1 = vpop.eup %6586 }
 0x436   : > { %v3015_v22 = vpop.xlane.xlu0 %3014  ;;  %6596 = vrcp.f32 %v2983_v42  ;;  %v4456_v50 = vrot.slane %v8595_v1, %v8295_v14 }
 0x437   : > { %6598 = vrcp.f32 %v3015_v22 }
 0x438   : > { %v8599_v32 = vpop.eup %6588 }
 0x439   : > { %v3047_v47 = vpop.xlane.xlu1 %3046  ;;  %v8601_v34 = vpop.eup %6590 }
 0x43a   : > { %v2985_v8 = vpop.xlane.xlu0 %2984  ;;  %6600 = vrcp.f32 %v3047_v47  ;;  %v4525_v47 = vrot.slane %v8583_v9, %v8272_v17  ;;  %v4535_v9 = vrot.slane %v8599_v32, %v8295_v14 }
 0x43b   : > { %6602 = vrcp.f32 %v2985_v8  ;;  %v4372_v8 = vrot.slane %v8585_v3, %v8287_v27 }
 0x43c   : > { %v8603_v53 = vpop.eup %6592 }
 0x43d   : > { %v3017_v40 = vpop.xlane.xlu1 %3016  ;;  %v8607_v35 = vpop.eup %6594 }
 0x43e   : > { %v3049_v36 = vpop.xlane.xlu0 %3048  ;;  %6604 = vrcp.f32 %v3017_v40 }
 0x43f   : > { %6606 = vrcp.f32 %v3049_v36 }
 0x440   : > { %v8611_v54 = vpop.eup %6596 }
 0x441   : > { %v2987_v44 = vpop.xlane.xlu1 %2986  ;;  %v8613_v28 = vpop.eup %6598 }
 0x442   : > { %v3019_v56 = vpop.xlane.xlu0 %3018  ;;  %6608 = vrcp.f32 %v2987_v44  ;;  %v4451_v44 = vrot.slane %v8587_v46, %v8287_v27  ;;  %v4382_v46 = vrot.slane %v8601_v34, %v8302_v23  ;;  %v4466_v34 = vrot.slane %v8613_v28, %v8305_v12 }
 0x443   : > { %6610 = vrcp.f32 %v3019_v56 }
 0x444   : > { %v8615_v55 = vpop.eup %6600 }
 0x445   : > { %v3051_v21 = vpop.xlane.xlu1 %3050  ;;  %v8617_v0 = vpop.eup %6602 }
 0x446   : > { %v2989_v62 = vpop.xlane.xlu0 %2988  ;;  %6612 = vrcp.f32 %v3051_v21  ;;  %v4368_v21 = vsel %vm3950_vm4, %v4367_v51, %v8571_v16  ;;  %v4526_v16 = vsel %vm3950_vm4, %v4525_v47, %v8579_v10 }
 0x447   : > { %6614 = vrcp.f32 %v2989_v62  ;;  %v4530_v62 = vrot.slane %v8589_v37, %v8287_v27  ;;  %v4373_v27 = vsel %vm3957_vm5, %v4372_v8, %v4368_v21  ;;  %v4461_v37 = vrot.slane %v8603_v53, %v8302_v23 }
 0x448   : > { %v8619_v60 = vpop.eup %6604 }
 0x449   : > { %v3021_v26 = vpop.xlane.xlu1 %3020  ;;  %v8622_v18 = vpop.eup %6606  ;;  %v4531_v10 = vsel %vm3957_vm5, %v4530_v62, %v4526_v16  ;;  %v4471_v28 = vrot.slane %v8619_v60, %v8316_v48 }
 0x44a   : > { %v3053_v45 = vpop.xlane.xlu0 %3052  ;;  %6616 = vrcp.f32 %v3021_v26  ;;  %v4447_v26 = vsel %vm3950_vm4, %v4446_v11, %v8576_v31 }
 0x44b   : > { %6618 = vrcp.f32 %v3053_v45  ;;  %v4377_v45 = vrot.slane %v8591_v63, %v8295_v14  ;;  %v4452_v3 = vsel %vm3957_vm5, %v4451_v44, %v4447_v26  ;;  %v4540_v63 = vrot.slane %v8607_v35, %v8302_v23 }
 0x44c   : > { %v8626_v22 = vpop.eup %6608  ;;  %v4387_v14 = vrot.slane %v8611_v54, %v8305_v12  ;;  %v4457_v32 = vsel %vm3964_vm6, %v4456_v50, %v4452_v3  ;;  %v4545_v23 = vrot.slane %v8615_v55, %v8305_v12  ;;  %v4392_v35 = vrot.slane %v8617_v0, %v8316_v48 }
 0x44d   : > { %v2991_v7 = vpop.xlane.xlu1 %2990  ;;  %v8632_v36 = vpop.eup %6610  ;;  %v4378_v1 = vsel %vm3964_vm6, %v4377_v45, %v4373_v27  ;;  %v4462_v51 = vsel %vm3971_vm7, %v4461_v37, %v4457_v32  ;;  %v4550_v12 = vrot.slane %v8622_v18, %v8316_v48  ;;  %v4397_v55 = vrot.slane %v8626_v22, %v8324_v57 }
 0x44e   : > { %v3023_v6 = vpop.xlane.xlu0 %3022  ;;  %6620 = vrcp.f32 %v2991_v7  ;;  %v4467_v8 = vsel %vm3978_vm8, %v4466_v34, %v4462_v51 }
 0x44f   : > { %6622 = vrcp.f32 %v3023_v6 }
 0x450   : > { %v8636_v56 = vpop.eup %6612 }
 0x451   : > { %v3055_v13 = vpop.xlane.xlu1 %3054  ;;  %v8642_v17 = vpop.eup %6614  ;;  %v4555_v60 = vrot.slane %v8636_v56, %v8324_v57  ;;  %v4472_v56 = vsel %vm3985_vm9, %v4471_v28, %v4467_v8 }
 0x452   : > { %v2961_v24 = vpop.xlane.xlu0 %2960  ;;  %v8593_v20 = vpop.f32.mrb[70].mxu0  ;;  %6624 = vrcp.f32 %v3055_v13  ;;  %v4402_v44 = vrot.slane %v8642_v17, %v8330_v15 }
 0x453   : > { %v8597_v5 = vpop.f32.mrb[71].mxu0  ;;  %6626 = vrcp.f32 %v2961_v24 }
 0x454   : > { %v8650_v7 = vpop.eup %6616 }
 0x455   : > { %v2993_v4 = vpop.xlane.xlu1 %2992  ;;  %v8657_v6 = vpop.eup %6618  ;;  %v4481_v45 = vrot.slane %v8650_v7, %v8330_v15 }
 0x456   : > { %v3025_v29 = vpop.xlane.xlu0 %3024  ;;  %v8605_v38 = vpop.f32.mrb[70].mxu1  ;;  %v4560_v7 = vrot.slane %v8657_v6, %v8330_v15 }
 0x457   : > { %v8609_v61 = vpop.f32.mrb[71].mxu1 }
 0x458   : > { %v6621_v13 = vpop.eup %6620 }
 0x459   : > { %v3057_v2 = vpop.xlane.xlu1 %3056  ;;  %v8669_v24 = vpop.eup %6622 }
 0x45a   : > { %v2963_v58 = vpop.xlane.xlu0 %2962 }
 0x45b   : > { %6628 = vrcp.f32 %v2963_v58  ;;  %v4383_v58 = vsel %vm3971_vm7, %v4382_v46, %v4378_v1 }
 0x45c   : > { %6630 = vrcp.f32 %v2993_v4  ;;  %v8675_v53 = vpop.eup %6624  ;;  %v4388_v47 = vsel %vm3978_vm8, %v4387_v14, %v4383_v58 }
 0x45d   : > { %v2995_v42 = vpop.xlane.xlu1 %2994  ;;  %6632 = vrcp.f32 %v3025_v29  ;;  %v4536_v29 = vsel %vm3964_vm6, %v4535_v9, %v4531_v10  ;;  %v4393_v48 = vsel %vm3985_vm9, %v4392_v35, %v4388_v47 }
 0x45e   : > { %v3027_v40 = vpop.xlane.xlu0 %3026  ;;  %6634 = vrcp.f32 %v2995_v42  ;;  %v4541_v42 = vsel %vm3971_vm7, %v4540_v63, %v4536_v29  ;;  %v4398_v50 = vsel %vm3992_vm10, %v4397_v55, %v4393_v48 }
 0x45f   : > { %6636 = vrcp.f32 %v3027_v40  ;;  %v4476_v40 = vrot.slane %v8632_v36, %v8324_v57  ;;  %v4546_v26 = vsel %vm3978_vm8, %v4545_v23, %v4541_v42  ;;  %v4407_v36 = vrot.slane %v6621_v13, %v8334_v30 }
 0x460   : > { %v4551_v27 = vsel %vm3985_vm9, %v4550_v12, %v4546_v26 }
 0x461   : > { %v3059_v59 = vpop.xlane.xlu1 %3058  ;;  %v4477_v3 = vsel %vm3992_vm10, %v4476_v40, %v4472_v56  ;;  %v4556_v46 = vsel %vm3992_vm10, %v4555_v60, %v4551_v27 }
 0x462   : > { %v2965_v31 = vpop.xlane.xlu0 %2964  ;;  %v4482_v15 = vsel %vm3999_vm11, %v4481_v45, %v4477_v3 }
 0x463   : > { %6638 = vrcp.f32 %v2965_v31  ;;  %v4403_v31 = vsel %vm3999_vm11, %v4402_v44, %v4398_v50 }
 0x464   : > { %6640 = vrcp.f32 %v3057_v2  ;;  %v6627_v2 = vpop.eup %6626  ;;  %v4408_v1 = vsel %vm4006_vm12, %v4407_v36, %v4403_v31 }
 0x465   : > { %6642 = vrcp.f32 %v3059_v59  ;;  %v2997_v4 = vpop.xlane.xlu1 %2996  ;;  %v6629_v11 = vpop.eup %6628  ;;  %v4333_v18 = vrot.slane %v6627_v2, %v8345_v52  ;;  %v4486_v59 = vrot.slane %v8669_v24, %v8334_v30 }
 0x466   : > { %6644 = vrcp.f32 %v2997_v4  ;;  %v3029_v54 = vpop.xlane.xlu0 %3028  ;;  %v6631_v0 = vpop.eup %6630  ;;  %v4338_v57 = vrot.slane %v6629_v11, %v8351_v39 }
 0x467   : > { %6646 = vrcp.f32 %v3029_v54  ;;  %v6633_v62 = vpop.eup %6632  ;;  %v4412_v16 = vrot.slane %v6631_v0, %v8345_v52  ;;  %v4334_v13 = vsel %vm4013_vm13, %v4333_v18, %v8544_v33  ;;  %v4565_v33 = vrot.slane %v8675_v53, %v8334_v30 }
 0x468   : > { %v6635_v22 = vpop.eup %6634  ;;  %v4491_v14 = vrot.slane %v6633_v62, %v8345_v52  ;;  %v4339_v32 = vsel %vm4020_vm14, %v4338_v57, %v4334_v13  ;;  %v4487_v23 = vsel %vm4006_vm12, %v4486_v59, %v4482_v15 }
 0x469   : > { %v3061_v21 = vpop.xlane.xlu1 %3060  ;;  %v6637_v17 = vpop.eup %6636  ;;  %v4417_v10 = vrot.slane %v6635_v22, %v8351_v39  ;;  %v4413_v4 = vsel %vm4013_vm13, %v4412_v16, %v4408_v1 }
 0x46a   : > { %6648 = vrcp.f32 %v3061_v21  ;;  %v4496_v6 = vrot.slane %v6637_v17, %v8351_v39  ;;  %v4492_v30 = vsel %vm4013_vm13, %v4491_v14, %v4487_v23 }
 0x46b   : > { %v4418_v28 = vsel %vm4020_vm14, %v4417_v10, %v4413_v4 }
 0x46d   : > { %v6639_v9 = vpop.eup %6638 }
 0x46e   : > { %v6641_v37 = vpop.eup %6640  ;;  %v4343_v63 = vrot.slane %v6639_v9, %v8358_v41 }
 0x46f   : > { %v6643_v24 = vpop.eup %6642  ;;  %v4570_v51 = vrot.slane %v6641_v37, %v8345_v52  ;;  %v4561_v52 = vsel %vm3999_vm11, %v4560_v7, %v4556_v46 }
 0x470   : > { %v6645_v34 = vpop.eup %6644  ;;  %v4344_v29 = vsel %vm4027_vm15, %v4343_v63, %v4339_v32  ;;  %v4575_v11 = vrot.slane %v6643_v24, %v8351_v39  ;;  %v4566_v39 = vsel %vm4006_vm12, %v4565_v33, %v4561_v52 }
 0x471   : > { %v6647_v35 = vpop.eup %6646  ;;  %v4652_v54 = vmul.f32 %v4344_v29, %v8550_v49  ;;  %v4653_v2 = vmul.f32 %v8548_v43, %v4344_v29  ;;  %v4422_v58 = vrot.slane %v6645_v34, %v8358_v41  ;;  %v4497_v49 = vsel %vm4020_vm14, %v4496_v6, %v4492_v30 }
 0x472   : > { %v4501_v53 = vrot.slane %v6647_v35, %v8358_v41  ;;  %v4571_v40 = vsel %vm4013_vm13, %v4570_v51, %v4566_v39 }
 0x473   : > { %4668 = vst [vmem:[%s8378_s24 + $0x40] sm:$0xff] %v4652_v54  ;;  %4669 = vst [vmem:[%s8378_s24 + $0x48] sm:$0xff] %v4653_v2  ;;  %v4423_v43 = vsel %vm4027_vm15, %v4422_v58, %v4418_v28 }
 0x474   : > { %v6649_v42 = vpop.eup %6648  ;;  %v4654_v47 = vmul.f32 %v4423_v43, %v8557_v19  ;;  %v4655_v12 = vmul.f32 %v8555_v25, %v4423_v43  ;;  %v4502_v55 = vsel %vm4027_vm15, %v4501_v53, %v4497_v49  ;;  %v4576_v25 = vsel %vm4020_vm14, %v4575_v11, %v4571_v40 }
 0x475   : > { %v4657_v0 = vmul.f32 %v8593_v20, %v4502_v55  ;;  %v4656_v8 = vmul.f32 %v4502_v55, %v8597_v5  ;;  %v4580_v60 = vrot.slane %v6649_v42, %v8358_v41 }
 0x476   : > { %4670 = vst [vmem:[%s8378_s24 + $0x50] sm:$0xff] %v4654_v47  ;;  %4671 = vst [vmem:[%s8378_s24 + $0x58] sm:$0xff] %v4655_v12 }
 0x477   : > { %4673 = vst [vmem:[%s8378_s24 + $0x68] sm:$0xff] %v4657_v0  ;;  %4672 = vst [vmem:[%s8378_s24 + $0x60] sm:$0xff] %v4656_v8  ;;  %v4581_v19 = vsel %vm4027_vm15, %v4580_v60, %v4576_v25 }
 0x478   : > { %v4659_v41 = vmul.f32 %v8605_v38, %v4581_v19  ;;  %v4658_v20 = vmul.f32 %v4581_v19, %v8609_v61 }
 0x47a   : > { %4675 = vst [vmem:[%s8378_s24 + $0x78] sm:$0xff] %v4659_v41  ;;  %4674 = vst [vmem:[%s8378_s24 + $0x70] sm:$0xff] %v4658_v20 }
 0x47b   : > { %6755 = shalt.err (!%p6752_p13)
}
 0x47c   : > { %s6756_s16 = scalar_lea.hbm %s8763_s1, 2048  ;;  %s6760_s22 = scalar_lea.hbm %s8821_s3, 4096 }
 0x47d   : > { %p6757_p11 = scmp.ne.s32.totalorder %s8763_s1, %s6756_s16  ;;  %p6761_p6 = scmp.lt.u32.totalorder %s8763_s1, %s8821_s3 }
 0x47e   : > { %p6762_p3 = scmp.lt.u32.totalorder %s6760_s22, %s6756_s16  ;;  %p6764_p0 = scmp.lt.u32.totalorder %s6756_s16, %s8763_s1 }
 0x47f   : > { %p6758_p5 = pnand %p6757_p11, %p9108_p7 }
 0x480   : > { %p6763_p2 = por %p6762_p3, %p6761_p6 }
 0x481   : > { %p6759_p4 = pneg %p6758_p5 }
 0x482   : > { %p6765_p8 = por %p6764_p0, %p6763_p2 }
 0x484   : > { %p6766_p9 = pnand %p6765_p8, %p6759_p4 }
 0x486   : > { %6769 = shalt.err (!%p6766_p9)
}
 0x487   : > { %s6836_s19 = smov 128   ;;  %s6837_s7 = smov 8  }
 0x488   : > { %6067 = dma.vmem_to_hbm [thread:$0]  (%p9108_p7), %s8765_s23, 2048, %s8763_s1, %s4677_s8, %s6836_s19, %s6836_s19, %s6837_s7  }
 0x489 PF: > { %s4708_s20 = sand.u32 1, %s6808_s12   ;;  %p9109_p12 = scmp.ne.s32.totalorder %s8924_s27, 0 }
 0x48a   : > { %p9110_p1 = scmp.ge.s32.totalorder %s6828_s17, 2  ;;  %s4709_s18 = scalar_lea.sflag [#allocation4], %s4708_s20 }
 0x48c   : > { %p6080_p10 = pnand %p9110_p1, %p9109_p12 }
 0x48e   : > { %6803 = dma.done.wait (!%p6080_p10), %s4709_s18, 2048  }
 0x48f   : > { %6805 = vsyncadd (!%p6080_p10), %s4709_s18, 4294965248  ;;  %s22_s17 = sadd.s32 1, %s6828_s17   ;;  %s9111_s15 = sld [smem:[#allocation12_spill]] }
 0x490   : > { %p19_p13 = scmp.ge.s32.totalorder %s22_s17, 4   ;;  %s9112_s16 = sld [smem:[#allocation13_spill]] }
 0x491   : > { %s9113_s12 = smov %s6812_s13  ;;  %s9114_s13 = smov %s6816_s14 }
 0x492   : > { %s9115_s14 = smov %s6918_s26  ;;  %21 = sbr.rel (!%p19_p13) target bundleno = 11 (0xb), region = 101 }
 0x499   :  { %4714 = vsyncpa [#allocation3], 1 }
 0x49a   :  { %4716 = vsyncpa [#allocation3 + $0x1], 1 }
 0x49b   :  { %4717 = vsyncpa [#allocation6], 1 }
 0x49c   :  { %4719 = vsyncpa [#allocation6 + $0x1], 1 }
 0x49d   :  { %4720 = vsyncpa [#allocation4], 1 }
 0x49e   :  { %4722 = vsyncpa [#allocation4 + $0x1], 1 }

</bundles_post_ra>
